<compile_context>
chip_gen: v7x
topology: tpu7x:2x2x1
jax: 0.10.0
libtpu: 0.0.40
codegen_flags: <defaults>
</compile_context>

<pallas_src>
import math

import jax
import jax.numpy as jnp
from jax.experimental import pallas as pl
from jax.experimental.pallas import tpu as pltpu

LANE = 128
SUBLANE = 8


def _round_up(n, m):
    return ((n + m - 1) // m) * m


def _pad2d(a, rows, cols):
    r, c = a.shape
    return jnp.pad(a, ((0, rows - r), (0, cols - c)))


def mlp_kernel(x_ref, w1_ref, b1_ref, w2_ref, b2_ref, w3_ref, b3_ref,
               w4_ref, b4_ref, o_ref):
    """Fused 4-layer MLP on one (TM, Din_p) row tile of the batch."""
    h = jnp.dot(x_ref[...], w1_ref[...], preferred_element_type=jnp.float32)
    h = jnp.tanh(h + b1_ref[...])
    h = jnp.dot(h, w2_ref[...], preferred_element_type=jnp.float32)
    h = jnp.tanh(h + b2_ref[...])
    h = jnp.dot(h, w3_ref[...], preferred_element_type=jnp.float32)
    h = jnp.tanh(h + b3_ref[...])
    o = jnp.dot(h, w4_ref[...], preferred_element_type=jnp.float32) + b4_ref[...]
    o_ref[...] = o.astype(o_ref.dtype)


def vector_embedding_forward(x, params, *, row_tile=128):
    """Pallas forward pass. params = [(W1,b1),(W2,b2),(W3,b3),(W4,b4)], W: (in,out)."""
    (w1, b1), (w2, b2), (w3, b3), (w4, b4) = params
    B, Din = x.shape
    H1, H2, H3, Dout = w1.shape[1], w2.shape[1], w3.shape[1], w4.shape[1]

    # Pad all feature dims to lane multiples (MXU-native, lane-dense stores).
    Din_p = _round_up(Din, LANE)
    H1_p = _round_up(H1, LANE)
    H2_p = _round_up(H2, LANE)
    H3_p = _round_up(H3, LANE)
    Dout_p = _round_up(Dout, LANE)

    # Batch tiling: one tile if the batch is small, otherwise 128-row tiles.
    if B <= row_tile:
        TM = _round_up(B, SUBLANE)
        B_p = TM
    else:
        TM = row_tile
        B_p = _round_up(B, TM)

    f32 = jnp.float32
    xf = jnp.pad(x.astype(f32), ((0, B_p - B), (0, Din_p - Din)))
    w1p = _pad2d(w1.astype(f32), Din_p, H1_p)
    w2p = _pad2d(w2.astype(f32), H1_p, H2_p)
    w3p = _pad2d(w3.astype(f32), H2_p, H3_p)
    w4p = _pad2d(w4.astype(f32), H3_p, Dout_p)
    b1p = _pad2d(b1.reshape(1, -1).astype(f32), 1, H1_p)
    b2p = _pad2d(b2.reshape(1, -1).astype(f32), 1, H2_p)
    b3p = _pad2d(b3.reshape(1, -1).astype(f32), 1, H3_p)
    b4p = _pad2d(b4.reshape(1, -1).astype(f32), 1, Dout_p)

    grid = (B_p // TM,)
    out = pl.pallas_call(
        mlp_kernel,
        out_shape=jax.ShapeDtypeStruct((B_p, Dout_p), f32),
        grid_spec=pltpu.PrefetchScalarGridSpec(
            num_scalar_prefetch=0,
            grid=grid,
            in_specs=[
                pl.BlockSpec((TM, Din_p), lambda i: (i, 0)),     # x row tile
                pl.BlockSpec((Din_p, H1_p), lambda i: (0, 0)),   # W1 (resident)
                pl.BlockSpec((1, H1_p), lambda i: (0, 0)),       # b1
                pl.BlockSpec((H1_p, H2_p), lambda i: (0, 0)),    # W2
                pl.BlockSpec((1, H2_p), lambda i: (0, 0)),       # b2
                pl.BlockSpec((H2_p, H3_p), lambda i: (0, 0)),    # W3
                pl.BlockSpec((1, H3_p), lambda i: (0, 0)),       # b3
                pl.BlockSpec((H3_p, Dout_p), lambda i: (0, 0)),  # W4
                pl.BlockSpec((1, Dout_p), lambda i: (0, 0)),     # b4
            ],
            out_specs=pl.BlockSpec((TM, Dout_p), lambda i: (i, 0)),
        ),
        compiler_params=pltpu.CompilerParams(
            dimension_semantics=("parallel",),
        ),
    )(xf, w1p, b1p, w2p, b2p, w3p, b3p, w4p, b4p)
    return out[:B, :Dout]


def init_params(key, input_dim, latent_dim):
    """PyTorch nn.Linear-style uniform(-1/sqrt(fan_in), 1/sqrt(fan_in)) init."""
    dims = [input_dim, 500, 500, 2000, latent_dim]
    keys = jax.random.split(key, len(dims) - 1)
    params = []
    for k, fi, fo in zip(keys, dims[:-1], dims[1:]):
        kw, kb = jax.random.split(k)
        bound = 1.0 / math.sqrt(fi)
        w = jax.random.uniform(kw, (fi, fo), jnp.float32, -bound, bound)
        b = jax.random.uniform(kb, (fo,), jnp.float32, -bound, bound)
        params.append((w, b))
    return params


def reference(x, params):
    """Pure-JAX transcription of the PyTorch forward, for verification."""
    (w1, b1), (w2, b2), (w3, b3), (w4, b4) = params
    hp = jax.lax.Precision.HIGHEST
    h = jnp.tanh(jnp.dot(x, w1, precision=hp, preferred_element_type=jnp.float32) + b1)
    h = jnp.tanh(jnp.dot(h, w2, precision=hp, preferred_element_type=jnp.float32) + b2)
    h = jnp.tanh(jnp.dot(h, w3, precision=hp, preferred_element_type=jnp.float32) + b3)
    return jnp.dot(h, w4, precision=hp, preferred_element_type=jnp.float32) + b4


if __name__ == "__main__":
    key = jax.random.PRNGKey(0)
    kx, kp = jax.random.split(key)

    batch, input_dim, latent_dim = 8, 32, 10
    x = jax.random.normal(kx, (batch, input_dim), jnp.float32)
    params = init_params(kp, input_dim, latent_dim)

    out = vector_embedding_forward(x, params)
    out = jax.block_until_ready(out)

    ref = reference(x, params)
    assert out.shape == (batch, latent_dim), out.shape
    assert jnp.allclose(out, ref, atol=2e-3, rtol=2e-3), (out, ref)
    print("KERNEL_OK")
</pallas_src>

<mosaic_0001>
module attributes {stable_mosaic.version = 11 : i64} {
  func.func @mlp_kernel(%arg0: i32, %arg1: memref<8x128xf32, #tpu.memory_space<vmem>>, %arg2: memref<128x512xf32, #tpu.memory_space<vmem>>, %arg3: memref<1x512xf32, #tpu.memory_space<vmem>>, %arg4: memref<512x512xf32, #tpu.memory_space<vmem>>, %arg5: memref<1x512xf32, #tpu.memory_space<vmem>>, %arg6: memref<512x2048xf32, #tpu.memory_space<vmem>>, %arg7: memref<1x2048xf32, #tpu.memory_space<vmem>>, %arg8: memref<2048x128xf32, #tpu.memory_space<vmem>>, %arg9: memref<1x128xf32, #tpu.memory_space<vmem>>, %arg10: memref<8x128xf32, #tpu.memory_space<vmem>>) attributes {dimension_semantics = [#tpu.dimension_semantics<parallel>], iteration_bounds = array<i64: 1>, scalar_prefetch = 0 : i64, scratch_operands = 0 : i64, tpu.core_type = #tpu.core_type<tc>, window_params = [{transform_indices = @transform_0, window_bounds = array<i64: 8, 128>}, {pipeline_mode = #tpu.pipeline_mode<synchronous>, transform_indices = @transform_1, window_bounds = array<i64: 128, 512>}, {pipeline_mode = #tpu.pipeline_mode<synchronous>, transform_indices = @transform_2, window_bounds = array<i64: 1, 512>}, {pipeline_mode = #tpu.pipeline_mode<synchronous>, transform_indices = @transform_3, window_bounds = array<i64: 512, 512>}, {pipeline_mode = #tpu.pipeline_mode<synchronous>, transform_indices = @transform_4, window_bounds = array<i64: 1, 512>}, {pipeline_mode = #tpu.pipeline_mode<synchronous>, transform_indices = @transform_5, window_bounds = array<i64: 512, 2048>}, {pipeline_mode = #tpu.pipeline_mode<synchronous>, transform_indices = @transform_6, window_bounds = array<i64: 1, 2048>}, {pipeline_mode = #tpu.pipeline_mode<synchronous>, transform_indices = @transform_7, window_bounds = array<i64: 2048, 128>}, {pipeline_mode = #tpu.pipeline_mode<synchronous>, transform_indices = @transform_8, window_bounds = array<i64: 1, 128>}, {transform_indices = @transform_9, window_bounds = array<i64: 8, 128>}]} {
    %c0 = arith.constant 0 : index
    %c0_0 = arith.constant 0 : index
    %0 = vector.load %arg1[%c0, %c0_0] : memref<8x128xf32, #tpu.memory_space<vmem>>, vector<8x128xf32>
    %c0_1 = arith.constant 0 : index
    %c0_2 = arith.constant 0 : index
    %1 = vector.load %arg2[%c0_1, %c0_2] : memref<128x512xf32, #tpu.memory_space<vmem>>, vector<128x512xf32>
    %cst = arith.constant dense<0.000000e+00> : vector<8x512xf32>
    %2 = tpu.matmul %0, %1, %cst {dimension_numbers = #tpu.dot_dimension_numbers<[1], [0], [0], [1], [0, 0, 1, 1], [], []>} : vector<8x128xf32>, vector<128x512xf32>, vector<8x512xf32> -> vector<8x512xf32>
    %c0_3 = arith.constant 0 : index
    %c0_4 = arith.constant 0 : index
    %3 = vector.load %arg3[%c0_3, %c0_4] : memref<1x512xf32, #tpu.memory_space<vmem>>, vector<1x512xf32>
    %4 = vector.broadcast %3 : vector<1x512xf32> to vector<8x512xf32>
    %5 = arith.addf %2, %4 : vector<8x512xf32>
    %6 = math.tanh %5 : vector<8x512xf32>
    %c0_5 = arith.constant 0 : index
    %c0_6 = arith.constant 0 : index
    %7 = vector.load %arg4[%c0_5, %c0_6] : memref<512x512xf32, #tpu.memory_space<vmem>>, vector<512x512xf32>
    %cst_7 = arith.constant dense<0.000000e+00> : vector<8x512xf32>
    %8 = tpu.matmul %6, %7, %cst_7 {dimension_numbers = #tpu.dot_dimension_numbers<[1], [0], [0], [1], [0, 0, 1, 1], [], []>} : vector<8x512xf32>, vector<512x512xf32>, vector<8x512xf32> -> vector<8x512xf32>
    %c0_8 = arith.constant 0 : index
    %c0_9 = arith.constant 0 : index
    %9 = vector.load %arg5[%c0_8, %c0_9] : memref<1x512xf32, #tpu.memory_space<vmem>>, vector<1x512xf32>
    %10 = vector.broadcast %9 : vector<1x512xf32> to vector<8x512xf32>
    %11 = arith.addf %8, %10 : vector<8x512xf32>
    %12 = math.tanh %11 : vector<8x512xf32>
    %c0_10 = arith.constant 0 : index
    %c0_11 = arith.constant 0 : index
    %13 = vector.load %arg6[%c0_10, %c0_11] : memref<512x2048xf32, #tpu.memory_space<vmem>>, vector<512x2048xf32>
    %cst_12 = arith.constant dense<0.000000e+00> : vector<8x2048xf32>
    %14 = tpu.matmul %12, %13, %cst_12 {dimension_numbers = #tpu.dot_dimension_numbers<[1], [0], [0], [1], [0, 0, 1, 1], [], []>} : vector<8x512xf32>, vector<512x2048xf32>, vector<8x2048xf32> -> vector<8x2048xf32>
    %c0_13 = arith.constant 0 : index
    %c0_14 = arith.constant 0 : index
    %15 = vector.load %arg7[%c0_13, %c0_14] : memref<1x2048xf32, #tpu.memory_space<vmem>>, vector<1x2048xf32>
    %16 = vector.broadcast %15 : vector<1x2048xf32> to vector<8x2048xf32>
    %17 = arith.addf %14, %16 : vector<8x2048xf32>
    %18 = math.tanh %17 : vector<8x2048xf32>
    %c0_15 = arith.constant 0 : index
    %c0_16 = arith.constant 0 : index
    %19 = vector.load %arg8[%c0_15, %c0_16] : memref<2048x128xf32, #tpu.memory_space<vmem>>, vector<2048x128xf32>
    %cst_17 = arith.constant dense<0.000000e+00> : vector<8x128xf32>
    %20 = tpu.matmul %18, %19, %cst_17 {dimension_numbers = #tpu.dot_dimension_numbers<[1], [0], [0], [1], [0, 0, 1, 1], [], []>} : vector<8x2048xf32>, vector<2048x128xf32>, vector<8x128xf32> -> vector<8x128xf32>
    %c0_18 = arith.constant 0 : index
    %c0_19 = arith.constant 0 : index
    %21 = vector.load %arg9[%c0_18, %c0_19] : memref<1x128xf32, #tpu.memory_space<vmem>>, vector<1x128xf32>
    %22 = vector.broadcast %21 : vector<1x128xf32> to vector<8x128xf32>
    %23 = arith.addf %20, %22 : vector<8x128xf32>
    %c0_20 = arith.constant 0 : index
    %c0_21 = arith.constant 0 : index
    %24 = vector.load %arg10[%c0_20, %c0_21] : memref<8x128xf32, #tpu.memory_space<vmem>>, vector<8x128xf32>
    tpu.vector_store %arg10[%c0_20, %c0_21], %23 {strides = array<i32>} : memref<8x128xf32, #tpu.memory_space<vmem>>, vector<8x128xf32>,
    return
  }
  func.func @transform_0(%arg0: i32) -> (i32, i32) {
    %c0_i32 = arith.constant 0 : i32
    %c0_i32_0 = arith.constant 0 : i32
    return %arg0, %c0_i32 : i32, i32
  }
  func.func @transform_1(%arg0: i32) -> (i32, i32) {
    %c0_i32 = arith.constant 0 : i32
    %c0_i32_0 = arith.constant 0 : i32
    %c0_i32_1 = arith.constant 0 : i32
    return %c0_i32, %c0_i32_0 : i32, i32
  }
  func.func @transform_2(%arg0: i32) -> (i32, i32) {
    %c0_i32 = arith.constant 0 : i32
    %c0_i32_0 = arith.constant 0 : i32
    %c0_i32_1 = arith.constant 0 : i32
    return %c0_i32, %c0_i32_0 : i32, i32
  }
  func.func @transform_3(%arg0: i32) -> (i32, i32) {
    %c0_i32 = arith.constant 0 : i32
    %c0_i32_0 = arith.constant 0 : i32
    %c0_i32_1 = arith.constant 0 : i32
    return %c0_i32, %c0_i32_0 : i32, i32
  }
  func.func @transform_4(%arg0: i32) -> (i32, i32) {
    %c0_i32 = arith.constant 0 : i32
    %c0_i32_0 = arith.constant 0 : i32
    %c0_i32_1 = arith.constant 0 : i32
    return %c0_i32, %c0_i32_0 : i32, i32
  }
  func.func @transform_5(%arg0: i32) -> (i32, i32) {
    %c0_i32 = arith.constant 0 : i32
    %c0_i32_0 = arith.constant 0 : i32
    %c0_i32_1 = arith.constant 0 : i32
    return %c0_i32, %c0_i32_0 : i32, i32
  }
  func.func @transform_6(%arg0: i32) -> (i32, i32) {
    %c0_i32 = arith.constant 0 : i32
    %c0_i32_0 = arith.constant 0 : i32
    %c0_i32_1 = arith.constant 0 : i32
    return %c0_i32, %c0_i32_0 : i32, i32
  }
  func.func @transform_7(%arg0: i32) -> (i32, i32) {
    %c0_i32 = arith.constant 0 : i32
    %c0_i32_0 = arith.constant 0 : i32
    %c0_i32_1 = arith.constant 0 : i32
    return %c0_i32, %c0_i32_0 : i32, i32
  }
  func.func @transform_8(%arg0: i32) -> (i32, i32) {
    %c0_i32 = arith.constant 0 : i32
    %c0_i32_0 = arith.constant 0 : i32
    %c0_i32_1 = arith.constant 0 : i32
    return %c0_i32, %c0_i32_0 : i32, i32
  }
  func.func @transform_9(%arg0: i32) -> (i32, i32) {
    %c0_i32 = arith.constant 0 : i32
    %c0_i32_0 = arith.constant 0 : i32
    return %arg0, %c0_i32 : i32, i32
  }
}

</mosaic_0001>

<bundles_post_ra>
// kernel: tpu_custom_call.1
= control target key start
LH: loop header
LB: loop body
LE: loop exit
PB: predicated region body
PF: predicated region fallthrough
CT: control target
= control target key end

     0   :  { %14 = vsyncpa [#allocation3], 0  ;;  %s6606_s0 = inlined_call_operand.hbm [shape: f32[8,128], index: 0, kind: input, shape index: {}]   ;;  %s6607_s1 = inlined_call_operand.hbm [shape: f32[128,512], index: 1, kind: input, shape index: {}]   ;;  %s6608_s2 = inlined_call_operand.hbm [shape: f32[1,512], index: 2, kind: input, shape index: {}]   ;;  %s6609_s3 = inlined_call_operand.hbm [shape: f32[512,512], index: 3, kind: input, shape index: {}]   ;;  %s6610_s4 = inlined_call_operand.hbm [shape: f32[1,512], index: 4, kind: input, shape index: {}]   ;;  %s6611_s5 = inlined_call_operand.hbm [shape: f32[512,2048], index: 5, kind: input, shape index: {}]   ;;  %s6612_s6 = inlined_call_operand.hbm [shape: f32[1,2048], index: 6, kind: input, shape index: {}]   ;;  %s6613_s7 = inlined_call_operand.hbm [shape: f32[2048,128], index: 7, kind: input, shape index: {}]   ;;  %s6614_s8 = inlined_call_operand.hbm [shape: f32[1,128], index: 8, kind: input, shape index: {}]   ;;  %s6615_s9 = inlined_call_operand.hbm [shape: f32[8,128], index: 9, kind: output, shape index: {}]  }
   0x1   :  { %15 = vsyncpa [#allocation6], 0 }
   0x2   :  { %16 = vsyncpa [#allocation9], 0 }
   0x3   :  { %17 = vsyncpa [#allocation12], 0 }
   0x4   :  { %18 = vsyncpa [#allocation15], 0 }
   0x5   :  { %19 = vsyncpa [#allocation4], 0  ;;  %s6264_s30 = smov [#allocation5]   ;;  %s6032_s13 = scalar_lea.hbm %s6607_s1, 8192 }
   0x6   :  { %s35_s10 = sshll.u32 %s6264_s30, 4  ;;  %p6033_p0 = scmp.ne.s32.totalorder %s6607_s1, %s6032_s13  ;;  %s36_s10 = int_to_ptr.vmem [resolvable:$true] %s35_s10 }
   0x7   :  { %p6036_p1 = scmp.lt.u32.totalorder %s6032_s13, %s6607_s1 }
   0x9   :  { %p6038_p2 = pnand %p6036_p1, %p6033_p0 }
   0xb   :  { %6041 = shalt.err (!%p6038_p2)
}
   0xc   :  { %s6042_s18 = scalar_lea.vmem %s36_s10, 8192  ;;  %p6047_p4 = scmp.lt.s32.totalorder %s36_s10, %s36_s10 }
   0xd   :  { %p6043_p3 = scmp.ne.s32.totalorder %s36_s10, %s6042_s18  ;;  %p6048_p5 = scmp.lt.s32.totalorder %s6042_s18, %s6042_s18 }
   0xf   :  { %p6049_p6 = por %p6048_p5, %p6047_p4 }
  0x11   :  { %p6050_p7 = pnand %p6049_p6, %p6043_p3 }
  0x13   :  { %6053 = shalt.err (!%p6050_p7)
}
  0x14   :  { %s6265_s19 = smov 512   ;;  %s6266_s20 = smov 32  }
  0x15   :  { %41 = dma.hbm_to_vmem [thread:$0]  %s6607_s1, 8192, %s36_s10, [#allocation6], %s6265_s19, %s6265_s19, %s6266_s20  }
  0x16   :  { %s6267_s23 = smov [#allocation8]   ;;  %s6268_s25 = smov [#allocation11]  }
  0x17   :  { %s57_s24 = sshll.u32 %s6267_s23, 4  ;;  %s79_s26 = sshll.u32 %s6268_s25, 4  ;;  %s58_s24 = int_to_ptr.vmem [resolvable:$true] %s57_s24  ;;  %s80_s26 = int_to_ptr.vmem [resolvable:$true] %s79_s26 }
  0x18   :  { %s6054_s29 = scalar_lea.hbm %s6609_s3, 32768 }
  0x19   :  { %p6055_p8 = scmp.ne.s32.totalorder %s6609_s3, %s6054_s29  ;;  %p6058_p9 = scmp.lt.u32.totalorder %s6054_s29, %s6609_s3 }
  0x1b   :  { %p6060_p10 = pnand %p6058_p9, %p6055_p8 }
  0x1d   :  { %6063 = shalt.err (!%p6060_p10)
}
  0x1e   :  { %s6064_s1 = scalar_lea.vmem %s58_s24, 32768  ;;  %p6069_p12 = scmp.lt.s32.totalorder %s58_s24, %s58_s24 }
  0x1f   :  { %p6065_p11 = scmp.ne.s32.totalorder %s58_s24, %s6064_s1  ;;  %p6070_p13 = scmp.lt.s32.totalorder %s6064_s1, %s6064_s1 }
  0x21   :  { %p6071_p0 = por %p6070_p13, %p6069_p12 }
  0x23   :  { %p6072_p1 = pnand %p6071_p0, %p6065_p11 }
  0x25   :  { %6075 = shalt.err (!%p6072_p1)
}
  0x26   :  { %63 = dma.hbm_to_vmem [thread:$0]  %s6609_s3, 32768, %s58_s24, [#allocation9], %s6265_s19, %s6265_s19, %s6266_s20  }
  0x27   :  { %s6076_s17 = scalar_lea.hbm %s6611_s5, 131072 }
  0x28   :  { %p6077_p2 = scmp.ne.s32.totalorder %s6611_s5, %s6076_s17  ;;  %p6080_p3 = scmp.lt.u32.totalorder %s6076_s17, %s6611_s5 }
  0x2a   :  { %p6082_p4 = pnand %p6080_p3, %p6077_p2 }
  0x2c   :  { %6085 = shalt.err (!%p6082_p4)
}
  0x2d   :  { %s6086_s25 = scalar_lea.vmem %s80_s26, 131072  ;;  %p6091_p6 = scmp.lt.s32.totalorder %s80_s26, %s80_s26 }
  0x2e   :  { %p6087_p5 = scmp.ne.s32.totalorder %s80_s26, %s6086_s25  ;;  %p6092_p7 = scmp.lt.s32.totalorder %s6086_s25, %s6086_s25 }
  0x30   :  { %p6093_p8 = por %p6092_p7, %p6091_p6 }
  0x32   :  { %p6094_p9 = pnand %p6093_p8, %p6087_p5 }
  0x34   :  { %6097 = shalt.err (!%p6094_p9)
}
  0x35   :  { %s6269_s3 = smov 2048   ;;  %s6270_s19 = smov 128  }
  0x36   :  { %85 = dma.hbm_to_vmem [thread:$0]  %s6611_s5, 131072, %s80_s26, [#allocation12], %s6269_s3, %s6269_s3, %s6270_s19  }
  0x37   :  { %s6271_s27 = smov [#allocation14]   ;;  %s6098_s11 = scalar_lea.hbm %s6613_s7, 32768 }
  0x38   :  { %s101_s28 = sshll.u32 %s6271_s27, 4  ;;  %p6099_p10 = scmp.ne.s32.totalorder %s6613_s7, %s6098_s11  ;;  %s102_s28 = int_to_ptr.vmem [resolvable:$true] %s101_s28 }
  0x39   :  { %p6102_p11 = scmp.lt.u32.totalorder %s6098_s11, %s6613_s7 }
  0x3b   :  { %p6104_p12 = pnand %p6102_p11, %p6099_p10 }
  0x3d   :  { %6107 = shalt.err (!%p6104_p12)
}
  0x3e   :  { %s6108_s14 = scalar_lea.vmem %s102_s28, 32768  ;;  %p6113_p0 = scmp.lt.s32.totalorder %s102_s28, %s102_s28 }
  0x3f   :  { %p6109_p13 = scmp.ne.s32.totalorder %s102_s28, %s6108_s14  ;;  %p6114_p1 = scmp.lt.s32.totalorder %s6108_s14, %s6108_s14 }
  0x41   :  { %p6115_p2 = por %p6114_p1, %p6113_p0 }
  0x43   :  { %p6116_p3 = pnand %p6115_p2, %p6109_p13 }
  0x45   :  { %6119 = shalt.err (!%p6116_p3)
}
  0x46   :  { %s6272_s5 = smov 8   ;;  %s6273_s16 = smov [#allocation2]  }
  0x47   :  { %107 = dma.hbm_to_vmem [thread:$0]  %s6613_s7, 32768, %s102_s28, [#allocation15], %s6270_s19, %s6270_s19, %s6272_s5  }
  0x48   :  { %s26_s17 = sshll.u32 %s6273_s16, 4  ;;  %s6274_s18 = smov [#allocation7]   ;;  %s27_s17 = int_to_ptr.vmem [resolvable:$true] %s26_s17 }
  0x49   :  { %s48_s21 = sshll.u32 %s6274_s18, 4  ;;  %s6120_s25 = scalar_lea.hbm %s6606_s0, 128  ;;  %s49_s21 = int_to_ptr.vmem [resolvable:$true] %s48_s21 }
  0x4a   :  { %p6121_p4 = scmp.ne.s32.totalorder %s6606_s0, %s6120_s25  ;;  %p6124_p5 = scmp.lt.u32.totalorder %s6120_s25, %s6606_s0 }
  0x4c   :  { %p6126_p6 = pnand %p6124_p5, %p6121_p4 }
  0x4e   :  { %6129 = shalt.err (!%p6126_p6)
}
  0x4f   :  { %s6130_s7 = scalar_lea.vmem %s27_s17, 128  ;;  %p6135_p8 = scmp.lt.s32.totalorder %s27_s17, %s27_s17 }
  0x50   :  { %p6131_p7 = scmp.ne.s32.totalorder %s27_s17, %s6130_s7  ;;  %p6136_p9 = scmp.lt.s32.totalorder %s6130_s7, %s6130_s7 }
  0x52   :  { %p6137_p10 = por %p6136_p9, %p6135_p8 }
  0x54   :  { %p6138_p11 = pnand %p6137_p10, %p6131_p7 }
  0x56   :  { %6141 = shalt.err (!%p6138_p11)
}
  0x57   :  { %29 = dma.hbm_to_vmem [thread:$0]  %s6606_s0, 128, %s27_s17, [#allocation3]  }
  0x58   :  { %s6142_s11 = scalar_lea.hbm %s6608_s2, 64 }
  0x59   :  { %p6143_p12 = scmp.ne.s32.totalorder %s6608_s2, %s6142_s11  ;;  %p6146_p13 = scmp.lt.u32.totalorder %s6142_s11, %s6608_s2 }
  0x5b   :  { %p6148_p0 = pnand %p6146_p13, %p6143_p12 }
  0x5d   :  { %6151 = shalt.err (!%p6148_p0)
}
  0x5e   :  { %s6152_s14 = scalar_lea.vmem %s49_s21, 64  ;;  %p6157_p2 = scmp.lt.s32.totalorder %s49_s21, %s49_s21 }
  0x5f   :  { %p6153_p1 = scmp.ne.s32.totalorder %s49_s21, %s6152_s14  ;;  %p6158_p3 = scmp.lt.s32.totalorder %s6152_s14, %s6152_s14 }
  0x61   :  { %p6159_p4 = por %p6158_p3, %p6157_p2 }
  0x63   :  { %p6160_p5 = pnand %p6159_p4, %p6153_p1 }
  0x65   :  { %6163 = shalt.err (!%p6160_p5)
}
  0x66   :  { %51 = dma.hbm_to_vmem [thread:$0]  %s6608_s2, 64, %s49_s21, [#allocation6]  }
  0x67   :  { %s6275_s26 = smov [#allocation10]   ;;  %s6276_s16 = smov [#allocation13]  }
  0x68   :  { %s70_s15 = sshll.u32 %s6275_s26, 4  ;;  %s92_s17 = sshll.u32 %s6276_s16, 4  ;;  %s71_s15 = int_to_ptr.vmem [resolvable:$true] %s70_s15  ;;  %s93_s17 = int_to_ptr.vmem [resolvable:$true] %s92_s17 }
  0x69   :  { %s6164_s23 = scalar_lea.hbm %s6610_s4, 64 }
  0x6a   :  { %p6165_p6 = scmp.ne.s32.totalorder %s6610_s4, %s6164_s23  ;;  %p6168_p7 = scmp.lt.u32.totalorder %s6164_s23, %s6610_s4 }
  0x6c   :  { %p6170_p8 = pnand %p6168_p7, %p6165_p6 }
  0x6e   :  { %6173 = shalt.err (!%p6170_p8)
}
  0x6f   :  { %s6174_s2 = scalar_lea.vmem %s71_s15, 64  ;;  %p6179_p10 = scmp.lt.s32.totalorder %s71_s15, %s71_s15 }
  0x70   :  { %p6175_p9 = scmp.ne.s32.totalorder %s71_s15, %s6174_s2  ;;  %p6180_p11 = scmp.lt.s32.totalorder %s6174_s2, %s6174_s2 }
  0x72   :  { %p6181_p12 = por %p6180_p11, %p6179_p10 }
  0x74   :  { %p6182_p13 = pnand %p6181_p12, %p6175_p9 }
  0x76   :  { %6185 = shalt.err (!%p6182_p13)
}
  0x77   :  { %73 = dma.hbm_to_vmem [thread:$0]  %s6610_s4, 64, %s71_s15, [#allocation9]  }
  0x78   :  { %s6186_s28 = scalar_lea.hbm %s6612_s6, 256 }
  0x79   :  { %p6187_p0 = scmp.ne.s32.totalorder %s6612_s6, %s6186_s28  ;;  %p6190_p1 = scmp.lt.u32.totalorder %s6186_s28, %s6612_s6 }
  0x7b   :  { %p6192_p2 = pnand %p6190_p1, %p6187_p0 }
  0x7d   :  { %6195 = shalt.err (!%p6192_p2)
}
  0x7e   :  { %s6196_s13 = scalar_lea.vmem %s93_s17, 256  ;;  %p6201_p4 = scmp.lt.s32.totalorder %s93_s17, %s93_s17 }
  0x7f   :  { %p6197_p3 = scmp.ne.s32.totalorder %s93_s17, %s6196_s13  ;;  %p6202_p5 = scmp.lt.s32.totalorder %s6196_s13, %s6196_s13 }
  0x81   :  { %p6203_p6 = por %p6202_p5, %p6201_p4 }
  0x83   :  { %p6204_p7 = pnand %p6203_p6, %p6197_p3 }
  0x85   :  { %6207 = shalt.err (!%p6204_p7)
}
  0x86   :  { %95 = dma.hbm_to_vmem [thread:$0]  %s6612_s6, 256, %s93_s17, [#allocation12]  }
  0x87   :  { %s6277_s10 = smov [#allocation16]   ;;  %s6208_s26 = scalar_lea.hbm %s6614_s8, 16 }
  0x88   :  { %s114_s14 = sshll.u32 %s6277_s10, 4  ;;  %p6209_p8 = scmp.ne.s32.totalorder %s6614_s8, %s6208_s26  ;;  %s115_s14 = int_to_ptr.vmem [resolvable:$true] %s114_s14 }
  0x89   :  { %p6212_p9 = scmp.lt.u32.totalorder %s6208_s26, %s6614_s8 }
  0x8b   :  { %p6214_p10 = pnand %p6212_p9, %p6209_p8 }
  0x8d   :  { %6217 = shalt.err (!%p6214_p10)
}
  0x8e   :  { %s6218_s23 = scalar_lea.vmem %s115_s14, 16  ;;  %s6222_s6 = scalar_lea.vmem %s115_s14, 32 }
  0x8f   :  { %p6219_p11 = scmp.ne.s32.totalorder %s115_s14, %s6218_s23  ;;  %p6223_p12 = scmp.lt.s32.totalorder %s115_s14, %s115_s14 }
  0x90   :  { %p6224_p13 = scmp.lt.s32.totalorder %s6222_s6, %s6218_s23 }
  0x92   :  { %p6225_p0 = por %p6224_p13, %p6223_p12 }
  0x94   :  { %p6226_p1 = pnand %p6225_p0, %p6219_p11 }
  0x96   :  { %6229 = shalt.err (!%p6226_p1)
}
  0x97   :  { %117 = dma.hbm_to_vmem [thread:$0]  %s6614_s8, 16, %s115_s14, [#allocation15]  }
  0x98   :  { %6252 = dma.done.wait [#allocation3], 128  }
  0x99   :  { %6253 = vsyncadd [#allocation3], 4294967168 }
  0x9a   :  { %6254 = dma.done.wait [#allocation6], 8256  }
  0x9b   :  { %6255 = vsyncadd [#allocation6], 4294959040 }
  0x9c   :  { %6256 = dma.done.wait [#allocation9], 32832  }
  0x9d   :  { %6257 = vsyncadd [#allocation9], 4294934464 }
  0x9e   :  { %6258 = dma.done.wait [#allocation12], 131328  }
  0x9f   :  { %6259 = vsyncadd [#allocation12], 4294835968 }
  0xa0   :  { %6260 = dma.done.wait [#allocation15], 32784  }
  0xa1   :  { %6261 = vsyncadd [#allocation15], 4294934512  ;;  %v6278_v0 = vmov 0.0   ;;  %v147_v1 = vld [vmem:[#allocation5 + $0x8] sm:$0xff]  ;;  %v146_v3 = vld [vmem:[#allocation5] sm:$0xff]  ;;  %s6279_s8 = smov [#allocation17]  }
  0xa2   :  { %296 = vmatprep.mubr.f32.mxu0 %v6278_v0  ;;  %367 = vmatprep.mubr.f32.mxu1 %v6278_v0  ;;  %v151_v2 = vld [vmem:[#allocation5 + $0x28] sm:$0xff]  ;;  %v150_v5 = vld [vmem:[#allocation5 + $0x20] sm:$0xff]  ;;  %v149_v28 = vld [vmem:[#allocation5 + $0x18] sm:$0xff]  ;;  %s4034_s3 = sshll.u32 %s6279_s8, 4  ;;  %s4035_s3 = int_to_ptr.vmem [resolvable:$true] %s4034_s3 }
  0xa3   :  { %v4328_v4 = vpack.c.bf16 %v151_v2, %v147_v1  ;;  %v155_v6 = vld [vmem:[#allocation5 + $0x48] sm:$0xff]  ;;  %v4330_v8 = vpack.c.bf16 %v150_v5, %v146_v3  ;;  %v154_v10 = vld [vmem:[#allocation5 + $0x40] sm:$0xff]  ;;  %v153_v29 = vld [vmem:[#allocation5 + $0x38] sm:$0xff]  ;;  %s6230_s20 = scalar_lea.vmem %s4035_s3, 128  ;;  %p6235_p3 = scmp.lt.s32.totalorder %s4035_s3, %s4035_s3 }
  0xa4   :  { %v159_v7 = vld [vmem:[#allocation5 + $0x68] sm:$0xff]  ;;  %v158_v11 = vld [vmem:[#allocation5 + $0x60] sm:$0xff]  ;;  %v148_v30 = vld [vmem:[#allocation5 + $0x10] sm:$0xff]  ;;  %v4360_v32 = vpack.c.bf16 %v153_v29, %v149_v28  ;;  %p6231_p2 = scmp.ne.s32.totalorder %s4035_s3, %s6230_s20  ;;  %p6236_p4 = scmp.lt.s32.totalorder %s6230_s20, %s6230_s20 }
  0xa5   :  { %v4332_v9 = vpack.c.bf16 %v159_v7, %v155_v6  ;;  %v163_v12 = vld [vmem:[#allocation5 + $0x88] sm:$0xff]  ;;  %4329 = vmatprep.subr.bf16.mxu0 %v4328_v4  ;;  %v4334_v14 = vpack.c.bf16 %v158_v11, %v154_v10  ;;  %v162_v16 = vld [vmem:[#allocation5 + $0x80] sm:$0xff]  ;;  %v152_v33 = vld [vmem:[#allocation5 + $0x30] sm:$0xff] }
  0xa6   :  { %v167_v13 = vld [vmem:[#allocation5 + $0xa8] sm:$0xff]  ;;  %4331 = vmatpush1.bf16.msra.mxu0 %v4330_v8  ;;  %v166_v17 = vld [vmem:[#allocation5 + $0xa0] sm:$0xff]  ;;  %v157_v34 = vld [vmem:[#allocation5 + $0x58] sm:$0xff]  ;;  %v4362_v37 = vpack.c.bf16 %v152_v33, %v148_v30  ;;  %4361 = vmatprep.subr.bf16.mxu1 %v4360_v32  ;;  %p6237_p5 = por %p6236_p4, %p6235_p3 }
  0xa7   :  { %4333 = vmatprep.subr.bf16.mxu0 %v4332_v9  ;;  %v4336_v15 = vpack.c.bf16 %v167_v13, %v163_v12  ;;  %v171_v18 = vld [vmem:[#allocation5 + $0xc8] sm:$0xff]  ;;  %v4338_v20 = vpack.c.bf16 %v166_v17, %v162_v16  ;;  %v170_v22 = vld [vmem:[#allocation5 + $0xc0] sm:$0xff]  ;;  %v161_v35 = vld [vmem:[#allocation5 + $0x78] sm:$0xff] }
  0xa8   :  { %v175_v19 = vld [vmem:[#allocation5 + $0xe8] sm:$0xff]  ;;  %v174_v23 = vld [vmem:[#allocation5 + $0xe0] sm:$0xff]  ;;  %v4364_v38 = vpack.c.bf16 %v161_v35, %v157_v34  ;;  %v156_v39 = vld [vmem:[#allocation5 + $0x50] sm:$0xff]  ;;  %4363 = vmatpush1.bf16.msra.mxu1 %v4362_v37  ;;  %p6238_p6 = pnand %p6237_p5, %p6231_p2 }
  0xa9   :  { %v4340_v21 = vpack.c.bf16 %v175_v19, %v171_v18  ;;  %v179_v24 = vld [vmem:[#allocation5 + $0x108] sm:$0xff]  ;;  %v178_v26 = vld [vmem:[#allocation5 + $0x100] sm:$0xff]  ;;  %v4342_v31 = vpack.c.bf16 %v174_v23, %v170_v22  ;;  %v160_v40 = vld [vmem:[#allocation5 + $0x70] sm:$0xff] }
  0xaa   :  { %4335 = vmatpush1.bf16.msra.mxu0 %v4334_v14  ;;  %v183_v25 = vld [vmem:[#allocation5 + $0x128] sm:$0xff]  ;;  %v182_v27 = vld [vmem:[#allocation5 + $0x120] sm:$0xff]  ;;  %v165_v41 = vld [vmem:[#allocation5 + $0x98] sm:$0xff]  ;;  %v4366_v45 = vpack.c.bf16 %v160_v40, %v156_v39  ;;  %4365 = vmatprep.subr.bf16.mxu1 %v4364_v38 }
  0xab   :  { %4337 = vmatprep.subr.bf16.mxu0 %v4336_v15  ;;  %v4344_v36 = vpack.c.bf16 %v183_v25, %v179_v24  ;;  %v187_v42 = vld [vmem:[#allocation5 + $0x148] sm:$0xff]  ;;  %v169_v44 = vld [vmem:[#allocation5 + $0xb8] sm:$0xff]  ;;  %v4346_v46 = vpack.c.bf16 %v182_v27, %v178_v26  ;;  %v186_v47 = vld [vmem:[#allocation5 + $0x140] sm:$0xff] }
  0xac   :  { %v191_v43 = vld [vmem:[#allocation5 + $0x168] sm:$0xff]  ;;  %v4368_v48 = vpack.c.bf16 %v169_v44, %v165_v41  ;;  %v164_v49 = vld [vmem:[#allocation5 + $0x90] sm:$0xff]  ;;  %v190_v52 = vld [vmem:[#allocation5 + $0x160] sm:$0xff]  ;;  %4367 = vmatpush1.bf16.msra.mxu1 %v4366_v45 }
  0xad   :  { %v168_v50 = vld [vmem:[#allocation5 + $0xb0] sm:$0xff]  ;;  %v4348_v51 = vpack.c.bf16 %v191_v43, %v187_v42  ;;  %v173_v53 = vld [vmem:[#allocation5 + $0xd8] sm:$0xff]  ;;  %v195_v55 = vld [vmem:[#allocation5 + $0x188] sm:$0xff]  ;;  %v4350_v58 = vpack.c.bf16 %v190_v52, %v186_v47 }
  0xae   :  { %4339 = vmatpush1.bf16.msra.mxu0 %v4338_v20  ;;  %v177_v54 = vld [vmem:[#allocation5 + $0xf8] sm:$0xff]  ;;  %v199_v56 = vld [vmem:[#allocation5 + $0x1a8] sm:$0xff]  ;;  %v4370_v57 = vpack.c.bf16 %v168_v50, %v164_v49  ;;  %v194_v59 = vld [vmem:[#allocation5 + $0x180] sm:$0xff]  ;;  %4369 = vmatprep.subr.bf16.mxu1 %v4368_v48 }
  0xaf   :  { %4341 = vmatprep.subr.bf16.mxu0 %v4340_v21  ;;  %v4372_v60 = vpack.c.bf16 %v177_v54, %v173_v53  ;;  %v172_v61 = vld [vmem:[#allocation5 + $0xd0] sm:$0xff]  ;;  %v4352_v63 = vpack.c.bf16 %v199_v56, %v195_v55  ;;  %v198_v0 = vld [vmem:[#allocation5 + $0x1a0] sm:$0xff]  ;;  %v181_v1 = vld [vmem:[#allocation5 + $0x118] sm:$0xff] }
  0xb0   :  { %v176_v62 = vld [vmem:[#allocation5 + $0xf0] sm:$0xff]  ;;  %v185_v2 = vld [vmem:[#allocation5 + $0x138] sm:$0xff]  ;;  %v203_v3 = vld [vmem:[#allocation5 + $0x1c8] sm:$0xff]  ;;  %4371 = vmatpush1.bf16.msra.mxu1 %v4370_v57  ;;  %v4354_v6 = vpack.c.bf16 %v198_v0, %v194_v59 }
  0xb1   :  { %v207_v4 = vld [vmem:[#allocation5 + $0x1e8] sm:$0xff]  ;;  %v4374_v5 = vpack.c.bf16 %v176_v62, %v172_v61  ;;  %v202_v7 = vld [vmem:[#allocation5 + $0x1c0] sm:$0xff]  ;;  %4373 = vmatprep.subr.bf16.mxu1 %v4372_v60  ;;  %v4376_v8 = vpack.c.bf16 %v185_v2, %v181_v1  ;;  %v180_v9 = vld [vmem:[#allocation5 + $0x110] sm:$0xff] }
  0xb2   :  { %4343 = vmatpush1.bf16.msra.mxu0 %v4342_v31  ;;  %v184_v10 = vld [vmem:[#allocation5 + $0x130] sm:$0xff]  ;;  %v4356_v11 = vpack.c.bf16 %v207_v4, %v203_v3  ;;  %v206_v12 = vld [vmem:[#allocation5 + $0x1e0] sm:$0xff]  ;;  %v189_v13 = vld [vmem:[#allocation5 + $0x158] sm:$0xff] }
  0xb3   :  { %4345 = vmatprep.subr.bf16.mxu0 %v4344_v36  ;;  %v193_v14 = vld [vmem:[#allocation5 + $0x178] sm:$0xff]  ;;  %v379_v15 = vld [vmem:[#allocation8 + $0x8] sm:$0xff]  ;;  %v4378_v17 = vpack.c.bf16 %v184_v10, %v180_v9  ;;  %v4358_v18 = vpack.c.bf16 %v206_v12, %v202_v7  ;;  %v378_v25 = vld [vmem:[#allocation8] sm:$0xff] }
  0xb4   :  { %v383_v16 = vld [vmem:[#allocation8 + $0x28] sm:$0xff]  ;;  %4375 = vmatpush1.bf16.msra.mxu1 %v4374_v5  ;;  %v4380_v19 = vpack.c.bf16 %v193_v14, %v189_v13  ;;  %v197_v22 = vld [vmem:[#allocation5 + $0x198] sm:$0xff]  ;;  %v382_v26 = vld [vmem:[#allocation8 + $0x20] sm:$0xff] }
  0xb5   :  { %4377 = vmatprep.subr.bf16.mxu1 %v4376_v8  ;;  %v188_v20 = vld [vmem:[#allocation5 + $0x150] sm:$0xff]  ;;  %v201_v23 = vld [vmem:[#allocation5 + $0x1b8] sm:$0xff]  ;;  %v4392_v24 = vpack.c.bf16 %v383_v16, %v379_v15  ;;  %v4394_v35 = vpack.c.bf16 %v382_v26, %v378_v25  ;;  %v386_v38 = vld [vmem:[#allocation8 + $0x40] sm:$0xff] }
  0xb6   :  { %4347 = vmatpush1.bf16.msra.mxu0 %v4346_v46  ;;  %v192_v21 = vld [vmem:[#allocation5 + $0x170] sm:$0xff]  ;;  %v6438_v29 = vld [vmem:[#allocation2] sm:$0xff]  ;;  %v4384_v31 = vpack.c.bf16 %v201_v23, %v197_v22  ;;  %v390_v39 = vld [vmem:[#allocation8 + $0x60] sm:$0xff] }
  0xb7   :  { %4349 = vmatprep.subr.bf16.mxu0 %v4348_v51  ;;  %v387_v27 = vld [vmem:[#allocation8 + $0x48] sm:$0xff]  ;;  %v4382_v30 = vpack.c.bf16 %v192_v21, %v188_v20  ;;  %v205_v34 = vld [vmem:[#allocation5 + $0x1d8] sm:$0xff]  ;;  %v4398_v47 = vpack.c.bf16 %v390_v39, %v386_v38  ;;  %v394_v50 = vld [vmem:[#allocation8 + $0x80] sm:$0xff] }
  0xb8   :  { %v391_v28 = vld [vmem:[#allocation8 + $0x68] sm:$0xff]  ;;  %4379 = vmatpush1.bf16.msra.mxu1 %v4378_v17  ;;  %v209_v36 = vld [vmem:[#allocation5 + $0x1f8] sm:$0xff]  ;;  %v398_v51 = vld [vmem:[#allocation8 + $0xa0] sm:$0xff] }
  0xb9   :  { %4381 = vmatprep.subr.bf16.mxu1 %v4380_v19  ;;  %v196_v32 = vld [vmem:[#allocation5 + $0x190] sm:$0xff]  ;;  %v4396_v37 = vpack.c.bf16 %v391_v28, %v387_v27  ;;  %v4388_v43 = vpack.c.bf16 %v209_v36, %v205_v34  ;;  %v381_v46 = vld [vmem:[#allocation8 + $0x18] sm:$0xff]  ;;  %v4402_v59 = vpack.c.bf16 %v398_v51, %v394_v50  ;;  %v402_v62 = vld [vmem:[#allocation8 + $0xc0] sm:$0xff] }
  0xba   :  { %4351 = vmatpush1.bf16.msra.mxu0 %v4350_v58  ;;  %v200_v33 = vld [vmem:[#allocation5 + $0x1b0] sm:$0xff]  ;;  %v385_v48 = vld [vmem:[#allocation8 + $0x38] sm:$0xff]  ;;  %v410_v10 = vld [vmem:[#allocation8 + $0x100] sm:$0xff] }
  0xbb   :  { %4353 = vmatprep.subr.bf16.mxu0 %v4352_v63  ;;  %v395_v40 = vld [vmem:[#allocation8 + $0x88] sm:$0xff]  ;;  %v4386_v42 = vpack.c.bf16 %v200_v33, %v196_v32  ;;  %v4520_v55 = vpack.c.bf16 %v385_v48, %v381_v46  ;;  %v380_v56 = vld [vmem:[#allocation8 + $0x10] sm:$0xff]  ;;  %v389_v58 = vld [vmem:[#allocation8 + $0x58] sm:$0xff] }
  0xbc   :  { %v399_v41 = vld [vmem:[#allocation8 + $0xa8] sm:$0xff]  ;;  %4383 = vmatpush1.bf16.msra.mxu1 %v4382_v30  ;;  %v384_v57 = vld [vmem:[#allocation8 + $0x30] sm:$0xff]  ;;  %v393_v60 = vld [vmem:[#allocation8 + $0x78] sm:$0xff] }
  0xbd   :  { %4385 = vmatprep.subr.bf16.mxu1 %v4384_v31  ;;  %v204_v44 = vld [vmem:[#allocation5 + $0x1d0] sm:$0xff]  ;;  %v4400_v49 = vpack.c.bf16 %v399_v41, %v395_v40  ;;  %v406_v63 = vld [vmem:[#allocation8 + $0xe0] sm:$0xff]  ;;  %v4522_v2 = vpack.c.bf16 %v384_v57, %v380_v56  ;;  %v4524_v3 = vpack.c.bf16 %v393_v60, %v389_v58  ;;  %v401_v8 = vld [vmem:[#allocation8 + $0xb8] sm:$0xff] }
  0xbe   :  { %4355 = vmatpush1.bf16.msra.mxu0 %v4354_v6  ;;  %v208_v45 = vld [vmem:[#allocation5 + $0x1f0] sm:$0xff]  ;;  %v397_v6 = vld [vmem:[#allocation8 + $0x98] sm:$0xff]  ;;  %v4406_v7 = vpack.c.bf16 %v406_v63, %v402_v62  ;;  %v418_v22 = vld [vmem:[#allocation8 + $0x140] sm:$0xff] }
  0xbf   :  { %4357 = vmatprep.subr.bf16.mxu0 %v4356_v11  ;;  %v403_v52 = vld [vmem:[#allocation8 + $0xc8] sm:$0xff]  ;;  %v4390_v54 = vpack.c.bf16 %v208_v45, %v204_v44  ;;  %v388_v4 = vld [vmem:[#allocation8 + $0x50] sm:$0xff]  ;;  %v414_v11 = vld [vmem:[#allocation8 + $0x120] sm:$0xff]  ;;  %v4528_v15 = vpack.c.bf16 %v401_v8, %v397_v6 }
  0xc0   :  { %v407_v53 = vld [vmem:[#allocation8 + $0xe8] sm:$0xff]  ;;  %4387 = vmatpush1.bf16.msra.mxu1 %v4386_v42  ;;  %v392_v5 = vld [vmem:[#allocation8 + $0x70] sm:$0xff]  ;;  %v4410_v19 = vpack.c.bf16 %v414_v11, %v410_v10  ;;  %v409_v20 = vld [vmem:[#allocation8 + $0xf8] sm:$0xff] }
  0xc1   :  { %4389 = vmatprep.subr.bf16.mxu1 %v4388_v43  ;;  %v4404_v61 = vpack.c.bf16 %v407_v53, %v403_v52  ;;  %v411_v0 = vld [vmem:[#allocation8 + $0x108] sm:$0xff]  ;;  %v4526_v14 = vpack.c.bf16 %v392_v5, %v388_v4  ;;  %v396_v16 = vld [vmem:[#allocation8 + $0x90] sm:$0xff]  ;;  %v422_v23 = vld [vmem:[#allocation8 + $0x160] sm:$0xff] }
  0xc2   :  { %4359 = vmatpush1.bf16.msra.mxu0 %v4358_v18  ;;  %v415_v1 = vld [vmem:[#allocation8 + $0x128] sm:$0xff]  ;;  %v400_v17 = vld [vmem:[#allocation8 + $0xb0] sm:$0xff]  ;;  %v405_v18 = vld [vmem:[#allocation8 + $0xd8] sm:$0xff]  ;;  %v4414_v31 = vpack.c.bf16 %v422_v23, %v418_v22 }
  0xc3   :  { %4393 = vmatprep.subr.bf16.mxu0 %v4392_v24  ;;  %v4408_v9 = vpack.c.bf16 %v415_v1, %v411_v0  ;;  %v419_v12 = vld [vmem:[#allocation8 + $0x148] sm:$0xff]  ;;  %v4530_v26 = vpack.c.bf16 %v400_v17, %v396_v16  ;;  %v4532_v27 = vpack.c.bf16 %v409_v20, %v405_v18  ;;  %v404_v28 = vld [vmem:[#allocation8 + $0xd0] sm:$0xff]  ;;  %v413_v30 = vld [vmem:[#allocation8 + $0x118] sm:$0xff] }
  0xc4   :  { %4391 = vmatpush1.bf16.msra.mxu1 %v4390_v54  ;;  %v423_v13 = vld [vmem:[#allocation8 + $0x168] sm:$0xff]  ;;  %v417_v32 = vld [vmem:[#allocation8 + $0x138] sm:$0xff]  ;;  %v426_v34 = vld [vmem:[#allocation8 + $0x180] sm:$0xff] }
  0xc5   :  { %297 = vmatmul.mubr.f32.vlgmr.msra.gmra.mrb[0].mxu0 %v6438_v29  ;;  %4521 = vmatprep.subr.bf16.mxu1 %v4520_v55  ;;  %v4412_v21 = vpack.c.bf16 %v423_v13, %v419_v12  ;;  %v427_v24 = vld [vmem:[#allocation8 + $0x188] sm:$0xff]  ;;  %v4536_v39 = vpack.c.bf16 %v417_v32, %v413_v30  ;;  %v412_v40 = vld [vmem:[#allocation8 + $0x110] sm:$0xff]  ;;  %v421_v42 = vld [vmem:[#allocation8 + $0x158] sm:$0xff] }
  0xc6   :  { %4395 = vmatpush1.bf16.msra.mxu0 %v4394_v35  ;;  %v431_v25 = vld [vmem:[#allocation8 + $0x1a8] sm:$0xff]  ;;  %v430_v35 = vld [vmem:[#allocation8 + $0x1a0] sm:$0xff]  ;;  %v416_v41 = vld [vmem:[#allocation8 + $0x130] sm:$0xff] }
  0xc7   :  { %4397 = vmatprep.subr.bf16.mxu0 %v4396_v37  ;;  %368 = vmatmul.mubr.f32.vlgmr.msra.gmra.mrb[0].mxu1 %v6438_v29  ;;  %v408_v29 = vld [vmem:[#allocation8 + $0xf0] sm:$0xff]  ;;  %v4416_v33 = vpack.c.bf16 %v431_v25, %v427_v24  ;;  %v435_v36 = vld [vmem:[#allocation8 + $0x1c8] sm:$0xff]  ;;  %v4418_v43 = vpack.c.bf16 %v430_v35, %v426_v34  ;;  %v425_v44 = vld [vmem:[#allocation8 + $0x178] sm:$0xff]  ;;  %v4538_v50 = vpack.c.bf16 %v416_v41, %v412_v40 }
  0xc8   :  { %4523 = vmatpush1.bf16.msra.mxu1 %v4522_v2  ;;  %v439_v37 = vld [vmem:[#allocation8 + $0x1e8] sm:$0xff]  ;;  %v4534_v38 = vpack.c.bf16 %v408_v29, %v404_v28  ;;  %v434_v46 = vld [vmem:[#allocation8 + $0x1c0] sm:$0xff]  ;;  %v4540_v51 = vpack.c.bf16 %v425_v44, %v421_v42  ;;  %v420_v52 = vld [vmem:[#allocation8 + $0x150] sm:$0xff] }
  0xc9   :  { %4525 = vmatprep.subr.bf16.mxu1 %v4524_v3  ;;  %v4420_v45 = vpack.c.bf16 %v439_v37, %v435_v36  ;;  %v443_v48 = vld [vmem:[#allocation8 + $0x208] sm:$0xff]  ;;  %v424_v53 = vld [vmem:[#allocation8 + $0x170] sm:$0xff]  ;;  %v429_v54 = vld [vmem:[#allocation8 + $0x198] sm:$0xff] }
  0xca   :  { %4399 = vmatpush1.bf16.msra.mxu0 %v4398_v47  ;;  %v438_v47 = vld [vmem:[#allocation8 + $0x1e0] sm:$0xff]  ;;  %v433_v56 = vld [vmem:[#allocation8 + $0x1b8] sm:$0xff]  ;;  %v451_v60 = vld [vmem:[#allocation8 + $0x248] sm:$0xff]  ;;  %v4542_v62 = vpack.c.bf16 %v424_v53, %v420_v52 }
  0xcb   :  { %4401 = vmatprep.subr.bf16.mxu0 %v4400_v49  ;;  %v447_v49 = vld [vmem:[#allocation8 + $0x228] sm:$0xff]  ;;  %v4422_v55 = vpack.c.bf16 %v438_v47, %v434_v46  ;;  %v442_v58 = vld [vmem:[#allocation8 + $0x200] sm:$0xff]  ;;  %v4544_v63 = vpack.c.bf16 %v433_v56, %v429_v54  ;;  %v428_v0 = vld [vmem:[#allocation8 + $0x190] sm:$0xff] }
  0xcc   :  { %4527 = vmatpush1.bf16.msra.mxu1 %v4526_v14  ;;  %v4424_v57 = vpack.c.bf16 %v447_v49, %v443_v48  ;;  %v432_v1 = vld [vmem:[#allocation8 + $0x1b0] sm:$0xff]  ;;  %v437_v2 = vld [vmem:[#allocation8 + $0x1d8] sm:$0xff]  ;;  %v450_v6 = vld [vmem:[#allocation8 + $0x240] sm:$0xff] }
  0xcd   :  { %4529 = vmatprep.subr.bf16.mxu1 %v4528_v15  ;;  %v441_v4 = vld [vmem:[#allocation8 + $0x1f8] sm:$0xff]  ;;  %v459_v8 = vld [vmem:[#allocation8 + $0x288] sm:$0xff]  ;;  %v4546_v10 = vpack.c.bf16 %v432_v1, %v428_v0  ;;  %v436_v12 = vld [vmem:[#allocation8 + $0x1d0] sm:$0xff] }
  0xce   :  { %4403 = vmatpush1.bf16.msra.mxu0 %v4402_v59  ;;  %v446_v59 = vld [vmem:[#allocation8 + $0x220] sm:$0xff]  ;;  %v4548_v11 = vpack.c.bf16 %v441_v4, %v437_v2  ;;  %v440_v13 = vld [vmem:[#allocation8 + $0x1f0] sm:$0xff]  ;;  %v445_v14 = vld [vmem:[#allocation8 + $0x218] sm:$0xff] }
  0xcf   :  { %4405 = vmatprep.subr.bf16.mxu0 %v4404_v61  ;;  %v455_v61 = vld [vmem:[#allocation8 + $0x268] sm:$0xff]  ;;  %v4426_v3 = vpack.c.bf16 %v446_v59, %v442_v58  ;;  %v449_v16 = vld [vmem:[#allocation8 + $0x238] sm:$0xff]  ;;  %v458_v18 = vld [vmem:[#allocation8 + $0x280] sm:$0xff]  ;;  %v4550_v22 = vpack.c.bf16 %v440_v13, %v436_v12 }
  0xd0   :  { %4531 = vmatpush1.bf16.msra.mxu1 %v4530_v26  ;;  %v4428_v5 = vpack.c.bf16 %v455_v61, %v451_v60  ;;  %v467_v20 = vld [vmem:[#allocation8 + $0x2c8] sm:$0xff]  ;;  %v4552_v23 = vpack.c.bf16 %v449_v16, %v445_v14  ;;  %v444_v24 = vld [vmem:[#allocation8 + $0x210] sm:$0xff]  ;;  %v453_v26 = vld [vmem:[#allocation8 + $0x258] sm:$0xff] }
  0xd1   :  { %4533 = vmatprep.subr.bf16.mxu1 %v4532_v27  ;;  %v448_v25 = vld [vmem:[#allocation8 + $0x230] sm:$0xff]  ;;  %v457_v28 = vld [vmem:[#allocation8 + $0x278] sm:$0xff]  ;;  %v466_v30 = vld [vmem:[#allocation8 + $0x2c0] sm:$0xff] }
  0xd2   :  { %4407 = vmatpush1.bf16.msra.mxu0 %v4406_v7  ;;  %v454_v7 = vld [vmem:[#allocation8 + $0x260] sm:$0xff]  ;;  %v475_v32 = vld [vmem:[#allocation8 + $0x308] sm:$0xff]  ;;  %v4554_v34 = vpack.c.bf16 %v448_v25, %v444_v24  ;;  %v4556_v35 = vpack.c.bf16 %v457_v28, %v453_v26  ;;  %v452_v36 = vld [vmem:[#allocation8 + $0x250] sm:$0xff] }
  0xd3   :  { %4409 = vmatprep.subr.bf16.mxu0 %v4408_v9  ;;  %v463_v9 = vld [vmem:[#allocation8 + $0x2a8] sm:$0xff]  ;;  %v4430_v15 = vpack.c.bf16 %v454_v7, %v450_v6  ;;  %v456_v37 = vld [vmem:[#allocation8 + $0x270] sm:$0xff]  ;;  %v465_v40 = vld [vmem:[#allocation8 + $0x2b8] sm:$0xff] }
  0xd4   :  { %4535 = vmatpush1.bf16.msra.mxu1 %v4534_v38  ;;  %v4432_v17 = vpack.c.bf16 %v463_v9, %v459_v8  ;;  %v4558_v42 = vpack.c.bf16 %v456_v37, %v452_v36  ;;  %v460_v44 = vld [vmem:[#allocation8 + $0x290] sm:$0xff]  ;;  %v469_v46 = vld [vmem:[#allocation8 + $0x2d8] sm:$0xff]  ;;  %v474_v56 = vld [vmem:[#allocation8 + $0x300] sm:$0xff] }
  0xd5   :  { %4537 = vmatprep.subr.bf16.mxu1 %v4536_v39  ;;  %v461_v39 = vld [vmem:[#allocation8 + $0x298] sm:$0xff]  ;;  %v476_v58 = vld [vmem:[#allocation8 + $0x310] sm:$0xff]  ;;  %v486_v4 = vld [vmem:[#allocation8 + $0x360] sm:$0xff] }
  0xd6   :  { %4411 = vmatpush1.bf16.msra.mxu0 %v4410_v19  ;;  %v462_v19 = vld [vmem:[#allocation8 + $0x2a0] sm:$0xff]  ;;  %v473_v47 = vld [vmem:[#allocation8 + $0x2f8] sm:$0xff]  ;;  %v480_v60 = vld [vmem:[#allocation8 + $0x330] sm:$0xff] }
  0xd7   :  { %4413 = vmatprep.subr.bf16.mxu0 %v4412_v21  ;;  %v471_v21 = vld [vmem:[#allocation8 + $0x2e8] sm:$0xff]  ;;  %v4434_v27 = vpack.c.bf16 %v462_v19, %v458_v18  ;;  %v4564_v49 = vpack.c.bf16 %v473_v47, %v469_v46  ;;  %v477_v52 = vld [vmem:[#allocation8 + $0x318] sm:$0xff]  ;;  %v4570_v61 = vpack.c.bf16 %v480_v60, %v476_v58  ;;  %v484_v7 = vld [vmem:[#allocation8 + $0x350] sm:$0xff] }
  0xd8   :  { %4539 = vmatpush1.bf16.msra.mxu1 %v4538_v50  ;;  %v4436_v29 = vpack.c.bf16 %v471_v21, %v467_v20  ;;  %v468_v50 = vld [vmem:[#allocation8 + $0x2d0] sm:$0xff]  ;;  %v481_v53 = vld [vmem:[#allocation8 + $0x338] sm:$0xff]  ;;  %v494_v16 = vld [vmem:[#allocation8 + $0x3a0] sm:$0xff] }
  0xd9   :  { %4541 = vmatprep.subr.bf16.mxu1 %v4540_v51  ;;  %v472_v51 = vld [vmem:[#allocation8 + $0x2f0] sm:$0xff]  ;;  %v485_v0 = vld [vmem:[#allocation8 + $0x358] sm:$0xff]  ;;  %v499_v21 = vld [vmem:[#allocation8 + $0x3c8] sm:$0xff] }
  0xda   :  { %4415 = vmatpush1.bf16.msra.mxu0 %v4414_v31  ;;  %v470_v31 = vld [vmem:[#allocation8 + $0x2e0] sm:$0xff]  ;;  %v4566_v54 = vpack.c.bf16 %v472_v51, %v468_v50  ;;  %v489_v2 = vld [vmem:[#allocation8 + $0x378] sm:$0xff]  ;;  %v488_v8 = vld [vmem:[#allocation8 + $0x370] sm:$0xff] }
  0xdb   :  { %4417 = vmatprep.subr.bf16.mxu0 %v4416_v33  ;;  %v479_v33 = vld [vmem:[#allocation8 + $0x328] sm:$0xff]  ;;  %v4438_v38 = vpack.c.bf16 %v470_v31, %v466_v30  ;;  %v4574_v9 = vpack.c.bf16 %v488_v8, %v484_v7  ;;  %v493_v12 = vld [vmem:[#allocation8 + $0x398] sm:$0xff]  ;;  %v492_v19 = vld [vmem:[#allocation8 + $0x390] sm:$0xff] }
  0xdc   :  { %4543 = vmatpush1.bf16.msra.mxu1 %v4542_v62  ;;  %v4440_v41 = vpack.c.bf16 %v479_v33, %v475_v32  ;;  %v483_v62 = vld [vmem:[#allocation8 + $0x348] sm:$0xff]  ;;  %v497_v14 = vld [vmem:[#allocation8 + $0x3b8] sm:$0xff]  ;;  %v496_v20 = vld [vmem:[#allocation8 + $0x3b0] sm:$0xff] }
  0xdd   :  { %4545 = vmatprep.subr.bf16.mxu1 %v4544_v63  ;;  %v487_v63 = vld [vmem:[#allocation8 + $0x368] sm:$0xff]  ;;  %v501_v24 = vld [vmem:[#allocation8 + $0x3d8] sm:$0xff]  ;;  %v498_v28 = vld [vmem:[#allocation8 + $0x3c0] sm:$0xff] }
  0xde   :  { %4419 = vmatpush1.bf16.msra.mxu0 %v4418_v43  ;;  %v4560_v43 = vpack.c.bf16 %v465_v40, %v461_v39  ;;  %v4444_v1 = vpack.c.bf16 %v487_v63, %v483_v62  ;;  %v505_v25 = vld [vmem:[#allocation8 + $0x3f8] sm:$0xff]  ;;  %v500_v30 = vld [vmem:[#allocation8 + $0x3d0] sm:$0xff]  ;;  %v212_v40 = vlaneseq  ;;  %v519_v58 = vld [vmem:[#allocation8 + $0x468] sm:$0xff] }
  0xdf   :  { %4421 = vmatprep.subr.bf16.mxu0 %v4420_v45  ;;  %v464_v45 = vld [vmem:[#allocation8 + $0x2b0] sm:$0xff]  ;;  %v509_v36 = vld [vmem:[#allocation8 + $0x418] sm:$0xff] }
  0xe0   :  { %4547 = vmatpush1.bf16.msra.mxu1 %v4546_v10  ;;  %v4562_v48 = vpack.c.bf16 %v464_v45, %v460_v44  ;;  %v491_v10 = vld [vmem:[#allocation8 + $0x388] sm:$0xff]  ;;  %v504_v32 = vld [vmem:[#allocation8 + $0x3f0] sm:$0xff]  ;;  %v521_v60 = vld [vmem:[#allocation8 + $0x478] sm:$0xff] }
  0xe1   :  { %4549 = vmatprep.subr.bf16.mxu1 %v4548_v11  ;;  %v495_v11 = vld [vmem:[#allocation8 + $0x3a8] sm:$0xff]  ;;  %v4582_v33 = vpack.c.bf16 %v504_v32, %v500_v30  ;;  %v516_v7 = vld [vmem:[#allocation8 + $0x450] sm:$0xff] }
  0xe2   :  { %4423 = vmatpush1.bf16.msra.mxu0 %v4422_v55  ;;  %v4568_v55 = vpack.c.bf16 %v481_v53, %v477_v52  ;;  %v4448_v13 = vpack.c.bf16 %v495_v11, %v491_v10  ;;  %v506_v52 = vld [vmem:[#allocation8 + $0x400] sm:$0xff]  ;;  %v520_v8 = vld [vmem:[#allocation8 + $0x470] sm:$0xff]  ;;  %v527_v11 = vld [vmem:[#allocation8 + $0x4a8] sm:$0xff] }
  0xe3   :  { %4425 = vmatprep.subr.bf16.mxu0 %v4424_v57  ;;  %v478_v57 = vld [vmem:[#allocation8 + $0x320] sm:$0xff]  ;;  %v532_v32 = vld [vmem:[#allocation8 + $0x4d0] sm:$0xff] }
  0xe4   :  { %4551 = vmatpush1.bf16.msra.mxu1 %v4550_v22  ;;  %v4442_v59 = vpack.c.bf16 %v478_v57, %v474_v56  ;;  %v4578_v22 = vpack.c.bf16 %v496_v20, %v492_v19  ;;  %v510_v53 = vld [vmem:[#allocation8 + $0x420] sm:$0xff]  ;;  %v512_v56 = vld [vmem:[#allocation8 + $0x430] sm:$0xff]  ;;  %v515_v57 = vld [vmem:[#allocation8 + $0x448] sm:$0xff] }
  0xe5   :  { %4553 = vmatprep.subr.bf16.mxu1 %v4552_v23  ;;  %v503_v23 = vld [vmem:[#allocation8 + $0x3e8] sm:$0xff]  ;;  %v4458_v63 = vpack.c.bf16 %v510_v53, %v506_v52  ;;  %v524_v20 = vld [vmem:[#allocation8 + $0x490] sm:$0xff] }
  0xe6   :  { %4427 = vmatpush1.bf16.msra.mxu0 %v4426_v3  ;;  %v482_v3 = vld [vmem:[#allocation8 + $0x340] sm:$0xff]  ;;  %v4452_v26 = vpack.c.bf16 %v503_v23, %v499_v21  ;;  %v528_v21 = vld [vmem:[#allocation8 + $0x4b0] sm:$0xff]  ;;  %v535_v23 = vld [vmem:[#allocation8 + $0x4e8] sm:$0xff] }
  0xe7   :  { %4429 = vmatprep.subr.bf16.mxu0 %v4428_v5  ;;  %v4572_v5 = vpack.c.bf16 %v489_v2, %v485_v0  ;;  %v4446_v6 = vpack.c.bf16 %v486_v4, %v482_v3  ;;  %v518_v2 = vld [vmem:[#allocation8 + $0x460] sm:$0xff]  ;;  %v547_v52 = vld [vmem:[#allocation8 + $0x548] sm:$0xff] }
  0xe8   :  { %4555 = vmatpush1.bf16.msra.mxu1 %v4554_v34  ;;  %v507_v34 = vld [vmem:[#allocation8 + $0x408] sm:$0xff] }
  0xe9   :  { %4557 = vmatprep.subr.bf16.mxu1 %v4556_v35  ;;  %v511_v35 = vld [vmem:[#allocation8 + $0x428] sm:$0xff] }
  0xea   :  { %4431 = vmatpush1.bf16.msra.mxu0 %v4430_v15  ;;  %v490_v15 = vld [vmem:[#allocation8 + $0x380] sm:$0xff]  ;;  %v4456_v37 = vpack.c.bf16 %v511_v35, %v507_v34  ;;  %v539_v34 = vld [vmem:[#allocation8 + $0x508] sm:$0xff] }
  0xeb   :  { %4433 = vmatprep.subr.bf16.mxu0 %v4432_v17  ;;  %v4576_v17 = vpack.c.bf16 %v497_v14, %v493_v12  ;;  %v4450_v18 = vpack.c.bf16 %v494_v16, %v490_v15  ;;  %v525_v12 = vld [vmem:[#allocation8 + $0x498] sm:$0xff]  ;;  %v4590_v15 = vpack.c.bf16 %v520_v8, %v516_v7  ;;  %v522_v16 = vld [vmem:[#allocation8 + $0x480] sm:$0xff]  ;;  %v543_v35 = vld [vmem:[#allocation8 + $0x528] sm:$0xff] }
  0xec   :  { %4559 = vmatpush1.bf16.msra.mxu1 %v4558_v42  ;;  %v551_v53 = vld [vmem:[#allocation8 + $0x568] sm:$0xff]  ;;  %v554_v7 = vld [vmem:[#allocation8 + $0x580] sm:$0xff] }
  0xed   :  { %4561 = vmatprep.subr.bf16.mxu1 %v4560_v43  ;;  %v6447_v43 = vld [vmem:[#allocation7] sm:$0xf]  ;;  %v558_v8 = vld [vmem:[#allocation8 + $0x5a0] sm:$0xff] }
  0xee   :  { %4435 = vmatpush1.bf16.msra.mxu0 %v4434_v27  ;;  %v4580_v27 = vpack.c.bf16 %v505_v25, %v501_v24  ;;  %v533_v24 = vld [vmem:[#allocation8 + $0x4d8] sm:$0xff] }
  0xef   :  { %4437 = vmatprep.subr.bf16.mxu0 %v4436_v29  ;;  %v502_v29 = vld [vmem:[#allocation8 + $0x3e0] sm:$0xff]  ;;  %v537_v25 = vld [vmem:[#allocation8 + $0x4f8] sm:$0xff] }
  0xf0   :  { %4563 = vmatpush1.bf16.msra.mxu1 %v4562_v48  ;;  %v4454_v31 = vpack.c.bf16 %v502_v29, %v498_v28  ;;  %v530_v28 = vld [vmem:[#allocation8 + $0x4c0] sm:$0xff] }
  0xf1   :  { %4565 = vmatprep.subr.bf16.mxu1 %v4564_v49  ;;  %v534_v29 = vld [vmem:[#allocation8 + $0x4e0] sm:$0xff] }
  0xf2   :  { %4439 = vmatpush1.bf16.msra.mxu0 %v4438_v38  ;;  %v513_v38 = vld [vmem:[#allocation8 + $0x438] sm:$0xff] }
  0xf3   :  { %4441 = vmatprep.subr.bf16.mxu0 %v4440_v41  ;;  %v4584_v39 = vpack.c.bf16 %v513_v38, %v509_v36  ;;  %v6442_v41 = vshrl.u32 %v212_v40, 7  ;;  %v541_v36 = vld [vmem:[#allocation8 + $0x518] sm:$0xff] }
  0xf4   :  { %4567 = vmatpush1.bf16.msra.mxu1 %v4566_v54 }
  0xf5   :  { %4569 = vmatprep.subr.bf16.mxu1 %v4568_v55  ;;  %v6445_v42 = vsub.s32 0, %v6442_v41  ;;  %v6450_v44 = vsub.s32 1, %v6442_v41  ;;  %v6457_v51 = vsub.s32 3, %v6442_v41  ;;  %v508_v55 = vld [vmem:[#allocation8 + $0x410] sm:$0xff] }
  0xf6   :  { %4443 = vmatpush1.bf16.msra.mxu0 %v4442_v59  ;;  %v517_v59 = vld [vmem:[#allocation8 + $0x458] sm:$0xff]  ;;  %v4586_v0 = vpack.c.bf16 %v512_v56, %v508_v55 }
  0xf7   :  { %4445 = vmatprep.subr.bf16.mxu0 %v4444_v1  ;;  %v215_v45 = vrot.slane %v6447_v43, %v6445_v42  ;;  %v219_v46 = vrot.slane %v6447_v43, %v6450_v44  ;;  %v227_v54 = vrot.slane %v6447_v43, %v6457_v51  ;;  %v514_v1 = vld [vmem:[#allocation8 + $0x440] sm:$0xff]  ;;  %v553_v55 = vld [vmem:[#allocation8 + $0x578] sm:$0xff] }
  0xf8   :  { %4571 = vmatpush1.bf16.msra.mxu1 %v4570_v61  ;;  %v4462_v14 = vpack.c.bf16 %v518_v2, %v514_v1  ;;  %v555_v1 = vld [vmem:[#allocation8 + $0x588] sm:$0xff] }
  0xf9   :  { %4573 = vmatprep.subr.bf16.mxu1 %v4572_v5  ;;  %v4460_v5 = vpack.c.bf16 %v519_v58, %v515_v57  ;;  %v546_v58 = vld [vmem:[#allocation8 + $0x540] sm:$0xff]  ;;  %v559_v2 = vld [vmem:[#allocation8 + $0x5a8] sm:$0xff] }
  0xfa   :  { %4447 = vmatpush1.bf16.msra.mxu0 %v4446_v6  ;;  %v4588_v6 = vpack.c.bf16 %v521_v60, %v517_v59  ;;  %v550_v59 = vld [vmem:[#allocation8 + $0x560] sm:$0xff]  ;;  %v4476_v60 = vpack.c.bf16 %v551_v53, %v547_v52  ;;  %v580_v52 = vld [vmem:[#allocation8 + $0x650] sm:$0xff] }
  0xfb   :  { %4449 = vmatprep.subr.bf16.mxu0 %v4448_v13  ;;  %v529_v13 = vld [vmem:[#allocation8 + $0x4b8] sm:$0xff]  ;;  %v584_v53 = vld [vmem:[#allocation8 + $0x670] sm:$0xff] }
  0xfc   :  { %4575 = vmatpush1.bf16.msra.mxu1 %v4574_v9  ;;  %v523_v9 = vld [vmem:[#allocation8 + $0x488] sm:$0xff]  ;;  %v4592_v19 = vpack.c.bf16 %v529_v13, %v525_v12  ;;  %v560_v12 = vld [vmem:[#allocation8 + $0x5b0] sm:$0xff] }
  0xfd   :  { %4577 = vmatprep.subr.bf16.mxu1 %v4576_v17  ;;  %v526_v17 = vld [vmem:[#allocation8 + $0x4a0] sm:$0xff]  ;;  %v563_v13 = vld [vmem:[#allocation8 + $0x5c8] sm:$0xff] }
  0xfe   :  { %4451 = vmatpush1.bf16.msra.mxu0 %v4450_v18  ;;  %v4464_v18 = vpack.c.bf16 %v527_v11, %v523_v9  ;;  %v4480_v9 = vpack.c.bf16 %v559_v2, %v555_v1  ;;  %v556_v11 = vld [vmem:[#allocation8 + $0x590] sm:$0xff] }
  0xff   :  { %4453 = vmatprep.subr.bf16.mxu0 %v4452_v26  ;;  %v4466_v26 = vpack.c.bf16 %v526_v17, %v522_v16  ;;  %v569_v16 = vld [vmem:[#allocation8 + $0x5f8] sm:$0xff]  ;;  %v4482_v17 = vpack.c.bf16 %v558_v8, %v554_v7  ;;  %v588_v1 = vld [vmem:[#allocation8 + $0x690] sm:$0xff] }
 0x100   :  { %4579 = vmatpush1.bf16.msra.mxu1 %v4578_v22  ;;  %v531_v22 = vld [vmem:[#allocation8 + $0x4c8] sm:$0xff]  ;;  %v592_v2 = vld [vmem:[#allocation8 + $0x6b0] sm:$0xff] }
 0x101   :  { %4581 = vmatprep.subr.bf16.mxu1 %v4580_v27  ;;  %v4594_v27 = vpack.c.bf16 %v528_v21, %v524_v20  ;;  %v4468_v30 = vpack.c.bf16 %v535_v23, %v531_v22  ;;  %v566_v20 = vld [vmem:[#allocation8 + $0x5e0] sm:$0xff]  ;;  %v564_v23 = vld [vmem:[#allocation8 + $0x5d0] sm:$0xff]  ;;  %v4626_v8 = vpack.c.bf16 %v592_v2, %v588_v1 }
 0x102   :  { %4455 = vmatpush1.bf16.msra.mxu0 %v4454_v31  ;;  %v4596_v31 = vpack.c.bf16 %v537_v25, %v533_v24  ;;  %v568_v24 = vld [vmem:[#allocation8 + $0x5f0] sm:$0xff]  ;;  %v571_v25 = vld [vmem:[#allocation8 + $0x608] sm:$0xff]  ;;  %v630_v1 = vld [vmem:[#allocation8 + $0x7e0] sm:$0xff] }
 0x103   :  { %4457 = vmatprep.subr.bf16.mxu0 %v4456_v37  ;;  %v545_v37 = vld [vmem:[#allocation8 + $0x538] sm:$0xff] }
 0x104   :  { %4583 = vmatpush1.bf16.msra.mxu1 %v4582_v33  ;;  %v536_v33 = vld [vmem:[#allocation8 + $0x4f0] sm:$0xff] }
 0x105   :  { %4585 = vmatprep.subr.bf16.mxu1 %v4584_v39  ;;  %v4470_v39 = vpack.c.bf16 %v534_v29, %v530_v28  ;;  %v4598_v40 = vpack.c.bf16 %v536_v33, %v532_v32  ;;  %v577_v28 = vld [vmem:[#allocation8 + $0x638] sm:$0xff]  ;;  %v574_v32 = vld [vmem:[#allocation8 + $0x620] sm:$0xff] }
 0x198   :  { %v298_v47 = vpop.f32.mrb[0].mxu0 }
 0x199   :  { %v299_v48 = vadd.f32 %v298_v47, %v215_v45  ;;  %v300_v49 = vpop.f32.mrb[1].mxu0  ;;  %v538_v45 = vld [vmem:[#allocation8 + $0x500] sm:$0xff]  ;;  %v4472_v47 = vpack.c.bf16 %v543_v35, %v539_v34  ;;  %v572_v35 = vld [vmem:[#allocation8 + $0x610] sm:$0xff] }
 0x19a   :  { %v301_v50 = vadd.f32 %v300_v49, %v219_v46  ;;  %v6461_v61 = vpop.f32.mrb[0].mxu1  ;;  %v542_v46 = vld [vmem:[#allocation8 + $0x520] sm:$0xff]  ;;  %v540_v49 = vld [vmem:[#allocation8 + $0x510] sm:$0xff] }
 0x19b   :  { %v371_v62 = vpop.f32.mrb[1].mxu1  ;;  %v4474_v56 = vpack.c.bf16 %v542_v46, %v538_v45 }
 0x19c   :  { %5984 = vtanh.f32 %v301_v50  ;;  %v372_v3 = vadd.f32 %v371_v62, %v227_v54  ;;  %v544_v50 = vld [vmem:[#allocation8 + $0x530] sm:$0xff]  ;;  %v549_v54 = vld [vmem:[#allocation8 + $0x558] sm:$0xff] }
 0x19d   :  { %5986 = vtanh.f32 %v299_v48  ;;  %v4600_v48 = vpack.c.bf16 %v545_v37, %v541_v36  ;;  %v4602_v57 = vpack.c.bf16 %v544_v50, %v540_v49  ;;  %v4604_v62 = vpack.c.bf16 %v553_v55, %v549_v54  ;;  %v576_v36 = vld [vmem:[#allocation8 + $0x630] sm:$0xff]  ;;  %v579_v37 = vld [vmem:[#allocation8 + $0x648] sm:$0xff] }
 0x19e   :  { %5988 = vtanh.f32 %v372_v3  ;;  %v557_v3 = vld [vmem:[#allocation8 + $0x598] sm:$0xff]  ;;  %v4618_v46 = vpack.c.bf16 %v576_v36, %v572_v35  ;;  %v587_v54 = vld [vmem:[#allocation8 + $0x688] sm:$0xff]  ;;  %v610_v35 = vld [vmem:[#allocation8 + $0x740] sm:$0xff] }
 0x19f   :  { %v591_v55 = vld [vmem:[#allocation8 + $0x6a8] sm:$0xff]  ;;  %v614_v36 = vld [vmem:[#allocation8 + $0x760] sm:$0xff] }
 0x1a6   :  { %v5985_v4 = vpop.eup %5984 }
 0x1a7   :  { %v5987_v10 = vpop.eup %5986  ;;  %720 = vmatprep.mubr.f32.mxu0 %v5985_v4  ;;  %862 = vmatprep.mubr.f32.mxu1 %v5985_v4  ;;  %v561_v4 = vld [vmem:[#allocation8 + $0x5b8] sm:$0xff] }
 0x1a8   :  { %721 = vmatmul.mubr.f32.vlgmr.msra.gmra.mrb[2].mxu0 %v5987_v10  ;;  %863 = vmatmul.mubr.f32.vlgmr.msra.gmra.mrb[2].mxu1 %v5987_v10  ;;  %v5989_v38 = vpop.eup %5988  ;;  %v4608_v10 = vpack.c.bf16 %v561_v4, %v557_v3  ;;  %v595_v3 = vld [vmem:[#allocation8 + $0x6c8] sm:$0xff] }
 0x1a9   :  { %4459 = vmatpush1.bf16.msra.mxu0 %v4458_v63  ;;  %4587 = vmatpush1.bf16.msra.mxu1 %v4586_v0  ;;  %v548_v63 = vld [vmem:[#allocation8 + $0x550] sm:$0xff]  ;;  %v599_v4 = vld [vmem:[#allocation8 + $0x6e8] sm:$0xff] }
 0x1aa   :  { %4461 = vmatprep.subr.bf16.mxu0 %v4460_v5  ;;  %4589 = vmatprep.subr.bf16.mxu1 %v4588_v6  ;;  %v552_v0 = vld [vmem:[#allocation8 + $0x570] sm:$0xff]  ;;  %v4478_v5 = vpack.c.bf16 %v550_v59, %v546_v58  ;;  %v4622_v59 = vpack.c.bf16 %v584_v53, %v580_v52  ;;  %v618_v52 = vld [vmem:[#allocation8 + $0x780] sm:$0xff] }
 0x1ab   :  { %791 = vmatprep.mubr.f32.mxu0 %v5989_v38  ;;  %933 = vmatprep.mubr.f32.mxu1 %v5989_v38  ;;  %v4606_v6 = vpack.c.bf16 %v552_v0, %v548_v63  ;;  %v583_v38 = vld [vmem:[#allocation8 + $0x668] sm:$0xff]  ;;  %v4496_v63 = vpack.c.bf16 %v591_v55, %v587_v54  ;;  %v622_v53 = vld [vmem:[#allocation8 + $0x7a0] sm:$0xff] }
 0x1ac   :  { %v4492_v49 = vpack.c.bf16 %v583_v38, %v579_v37 }
 0x1ad   :  { %4463 = vmatpush1.bf16.msra.mxu0 %v4462_v14  ;;  %4591 = vmatpush1.bf16.msra.mxu1 %v4590_v15  ;;  %v567_v14 = vld [vmem:[#allocation8 + $0x5e8] sm:$0xff]  ;;  %v565_v15 = vld [vmem:[#allocation8 + $0x5d8] sm:$0xff] }
 0x1ae   :  { %4465 = vmatprep.subr.bf16.mxu0 %v4464_v18  ;;  %4593 = vmatprep.subr.bf16.mxu1 %v4592_v19  ;;  %v4610_v18 = vpack.c.bf16 %v560_v12, %v556_v11  ;;  %v562_v19 = vld [vmem:[#allocation8 + $0x5c0] sm:$0xff]  ;;  %v4484_v21 = vpack.c.bf16 %v567_v14, %v563_v13  ;;  %v4612_v22 = vpack.c.bf16 %v569_v16, %v565_v15  ;;  %v596_v13 = vld [vmem:[#allocation8 + $0x6d0] sm:$0xff]  ;;  %v603_v15 = vld [vmem:[#allocation8 + $0x708] sm:$0xff] }
 0x1af   :  { %v4486_v29 = vpack.c.bf16 %v566_v20, %v562_v19  ;;  %v4500_v11 = vpack.c.bf16 %v599_v4, %v595_v3  ;;  %v600_v14 = vld [vmem:[#allocation8 + $0x6f0] sm:$0xff]  ;;  %v607_v16 = vld [vmem:[#allocation8 + $0x728] sm:$0xff] }
 0x1b0   :  { %v4630_v20 = vpack.c.bf16 %v600_v14, %v596_v13  ;;  %v628_v4 = vld [vmem:[#allocation8 + $0x7d0] sm:$0xff]  ;;  %v960_v13 = vld [vmem:[#allocation11 + $0x80] sm:$0xff] }
 0x1b1   :  { %4467 = vmatpush1.bf16.msra.mxu0 %v4466_v26  ;;  %4595 = vmatpush1.bf16.msra.mxu1 %v4594_v27  ;;  %v575_v26 = vld [vmem:[#allocation8 + $0x628] sm:$0xff]  ;;  %v573_v27 = vld [vmem:[#allocation8 + $0x618] sm:$0xff] }
 0x1b2   :  { %4469 = vmatprep.subr.bf16.mxu0 %v4468_v30  ;;  %4597 = vmatprep.subr.bf16.mxu1 %v4596_v31  ;;  %v4614_v30 = vpack.c.bf16 %v568_v24, %v564_v23  ;;  %v570_v31 = vld [vmem:[#allocation8 + $0x600] sm:$0xff]  ;;  %v4488_v33 = vpack.c.bf16 %v575_v26, %v571_v25  ;;  %v4616_v34 = vpack.c.bf16 %v577_v28, %v573_v27  ;;  %v604_v26 = vld [vmem:[#allocation8 + $0x710] sm:$0xff]  ;;  %v611_v28 = vld [vmem:[#allocation8 + $0x748] sm:$0xff] }
 0x1b3   :  { %v4490_v45 = vpack.c.bf16 %v574_v32, %v570_v31  ;;  %v606_v23 = vld [vmem:[#allocation8 + $0x720] sm:$0xff]  ;;  %v4504_v24 = vpack.c.bf16 %v607_v16, %v603_v15  ;;  %v608_v27 = vld [vmem:[#allocation8 + $0x730] sm:$0xff]  ;;  %v617_v31 = vld [vmem:[#allocation8 + $0x778] sm:$0xff] }
 0x1b4   :  { %v946_v16 = vld [vmem:[#allocation11 + $0x10] sm:$0xff] }
 0x1b5   :  { %4471 = vmatpush1.bf16.msra.mxu0 %v4470_v39  ;;  %4599 = vmatpush1.bf16.msra.mxu1 %v4598_v40  ;;  %v581_v39 = vld [vmem:[#allocation8 + $0x658] sm:$0xff] }
 0x1b6   :  { %4473 = vmatprep.subr.bf16.mxu0 %v4472_v47  ;;  %4601 = vmatprep.subr.bf16.mxu1 %v4600_v48  ;;  %v585_v40 = vld [vmem:[#allocation8 + $0x678] sm:$0xff]  ;;  %v578_v47 = vld [vmem:[#allocation8 + $0x640] sm:$0xff] }
 0x1b7   :  { %v582_v48 = vld [vmem:[#allocation8 + $0x660] sm:$0xff]  ;;  %v4620_v50 = vpack.c.bf16 %v585_v40, %v581_v39  ;;  %v612_v39 = vld [vmem:[#allocation8 + $0x750] sm:$0xff] }
 0x1b8   :  { %v4494_v58 = vpack.c.bf16 %v582_v48, %v578_v47  ;;  %v616_v40 = vld [vmem:[#allocation8 + $0x770] sm:$0xff]  ;;  %v621_v47 = vld [vmem:[#allocation8 + $0x798] sm:$0xff] }
 0x1b9   :  { %4475 = vmatpush1.bf16.msra.mxu0 %v4474_v56  ;;  %4603 = vmatpush1.bf16.msra.mxu1 %v4602_v57  ;;  %v589_v56 = vld [vmem:[#allocation8 + $0x698] sm:$0xff] }
 0x1ba   :  { %4477 = vmatprep.subr.bf16.mxu0 %v4476_v60  ;;  %4605 = vmatprep.subr.bf16.mxu1 %v4604_v62  ;;  %v593_v57 = vld [vmem:[#allocation8 + $0x6b8] sm:$0xff]  ;;  %v586_v60 = vld [vmem:[#allocation8 + $0x680] sm:$0xff] }
 0x1bb   :  { %v590_v62 = vld [vmem:[#allocation8 + $0x6a0] sm:$0xff]  ;;  %v4624_v0 = vpack.c.bf16 %v593_v57, %v589_v56  ;;  %v625_v48 = vld [vmem:[#allocation8 + $0x7b8] sm:$0xff]  ;;  %v620_v56 = vld [vmem:[#allocation8 + $0x790] sm:$0xff] }
 0x1bc   :  { %v4498_v7 = vpack.c.bf16 %v590_v62, %v586_v60  ;;  %v4640_v55 = vpack.c.bf16 %v625_v48, %v621_v47  ;;  %v624_v57 = vld [vmem:[#allocation8 + $0x7b0] sm:$0xff]  ;;  %v629_v60 = vld [vmem:[#allocation8 + $0x7d8] sm:$0xff] }
 0x1bd   :  { %4479 = vmatpush1.bf16.msra.mxu0 %v4478_v5  ;;  %4607 = vmatpush1.bf16.msra.mxu1 %v4606_v6  ;;  %v597_v5 = vld [vmem:[#allocation8 + $0x6d8] sm:$0xff]  ;;  %v1041_v48 = vld [vmem:[#allocation11 + $0x308] sm:$0xff] }
 0x1be   :  { %4481 = vmatprep.subr.bf16.mxu0 %v4480_v9  ;;  %4609 = vmatprep.subr.bf16.mxu1 %v4608_v10  ;;  %v601_v6 = vld [vmem:[#allocation8 + $0x6f8] sm:$0xff]  ;;  %v594_v9 = vld [vmem:[#allocation8 + $0x6c0] sm:$0xff] }
 0x1bf   :  { %v598_v10 = vld [vmem:[#allocation8 + $0x6e0] sm:$0xff]  ;;  %v4628_v12 = vpack.c.bf16 %v601_v6, %v597_v5  ;;  %v633_v62 = vld [vmem:[#allocation8 + $0x7f8] sm:$0xff]  ;;  %v632_v5 = vld [vmem:[#allocation8 + $0x7f0] sm:$0xff] }
 0x1c0   :  { %v4502_v19 = vpack.c.bf16 %v598_v10, %v594_v9  ;;  %v4644_v3 = vpack.c.bf16 %v633_v62, %v629_v60  ;;  %v945_v6 = vld [vmem:[#allocation11 + $0x8] sm:$0xff]  ;;  %v963_v9 = vld [vmem:[#allocation11 + $0x98] sm:$0xff]  ;;  %v1026_v47 = vld [vmem:[#allocation11 + $0x290] sm:$0xff] }
 0x1c1   :  { %4483 = vmatpush1.bf16.msra.mxu0 %v4482_v17  ;;  %4611 = vmatpush1.bf16.msra.mxu1 %v4610_v18  ;;  %v605_v17 = vld [vmem:[#allocation8 + $0x718] sm:$0xff]  ;;  %v1073_v60 = vld [vmem:[#allocation11 + $0x408] sm:$0xff] }
 0x1c2   :  { %4485 = vmatprep.subr.bf16.mxu0 %v4484_v21  ;;  %4613 = vmatprep.subr.bf16.mxu1 %v4612_v22  ;;  %v609_v18 = vld [vmem:[#allocation8 + $0x738] sm:$0xff]  ;;  %v6464_v21 = vsub.s32 2, %v6442_v41  ;;  %v602_v22 = vld [vmem:[#allocation8 + $0x700] sm:$0xff]  ;;  %v1089_v62 = vld [vmem:[#allocation11 + $0x488] sm:$0xff] }
 0x1c3   :  { %v4632_v25 = vpack.c.bf16 %v609_v18, %v605_v17  ;;  %v962_v17 = vld [vmem:[#allocation11 + $0x90] sm:$0xff]  ;;  %v977_v18 = vld [vmem:[#allocation11 + $0x108] sm:$0xff] }
 0x1c4   :  { %v223_v32 = vrot.slane %v6447_v43, %v6464_v21  ;;  %v4638_v43 = vpack.c.bf16 %v616_v40, %v612_v39  ;;  %v1024_v39 = vld [vmem:[#allocation11 + $0x280] sm:$0xff] }
 0x1c5   :  { %4487 = vmatpush1.bf16.msra.mxu0 %v4486_v29  ;;  %4615 = vmatpush1.bf16.msra.mxu1 %v4614_v30  ;;  %v615_v29 = vld [vmem:[#allocation8 + $0x768] sm:$0xff]  ;;  %v613_v30 = vld [vmem:[#allocation8 + $0x758] sm:$0xff] }
 0x1c6   :  { %4489 = vmatprep.subr.bf16.mxu0 %v4488_v33  ;;  %4617 = vmatprep.subr.bf16.mxu1 %v4616_v34  ;;  %v4506_v33 = vpack.c.bf16 %v606_v23, %v602_v22  ;;  %v4634_v34 = vpack.c.bf16 %v608_v27, %v604_v26  ;;  %v4508_v37 = vpack.c.bf16 %v615_v29, %v611_v28  ;;  %v995_v22 = vld [vmem:[#allocation11 + $0x198] sm:$0xff]  ;;  %v992_v26 = vld [vmem:[#allocation11 + $0x180] sm:$0xff]  ;;  %v978_v29 = vld [vmem:[#allocation11 + $0x110] sm:$0xff] }
 0x1c7   :  { %v4636_v38 = vpack.c.bf16 %v617_v31, %v613_v30  ;;  %v994_v30 = vld [vmem:[#allocation11 + $0x190] sm:$0xff]  ;;  %v1009_v31 = vld [vmem:[#allocation11 + $0x208] sm:$0xff] }
 0x1c9   :  { %4491 = vmatpush1.bf16.msra.mxu0 %v4490_v45  ;;  %4619 = vmatpush1.bf16.msra.mxu1 %v4618_v46  ;;  %v619_v45 = vld [vmem:[#allocation8 + $0x788] sm:$0xff] }
 0x1ca   :  { %4493 = vmatprep.subr.bf16.mxu0 %v4492_v49  ;;  %4621 = vmatprep.subr.bf16.mxu1 %v4620_v50  ;;  %v623_v46 = vld [vmem:[#allocation8 + $0x7a8] sm:$0xff]  ;;  %v370_v49 = vadd.f32 %v6461_v61, %v223_v32  ;;  %v4510_v50 = vpack.c.bf16 %v614_v36, %v610_v35  ;;  %v4514_v61 = vpack.c.bf16 %v622_v53, %v618_v52  ;;  %v1027_v35 = vld [vmem:[#allocation11 + $0x298] sm:$0xff] }
 0x1cb   :  { %v4512_v54 = vpack.c.bf16 %v623_v46, %v619_v45  ;;  %v1010_v46 = vld [vmem:[#allocation11 + $0x210] sm:$0xff] }
 0x1cc   :  { %5990 = vtanh.f32 %v370_v49  ;;  %v1057_v49 = vld [vmem:[#allocation11 + $0x388] sm:$0xff]  ;;  %v4786_v53 = vpack.c.bf16 %v1026_v47, %v1010_v46  ;;  %v1170_v47 = vld [vmem:[#allocation11 + $0x710] sm:$0xff] }
 0x1cd   :  { %4495 = vmatpush1.bf16.msra.mxu0 %v4494_v58  ;;  %4623 = vmatpush1.bf16.msra.mxu1 %v4622_v59  ;;  %v627_v58 = vld [vmem:[#allocation8 + $0x7c8] sm:$0xff] }
 0x1ce   :  { %4497 = vmatprep.subr.bf16.mxu0 %v4496_v63  ;;  %4625 = vmatprep.subr.bf16.mxu1 %v4624_v0  ;;  %v631_v59 = vld [vmem:[#allocation8 + $0x7e8] sm:$0xff]  ;;  %v4642_v63 = vpack.c.bf16 %v624_v57, %v620_v56  ;;  %v626_v0 = vld [vmem:[#allocation8 + $0x7c0] sm:$0xff]  ;;  %v4660_v56 = vpack.c.bf16 %v1057_v49, %v1041_v48  ;;  %v1186_v48 = vld [vmem:[#allocation11 + $0x790] sm:$0xff] }
 0x1cf   :  { %v4516_v2 = vpack.c.bf16 %v631_v59, %v627_v58  ;;  %v4518_v10 = vpack.c.bf16 %v630_v1, %v626_v0  ;;  %v1042_v58 = vld [vmem:[#allocation11 + $0x310] sm:$0xff]  ;;  %v1201_v49 = vld [vmem:[#allocation11 + $0x808] sm:$0xff] }
 0x1d0   :  { %v1058_v59 = vld [vmem:[#allocation11 + $0x390] sm:$0xff] }
 0x1d1   :  { %4499 = vmatpush1.bf16.msra.mxu0 %v4498_v7  ;;  %4627 = vmatpush1.bf16.msra.mxu1 %v4626_v8  ;;  %v961_v7 = vld [vmem:[#allocation11 + $0x88] sm:$0xff]  ;;  %v947_v8 = vld [vmem:[#allocation11 + $0x18] sm:$0xff]  ;;  %v4790_v1 = vpack.c.bf16 %v1058_v59, %v1042_v58  ;;  %v1202_v59 = vld [vmem:[#allocation11 + $0x810] sm:$0xff] }
 0x1d2   :  { %4501 = vmatprep.subr.bf16.mxu0 %v4500_v11  ;;  %4629 = vmatprep.subr.bf16.mxu1 %v4628_v12  ;;  %v4646_v11 = vpack.c.bf16 %v632_v5, %v628_v4  ;;  %v944_v12 = vld [vmem:[#allocation11] sm:$0xff]  ;;  %v4648_v14 = vpack.c.bf16 %v961_v7, %v945_v6  ;;  %v4776_v15 = vpack.c.bf16 %v963_v9, %v947_v8  ;;  %v1074_v6 = vld [vmem:[#allocation11 + $0x410] sm:$0xff]  ;;  %v1105_v8 = vld [vmem:[#allocation11 + $0x508] sm:$0xff] }
 0x1d3   :  { %v4650_v23 = vpack.c.bf16 %v960_v13, %v944_v12  ;;  %v4664_v4 = vpack.c.bf16 %v1089_v62, %v1073_v60  ;;  %v1090_v7 = vld [vmem:[#allocation11 + $0x490] sm:$0xff]  ;;  %v1121_v9 = vld [vmem:[#allocation11 + $0x588] sm:$0xff] }
 0x1d4   :  { %v4794_v13 = vpack.c.bf16 %v1090_v7, %v1074_v6  ;;  %v1218_v60 = vld [vmem:[#allocation11 + $0x890] sm:$0xff]  ;;  %v1233_v62 = vld [vmem:[#allocation11 + $0x908] sm:$0xff] }
 0x1d5   :  { %4503 = vmatpush1.bf16.msra.mxu0 %v4502_v19  ;;  %4631 = vmatpush1.bf16.msra.mxu1 %v4630_v20  ;;  %v993_v19 = vld [vmem:[#allocation11 + $0x188] sm:$0xff]  ;;  %v979_v20 = vld [vmem:[#allocation11 + $0x118] sm:$0xff]  ;;  %v1234_v7 = vld [vmem:[#allocation11 + $0x910] sm:$0xff] }
 0x1d6   :  { %4505 = vmatprep.subr.bf16.mxu0 %v4504_v24  ;;  %4633 = vmatprep.subr.bf16.mxu1 %v4632_v25  ;;  %v4778_v24 = vpack.c.bf16 %v962_v17, %v946_v16  ;;  %v976_v25 = vld [vmem:[#allocation11 + $0x100] sm:$0xff]  ;;  %v4652_v27 = vpack.c.bf16 %v993_v19, %v977_v18  ;;  %v4780_v28 = vpack.c.bf16 %v995_v22, %v979_v20  ;;  %v5991_v32 = vpop.eup %5990  ;;  %v1106_v18 = vld [vmem:[#allocation11 + $0x510] sm:$0xff]  ;;  %v1137_v20 = vld [vmem:[#allocation11 + $0x608] sm:$0xff] }
 0x1d7   :  { %v4654_v36 = vpack.c.bf16 %v992_v26, %v976_v25  ;;  %v4668_v16 = vpack.c.bf16 %v1121_v9, %v1105_v8  ;;  %v1122_v19 = vld [vmem:[#allocation11 + $0x590] sm:$0xff]  ;;  %v1153_v22 = vld [vmem:[#allocation11 + $0x688] sm:$0xff] }
 0x1d8   :  { %v4798_v26 = vpack.c.bf16 %v1122_v19, %v1106_v18  ;;  %v1250_v8 = vld [vmem:[#allocation11 + $0x990] sm:$0xff]  ;;  %v1265_v9 = vld [vmem:[#allocation11 + $0xa08] sm:$0xff] }
 0x1d9   :  { %4507 = vmatpush1.bf16.msra.mxu0 %v4506_v33  ;;  %4635 = vmatpush1.bf16.msra.mxu1 %v4634_v34  ;;  %v1025_v33 = vld [vmem:[#allocation11 + $0x288] sm:$0xff]  ;;  %v1011_v34 = vld [vmem:[#allocation11 + $0x218] sm:$0xff]  ;;  %v1266_v19 = vld [vmem:[#allocation11 + $0xa10] sm:$0xff] }
 0x1da   :  { %4509 = vmatprep.subr.bf16.mxu0 %v4508_v37  ;;  %4637 = vmatprep.subr.bf16.mxu1 %v4636_v38  ;;  %v4782_v37 = vpack.c.bf16 %v994_v30, %v978_v29  ;;  %v1008_v38 = vld [vmem:[#allocation11 + $0x200] sm:$0xff]  ;;  %v4656_v40 = vpack.c.bf16 %v1025_v33, %v1009_v31  ;;  %v4784_v45 = vpack.c.bf16 %v1027_v35, %v1011_v34  ;;  %v1138_v31 = vld [vmem:[#allocation11 + $0x610] sm:$0xff]  ;;  %v1169_v33 = vld [vmem:[#allocation11 + $0x708] sm:$0xff] }
 0x1db   :  { %v4658_v52 = vpack.c.bf16 %v1024_v39, %v1008_v38  ;;  %v4672_v29 = vpack.c.bf16 %v1153_v22, %v1137_v20  ;;  %v1185_v34 = vld [vmem:[#allocation11 + $0x788] sm:$0xff]  ;;  %v1171_v35 = vld [vmem:[#allocation11 + $0x718] sm:$0xff]  ;;  %v1168_v39 = vld [vmem:[#allocation11 + $0x700] sm:$0xff] }
 0x1dc   :  { %v1282_v20 = vld [vmem:[#allocation11 + $0xa90] sm:$0xff]  ;;  %v1297_v22 = vld [vmem:[#allocation11 + $0xb08] sm:$0xff] }
 0x1dd   :  { %4511 = vmatpush1.bf16.msra.mxu0 %v4510_v50  ;;  %4639 = vmatpush1.bf16.msra.mxu1 %v4638_v43  ;;  %v1043_v50 = vld [vmem:[#allocation11 + $0x318] sm:$0xff] }
 0x1de   :  { %4513 = vmatprep.subr.bf16.mxu0 %v4512_v54  ;;  %4641 = vmatprep.subr.bf16.mxu1 %v4640_v55  ;;  %v1059_v43 = vld [vmem:[#allocation11 + $0x398] sm:$0xff]  ;;  %v1040_v54 = vld [vmem:[#allocation11 + $0x300] sm:$0xff] }
 0x1df   :  { %v1056_v55 = vld [vmem:[#allocation11 + $0x380] sm:$0xff]  ;;  %v4788_v57 = vpack.c.bf16 %v1059_v43, %v1043_v50  ;;  %v1217_v50 = vld [vmem:[#allocation11 + $0x888] sm:$0xff]  ;;  %v1203_v43 = vld [vmem:[#allocation11 + $0x818] sm:$0xff] }
 0x1e0   :  { %v4662_v0 = vpack.c.bf16 %v1056_v55, %v1040_v54  ;;  %v4806_v54 = vpack.c.bf16 %v1186_v48, %v1170_v47  ;;  %v1200_v55 = vld [vmem:[#allocation11 + $0x800] sm:$0xff]  ;;  %v1330_v48 = vld [vmem:[#allocation11 + $0xc10] sm:$0xff] }
 0x1e1   :  { %4515 = vmatpush1.bf16.msra.mxu0 %v4514_v61  ;;  %4643 = vmatpush1.bf16.msra.mxu1 %v4642_v63  ;;  %v1075_v61 = vld [vmem:[#allocation11 + $0x418] sm:$0xff]  ;;  %v1344_v47 = vld [vmem:[#allocation11 + $0xc80] sm:$0xff] }
 0x1e2   :  { %4517 = vmatprep.subr.bf16.mxu0 %v4516_v2  ;;  %4645 = vmatprep.subr.bf16.mxu1 %v4644_v3  ;;  %v1091_v63 = vld [vmem:[#allocation11 + $0x498] sm:$0xff]  ;;  %v1072_v2 = vld [vmem:[#allocation11 + $0x400] sm:$0xff] }
 0x1e3   :  { %v1088_v3 = vld [vmem:[#allocation11 + $0x480] sm:$0xff]  ;;  %v4792_v5 = vpack.c.bf16 %v1091_v63, %v1075_v61  ;;  %v1249_v61 = vld [vmem:[#allocation11 + $0x988] sm:$0xff]  ;;  %v1235_v63 = vld [vmem:[#allocation11 + $0x918] sm:$0xff] }
 0x1e4   :  { %v4666_v12 = vpack.c.bf16 %v1088_v3, %v1072_v2  ;;  %v4810_v2 = vpack.c.bf16 %v1218_v60, %v1202_v59  ;;  %v1232_v3 = vld [vmem:[#allocation11 + $0x900] sm:$0xff] }
 0x1e5   :  { %4519 = vmatpush1.bf16.msra.mxu0 %v4518_v10  ;;  %4647 = vmatpush1.bf16.msra.mxu1 %v4646_v11  ;;  %v1107_v10 = vld [vmem:[#allocation11 + $0x518] sm:$0xff] }
 0x1e6   :  { %4649 = vmatprep.subr.bf16.mxu0 %v4648_v14  ;;  %4777 = vmatprep.subr.bf16.mxu1 %v4776_v15  ;;  %v1123_v11 = vld [vmem:[#allocation11 + $0x598] sm:$0xff]  ;;  %v1104_v14 = vld [vmem:[#allocation11 + $0x500] sm:$0xff] }
 0x1e7   :  { %v1120_v15 = vld [vmem:[#allocation11 + $0x580] sm:$0xff]  ;;  %v4796_v17 = vpack.c.bf16 %v1123_v11, %v1107_v10  ;;  %v1281_v10 = vld [vmem:[#allocation11 + $0xa88] sm:$0xff]  ;;  %v1267_v11 = vld [vmem:[#allocation11 + $0xa18] sm:$0xff] }
 0x1e8   :  { %792 = vmatmul.mubr.f32.vlgmr.msra.gmra.mrb[2].mxu0 %v5991_v32  ;;  %934 = vmatmul.mubr.f32.vlgmr.msra.gmra.mrb[2].mxu1 %v5991_v32  ;;  %v4670_v25 = vpack.c.bf16 %v1120_v15, %v1104_v14  ;;  %v1154_v32 = vld [vmem:[#allocation11 + $0x690] sm:$0xff]  ;;  %v4814_v14 = vpack.c.bf16 %v1250_v8, %v1234_v7  ;;  %v1264_v15 = vld [vmem:[#allocation11 + $0xa00] sm:$0xff] }
 0x1e9   :  { %4651 = vmatpush1.bf16.msra.mxu0 %v4650_v23  ;;  %4779 = vmatpush1.bf16.msra.mxu1 %v4778_v24  ;;  %v1139_v23 = vld [vmem:[#allocation11 + $0x618] sm:$0xff]  ;;  %v4802_v38 = vpack.c.bf16 %v1154_v32, %v1138_v31  ;;  %v1298_v32 = vld [vmem:[#allocation11 + $0xb10] sm:$0xff] }
 0x1ea   :  { %4653 = vmatprep.subr.bf16.mxu0 %v4652_v27  ;;  %4781 = vmatprep.subr.bf16.mxu1 %v4780_v28  ;;  %v1155_v24 = vld [vmem:[#allocation11 + $0x698] sm:$0xff]  ;;  %v1136_v27 = vld [vmem:[#allocation11 + $0x600] sm:$0xff] }
 0x1eb   :  { %v1152_v28 = vld [vmem:[#allocation11 + $0x680] sm:$0xff]  ;;  %v4800_v30 = vpack.c.bf16 %v1155_v24, %v1139_v23  ;;  %v1313_v23 = vld [vmem:[#allocation11 + $0xb88] sm:$0xff]  ;;  %v1299_v24 = vld [vmem:[#allocation11 + $0xb18] sm:$0xff] }
 0x1ed   :  { %4655 = vmatpush1.bf16.msra.mxu0 %v4654_v36  ;;  %4783 = vmatpush1.bf16.msra.mxu1 %v4782_v37  ;;  %v1187_v36 = vld [vmem:[#allocation11 + $0x798] sm:$0xff]  ;;  %v4674_v37 = vpack.c.bf16 %v1152_v28, %v1136_v27  ;;  %v4818_v27 = vpack.c.bf16 %v1282_v20, %v1266_v19  ;;  %v1296_v28 = vld [vmem:[#allocation11 + $0xb00] sm:$0xff]  ;;  %v1426_v20 = vld [vmem:[#allocation11 + $0xf10] sm:$0xff] }
 0x1ee   :  { %4657 = vmatprep.subr.bf16.mxu0 %v4656_v40  ;;  %4785 = vmatprep.subr.bf16.mxu1 %v4784_v45  ;;  %v1184_v40 = vld [vmem:[#allocation11 + $0x780] sm:$0xff]  ;;  %v4676_v45 = vpack.c.bf16 %v1185_v34, %v1169_v33  ;;  %v4804_v46 = vpack.c.bf16 %v1187_v36, %v1171_v35  ;;  %v1314_v33 = vld [vmem:[#allocation11 + $0xb90] sm:$0xff]  ;;  %v1329_v34 = vld [vmem:[#allocation11 + $0xc08] sm:$0xff] }
 0x1ef   :  { %v1345_v35 = vld [vmem:[#allocation11 + $0xc88] sm:$0xff]  ;;  %v1331_v36 = vld [vmem:[#allocation11 + $0xc18] sm:$0xff]  ;;  %v1440_v19 = vld [vmem:[#allocation11 + $0xf80] sm:$0xff] }
 0x1f1   :  { %4659 = vmatpush1.bf16.msra.mxu0 %v4658_v52  ;;  %4787 = vmatpush1.bf16.msra.mxu1 %v4786_v53  ;;  %v1219_v52 = vld [vmem:[#allocation11 + $0x898] sm:$0xff]  ;;  %v4678_v53 = vpack.c.bf16 %v1184_v40, %v1168_v39  ;;  %v4822_v39 = vpack.c.bf16 %v1314_v33, %v1298_v32  ;;  %v4696_v40 = vpack.c.bf16 %v1345_v35, %v1329_v34 }
 0x1f2   :  { %4661 = vmatprep.subr.bf16.mxu0 %v4660_v56  ;;  %4789 = vmatprep.subr.bf16.mxu1 %v4788_v57  ;;  %v1216_v56 = vld [vmem:[#allocation11 + $0x880] sm:$0xff]  ;;  %v4680_v57 = vpack.c.bf16 %v1217_v50, %v1201_v49  ;;  %v4808_v58 = vpack.c.bf16 %v1219_v52, %v1203_v43  ;;  %v1346_v50 = vld [vmem:[#allocation11 + $0xc90] sm:$0xff]  ;;  %v1361_v52 = vld [vmem:[#allocation11 + $0xd08] sm:$0xff] }
 0x1f3   :  { %v4826_v43 = vpack.c.bf16 %v1346_v50, %v1330_v48  ;;  %v1458_v48 = vld [vmem:[#allocation11 + $0x1010] sm:$0xff]  ;;  %v1489_v50 = vld [vmem:[#allocation11 + $0x1108] sm:$0xff] }
 0x1f5   :  { %4663 = vmatpush1.bf16.msra.mxu0 %v4662_v0  ;;  %4791 = vmatpush1.bf16.msra.mxu1 %v4790_v1  ;;  %v1251_v0 = vld [vmem:[#allocation11 + $0x998] sm:$0xff]  ;;  %v4682_v1 = vpack.c.bf16 %v1216_v56, %v1200_v55 }
 0x1f6   :  { %4665 = vmatprep.subr.bf16.mxu0 %v4664_v4  ;;  %4793 = vmatprep.subr.bf16.mxu1 %v4792_v5  ;;  %v1248_v4 = vld [vmem:[#allocation11 + $0x980] sm:$0xff]  ;;  %v4684_v5 = vpack.c.bf16 %v1249_v61, %v1233_v62  ;;  %v4812_v6 = vpack.c.bf16 %v1251_v0, %v1235_v63  ;;  %v1379_v56 = vld [vmem:[#allocation11 + $0xd98] sm:$0xff]  ;;  %v1362_v62 = vld [vmem:[#allocation11 + $0xd10] sm:$0xff] }
 0x1f7   :  { %v1378_v61 = vld [vmem:[#allocation11 + $0xd90] sm:$0xff]  ;;  %v1393_v0 = vld [vmem:[#allocation11 + $0xe08] sm:$0xff] }
 0x1f8   :  { %v4830_v63 = vpack.c.bf16 %v1378_v61, %v1362_v62  ;;  %v1521_v62 = vld [vmem:[#allocation11 + $0x1208] sm:$0xff] }
 0x1f9   :  { %4667 = vmatpush1.bf16.msra.mxu0 %v4666_v12  ;;  %4795 = vmatpush1.bf16.msra.mxu1 %v4794_v13  ;;  %v1283_v12 = vld [vmem:[#allocation11 + $0xa98] sm:$0xff]  ;;  %v4686_v13 = vpack.c.bf16 %v1248_v4, %v1232_v3 }
 0x1fa   :  { %4669 = vmatprep.subr.bf16.mxu0 %v4668_v16  ;;  %4797 = vmatprep.subr.bf16.mxu1 %v4796_v17  ;;  %v1280_v16 = vld [vmem:[#allocation11 + $0xa80] sm:$0xff]  ;;  %v4688_v17 = vpack.c.bf16 %v1281_v10, %v1265_v9  ;;  %v4816_v18 = vpack.c.bf16 %v1283_v12, %v1267_v11  ;;  %v1411_v4 = vld [vmem:[#allocation11 + $0xe98] sm:$0xff]  ;;  %v1394_v9 = vld [vmem:[#allocation11 + $0xe10] sm:$0xff] }
 0x1fb   :  { %v1410_v10 = vld [vmem:[#allocation11 + $0xe90] sm:$0xff]  ;;  %v1425_v11 = vld [vmem:[#allocation11 + $0xf08] sm:$0xff] }
 0x1fc   :  { %v4834_v12 = vpack.c.bf16 %v1410_v10, %v1394_v9 }
 0x1fd   :  { %4671 = vmatpush1.bf16.msra.mxu0 %v4670_v25  ;;  %4799 = vmatpush1.bf16.msra.mxu1 %v4798_v26  ;;  %v1315_v25 = vld [vmem:[#allocation11 + $0xb98] sm:$0xff]  ;;  %v4690_v26 = vpack.c.bf16 %v1280_v16, %v1264_v15 }
 0x1fe   :  { %4673 = vmatprep.subr.bf16.mxu0 %v4672_v29  ;;  %4801 = vmatprep.subr.bf16.mxu1 %v4800_v30  ;;  %v1312_v29 = vld [vmem:[#allocation11 + $0xb80] sm:$0xff]  ;;  %v4692_v30 = vpack.c.bf16 %v1313_v23, %v1297_v22  ;;  %v4820_v31 = vpack.c.bf16 %v1315_v25, %v1299_v24  ;;  %v1443_v15 = vld [vmem:[#allocation11 + $0xf98] sm:$0xff]  ;;  %v1442_v23 = vld [vmem:[#allocation11 + $0xf90] sm:$0xff] }
 0x1ff   :  { %v4838_v24 = vpack.c.bf16 %v1442_v23, %v1426_v20  ;;  %v1457_v25 = vld [vmem:[#allocation11 + $0x1008] sm:$0xff]  ;;  %v1568_v20 = vld [vmem:[#allocation11 + $0x1380] sm:$0xff] }
 0x201   :  { %4675 = vmatpush1.bf16.msra.mxu0 %v4674_v37  ;;  %4803 = vmatpush1.bf16.msra.mxu1 %v4802_v38  ;;  %v1347_v37 = vld [vmem:[#allocation11 + $0xc98] sm:$0xff]  ;;  %v4694_v38 = vpack.c.bf16 %v1312_v29, %v1296_v28 }
 0x202   :  { %4677 = vmatprep.subr.bf16.mxu0 %v4676_v45  ;;  %4805 = vmatprep.subr.bf16.mxu1 %v4804_v46  ;;  %v4824_v45 = vpack.c.bf16 %v1347_v37, %v1331_v36  ;;  %v1328_v46 = vld [vmem:[#allocation11 + $0xc00] sm:$0xff]  ;;  %v1475_v29 = vld [vmem:[#allocation11 + $0x1098] sm:$0xff] }
 0x203   :  { %v4698_v49 = vpack.c.bf16 %v1344_v47, %v1328_v46  ;;  %v1456_v46 = vld [vmem:[#allocation11 + $0x1000] sm:$0xff] }
 0x204   :  { %v1472_v47 = vld [vmem:[#allocation11 + $0x1080] sm:$0xff] }
 0x205   :  { %4679 = vmatpush1.bf16.msra.mxu0 %v4678_v53  ;;  %4807 = vmatpush1.bf16.msra.mxu1 %v4806_v54  ;;  %v1377_v53 = vld [vmem:[#allocation11 + $0xd88] sm:$0xff]  ;;  %v1363_v54 = vld [vmem:[#allocation11 + $0xd18] sm:$0xff] }
 0x206   :  { %4681 = vmatprep.subr.bf16.mxu0 %v4680_v57  ;;  %4809 = vmatprep.subr.bf16.mxu1 %v4808_v58  ;;  %v4700_v55 = vpack.c.bf16 %v1377_v53, %v1361_v52  ;;  %v1360_v57 = vld [vmem:[#allocation11 + $0xd00] sm:$0xff]  ;;  %v4828_v59 = vpack.c.bf16 %v1379_v56, %v1363_v54  ;;  %v1491_v52 = vld [vmem:[#allocation11 + $0x1118] sm:$0xff]  ;;  %v4714_v54 = vpack.c.bf16 %v1472_v47, %v1456_v46 }
 0x207   :  { %v1376_v58 = vld [vmem:[#allocation11 + $0xd80] sm:$0xff]  ;;  %v1507_v53 = vld [vmem:[#allocation11 + $0x1198] sm:$0xff] }
 0x208   :  { %v4702_v60 = vpack.c.bf16 %v1376_v58, %v1360_v57  ;;  %v1488_v56 = vld [vmem:[#allocation11 + $0x1100] sm:$0xff]  ;;  %v1619_v46 = vld [vmem:[#allocation11 + $0x1518] sm:$0xff] }
 0x209   :  { %4683 = vmatpush1.bf16.msra.mxu0 %v4682_v1  ;;  %4811 = vmatpush1.bf16.msra.mxu1 %v4810_v2  ;;  %v1409_v1 = vld [vmem:[#allocation11 + $0xe88] sm:$0xff]  ;;  %v1395_v2 = vld [vmem:[#allocation11 + $0xe18] sm:$0xff]  ;;  %v1504_v57 = vld [vmem:[#allocation11 + $0x1180] sm:$0xff] }
 0x20a   :  { %4685 = vmatprep.subr.bf16.mxu0 %v4684_v5  ;;  %4813 = vmatprep.subr.bf16.mxu1 %v4812_v6  ;;  %v4704_v3 = vpack.c.bf16 %v1409_v1, %v1393_v0  ;;  %v1392_v5 = vld [vmem:[#allocation11 + $0xe00] sm:$0xff]  ;;  %v4832_v7 = vpack.c.bf16 %v1411_v4, %v1395_v2  ;;  %v4844_v0 = vpack.c.bf16 %v1507_v53, %v1491_v52  ;;  %v1537_v1 = vld [vmem:[#allocation11 + $0x1288] sm:$0xff]  ;;  %v1523_v2 = vld [vmem:[#allocation11 + $0x1218] sm:$0xff] }
 0x20b   :  { %v1408_v6 = vld [vmem:[#allocation11 + $0xe80] sm:$0xff]  ;;  %v4720_v9 = vpack.c.bf16 %v1537_v1, %v1521_v62  ;;  %v1635_v47 = vld [vmem:[#allocation11 + $0x1598] sm:$0xff] }
 0x20c   :  { %v4706_v8 = vpack.c.bf16 %v1408_v6, %v1392_v5  ;;  %v4718_v5 = vpack.c.bf16 %v1504_v57, %v1488_v56  ;;  %v4860_v53 = vpack.c.bf16 %v1635_v47, %v1619_v46  ;;  %v1649_v56 = vld [vmem:[#allocation11 + $0x1608] sm:$0xff]  ;;  %v1664_v1 = vld [vmem:[#allocation11 + $0x1680] sm:$0xff] }
 0x20d   :  { %4687 = vmatpush1.bf16.msra.mxu0 %v4686_v13  ;;  %4815 = vmatpush1.bf16.msra.mxu1 %v4814_v14  ;;  %v1441_v13 = vld [vmem:[#allocation11 + $0xf88] sm:$0xff]  ;;  %v1427_v14 = vld [vmem:[#allocation11 + $0xf18] sm:$0xff] }
 0x20e   :  { %4689 = vmatprep.subr.bf16.mxu0 %v4688_v17  ;;  %4817 = vmatprep.subr.bf16.mxu1 %v4816_v18  ;;  %v4708_v16 = vpack.c.bf16 %v1441_v13, %v1425_v11  ;;  %v4836_v17 = vpack.c.bf16 %v1443_v15, %v1427_v14  ;;  %v1424_v18 = vld [vmem:[#allocation11 + $0xf00] sm:$0xff]  ;;  %v1522_v11 = vld [vmem:[#allocation11 + $0x1210] sm:$0xff]  ;;  %v1553_v13 = vld [vmem:[#allocation11 + $0x1308] sm:$0xff] }
 0x20f   :  { %v4710_v22 = vpack.c.bf16 %v1440_v19, %v1424_v18  ;;  %v1569_v14 = vld [vmem:[#allocation11 + $0x1388] sm:$0xff]  ;;  %v1555_v15 = vld [vmem:[#allocation11 + $0x1318] sm:$0xff]  ;;  %v1552_v19 = vld [vmem:[#allocation11 + $0x1300] sm:$0xff] }
 0x210   :  { %v1665_v57 = vld [vmem:[#allocation11 + $0x1688] sm:$0xff] }
 0x211   :  { %4691 = vmatpush1.bf16.msra.mxu0 %v4690_v26  ;;  %4819 = vmatpush1.bf16.msra.mxu1 %v4818_v27  ;;  %v1473_v26 = vld [vmem:[#allocation11 + $0x1088] sm:$0xff]  ;;  %v1459_v27 = vld [vmem:[#allocation11 + $0x1018] sm:$0xff] }
 0x212   :  { %4693 = vmatprep.subr.bf16.mxu0 %v4692_v30  ;;  %4821 = vmatprep.subr.bf16.mxu1 %v4820_v31  ;;  %v4712_v28 = vpack.c.bf16 %v1473_v26, %v1457_v25  ;;  %v4840_v30 = vpack.c.bf16 %v1475_v29, %v1459_v27  ;;  %v6469_v31 = vld [vmem:[#allocation10] sm:$0xf]  ;;  %v1570_v25 = vld [vmem:[#allocation11 + $0x1390] sm:$0xff]  ;;  %v1585_v26 = vld [vmem:[#allocation11 + $0x1408] sm:$0xff] }
 0x213   :  { %v639_v32 = vrot.slane %v6469_v31, %v6445_v42  ;;  %v643_v33 = vrot.slane %v6469_v31, %v6450_v44  ;;  %v651_v36 = vrot.slane %v6469_v31, %v6457_v51  ;;  %v1601_v27 = vld [vmem:[#allocation11 + $0x1488] sm:$0xff]  ;;  %v1603_v29 = vld [vmem:[#allocation11 + $0x1498] sm:$0xff] }
 0x215   :  { %4695 = vmatpush1.bf16.msra.mxu0 %v4694_v38  ;;  %4823 = vmatpush1.bf16.msra.mxu1 %v4822_v39 }
 0x216   :  { %4697 = vmatprep.subr.bf16.mxu0 %v4696_v40  ;;  %4825 = vmatprep.subr.bf16.mxu1 %v4824_v45 }
 0x219   :  { %4699 = vmatpush1.bf16.msra.mxu0 %v4698_v49  ;;  %4827 = vmatpush1.bf16.msra.mxu1 %v4826_v43  ;;  %v1474_v49 = vld [vmem:[#allocation11 + $0x1090] sm:$0xff]  ;;  %v1505_v43 = vld [vmem:[#allocation11 + $0x1188] sm:$0xff] }
 0x21a   :  { %4701 = vmatprep.subr.bf16.mxu0 %v4700_v55  ;;  %4829 = vmatprep.subr.bf16.mxu1 %v4828_v59  ;;  %v4842_v55 = vpack.c.bf16 %v1474_v49, %v1458_v48  ;;  %v1490_v59 = vld [vmem:[#allocation11 + $0x1110] sm:$0xff] }
 0x21d   :  { %4703 = vmatpush1.bf16.msra.mxu0 %v4702_v60  ;;  %4831 = vmatpush1.bf16.msra.mxu1 %v4830_v63  ;;  %v1506_v60 = vld [vmem:[#allocation11 + $0x1190] sm:$0xff]  ;;  %v4716_v63 = vpack.c.bf16 %v1505_v43, %v1489_v50  ;;  %v1616_v50 = vld [vmem:[#allocation11 + $0x1500] sm:$0xff] }
 0x21e   :  { %4705 = vmatprep.subr.bf16.mxu0 %v4704_v3  ;;  %4833 = vmatprep.subr.bf16.mxu1 %v4832_v7  ;;  %v1539_v3 = vld [vmem:[#allocation11 + $0x1298] sm:$0xff]  ;;  %v4846_v6 = vpack.c.bf16 %v1506_v60, %v1490_v59  ;;  %v1520_v7 = vld [vmem:[#allocation11 + $0x1200] sm:$0xff] }
 0x21f   :  { %v4848_v10 = vpack.c.bf16 %v1539_v3, %v1523_v2  ;;  %v1632_v43 = vld [vmem:[#allocation11 + $0x1580] sm:$0xff]  ;;  %v1651_v59 = vld [vmem:[#allocation11 + $0x1618] sm:$0xff]  ;;  %v4736_v2 = vpack.c.bf16 %v1665_v57, %v1649_v56 }
 0x220   :  { %v1667_v60 = vld [vmem:[#allocation11 + $0x1698] sm:$0xff]  ;;  %v4734_v62 = vpack.c.bf16 %v1632_v43, %v1616_v50  ;;  %v1777_v50 = vld [vmem:[#allocation11 + $0x1a08] sm:$0xff]  ;;  %v1776_v56 = vld [vmem:[#allocation11 + $0x1a00] sm:$0xff] }
 0x221   :  { %4707 = vmatpush1.bf16.msra.mxu0 %v4706_v8  ;;  %4835 = vmatpush1.bf16.msra.mxu1 %v4834_v12  ;;  %v1536_v8 = vld [vmem:[#allocation11 + $0x1280] sm:$0xff]  ;;  %v1538_v12 = vld [vmem:[#allocation11 + $0x1290] sm:$0xff]  ;;  %v4864_v3 = vpack.c.bf16 %v1667_v60, %v1651_v59  ;;  %v1793_v43 = vld [vmem:[#allocation11 + $0x1a88] sm:$0xff] }
 0x222   :  { %4709 = vmatprep.subr.bf16.mxu0 %v4708_v16  ;;  %4837 = vmatprep.subr.bf16.mxu1 %v4836_v17  ;;  %v1571_v16 = vld [vmem:[#allocation11 + $0x1398] sm:$0xff]  ;;  %v4722_v17 = vpack.c.bf16 %v1536_v8, %v1520_v7  ;;  %v4850_v18 = vpack.c.bf16 %v1538_v12, %v1522_v11  ;;  %v1681_v7 = vld [vmem:[#allocation11 + $0x1708] sm:$0xff]  ;;  %v1792_v57 = vld [vmem:[#allocation11 + $0x1a80] sm:$0xff]  ;;  %v4752_v59 = vpack.c.bf16 %v1793_v43, %v1777_v50 }
 0x223   :  { %v4852_v23 = vpack.c.bf16 %v1571_v16, %v1555_v15  ;;  %v1697_v8 = vld [vmem:[#allocation11 + $0x1788] sm:$0xff]  ;;  %v1904_v43 = vld [vmem:[#allocation11 + $0x1e00] sm:$0xff] }
 0x224   :  { %v4740_v15 = vpack.c.bf16 %v1697_v8, %v1681_v7  ;;  %v1808_v7 = vld [vmem:[#allocation11 + $0x1b00] sm:$0xff] }
 0x225   :  { %4711 = vmatpush1.bf16.msra.mxu0 %v4710_v22  ;;  %4839 = vmatpush1.bf16.msra.mxu1 %v4838_v24  ;;  %v4724_v22 = vpack.c.bf16 %v1569_v14, %v1553_v13  ;;  %v1554_v24 = vld [vmem:[#allocation11 + $0x1310] sm:$0xff]  ;;  %v1680_v13 = vld [vmem:[#allocation11 + $0x1700] sm:$0xff] }
 0x226   :  { %4713 = vmatprep.subr.bf16.mxu0 %v4712_v28  ;;  %4841 = vmatprep.subr.bf16.mxu1 %v4840_v30  ;;  %v1587_v28 = vld [vmem:[#allocation11 + $0x1418] sm:$0xff]  ;;  %v4726_v30 = vpack.c.bf16 %v1568_v20, %v1552_v19  ;;  %v1696_v14 = vld [vmem:[#allocation11 + $0x1780] sm:$0xff]  ;;  %v1713_v19 = vld [vmem:[#allocation11 + $0x1808] sm:$0xff] }
 0x227   :  { %v1729_v20 = vld [vmem:[#allocation11 + $0x1888] sm:$0xff]  ;;  %v1824_v8 = vld [vmem:[#allocation11 + $0x1b80] sm:$0xff] }
 0x2bb   :  { %v793_v34 = vpop.f32.mrb[2].mxu0  ;;  %v6475_v35 = vpop.f32.mrb[2].mxu1 }
 0x2bc   :  { %v795_v37 = vpop.f32.mrb[3].mxu0  ;;  %v937_v38 = vpop.f32.mrb[3].mxu1  ;;  %v5928_v39 = vadd.f32 %v793_v34, %v639_v32  ;;  %v4854_v32 = vpack.c.bf16 %v1570_v25, %v1554_v24  ;;  %v1600_v34 = vld [vmem:[#allocation11 + $0x1480] sm:$0xff]  ;;  %v4742_v24 = vpack.c.bf16 %v1696_v14, %v1680_v13  ;;  %v1841_v13 = vld [vmem:[#allocation11 + $0x1c08] sm:$0xff] }
 0x2bd   :  { %v5929_v40 = vadd.f32 %v795_v37, %v643_v33  ;;  %v5931_v45 = vadd.f32 %v937_v38, %v651_v36  ;;  %v1584_v33 = vld [vmem:[#allocation11 + $0x1400] sm:$0xff]  ;;  %v4728_v36 = vpack.c.bf16 %v1601_v27, %v1585_v26  ;;  %v4856_v37 = vpack.c.bf16 %v1603_v29, %v1587_v28  ;;  %v1586_v38 = vld [vmem:[#allocation11 + $0x1410] sm:$0xff]  ;;  %v1857_v14 = vld [vmem:[#allocation11 + $0x1c88] sm:$0xff] }
 0x2be   :  { %v4730_v48 = vpack.c.bf16 %v1600_v34, %v1584_v33  ;;  %v1712_v26 = vld [vmem:[#allocation11 + $0x1800] sm:$0xff]  ;;  %v4744_v28 = vpack.c.bf16 %v1729_v20, %v1713_v19  ;;  %v1745_v33 = vld [vmem:[#allocation11 + $0x1908] sm:$0xff] }
 0x2bf   :  { %5992 = vtanh.f32 %v5929_v40  ;;  %v1617_v40 = vld [vmem:[#allocation11 + $0x1508] sm:$0xff]  ;;  %v1728_v27 = vld [vmem:[#allocation11 + $0x1880] sm:$0xff] }
 0x2c0   :  { %5994 = vtanh.f32 %v5928_v39  ;;  %v1602_v39 = vld [vmem:[#allocation11 + $0x1490] sm:$0xff]  ;;  %v1761_v34 = vld [vmem:[#allocation11 + $0x1988] sm:$0xff]  ;;  %v1840_v19 = vld [vmem:[#allocation11 + $0x1c00] sm:$0xff] }
 0x2c1   :  { %5996 = vtanh.f32 %v5931_v45  ;;  %v1633_v45 = vld [vmem:[#allocation11 + $0x1588] sm:$0xff]  ;;  %v4858_v49 = vpack.c.bf16 %v1602_v39, %v1586_v38  ;;  %v4746_v38 = vpack.c.bf16 %v1728_v27, %v1712_v26  ;;  %v4748_v46 = vpack.c.bf16 %v1761_v34, %v1745_v33  ;;  %v1856_v20 = vld [vmem:[#allocation11 + $0x1c80] sm:$0xff] }
 0x2c2   :  { %v4732_v52 = vpack.c.bf16 %v1633_v45, %v1617_v40  ;;  %v1744_v40 = vld [vmem:[#allocation11 + $0x1900] sm:$0xff]  ;;  %v1873_v26 = vld [vmem:[#allocation11 + $0x1d08] sm:$0xff] }
 0x2c3   :  { %v1760_v45 = vld [vmem:[#allocation11 + $0x1980] sm:$0xff]  ;;  %v1889_v27 = vld [vmem:[#allocation11 + $0x1d88] sm:$0xff] }
 0x2c4   :  { %v1872_v34 = vld [vmem:[#allocation11 + $0x1d00] sm:$0xff] }
 0x2c9   :  { %v6479_v58 = vpop.eup %5992 }
 0x2ca   :  { %v6481_v61 = vpop.eup %5994  ;;  %2116 = vmatprep.mubr.f32.mxu0 %v6479_v58  ;;  %2258 = vmatprep.mubr.f32.mxu1 %v6479_v58 }
 0x2cb   :  { %2117 = vmatmul.mubr.f32.vlgmr.msra.gmra.mrb[4].mxu0 %v6481_v61  ;;  %2259 = vmatmul.mubr.f32.vlgmr.msra.gmra.mrb[4].mxu1 %v6481_v61  ;;  %v6487_v4 = vpop.eup %5996 }
 0x2cc   :  { %4715 = vmatpush1.bf16.msra.mxu0 %v4714_v54  ;;  %4843 = vmatpush1.bf16.msra.mxu1 %v4842_v55  ;;  %v1618_v54 = vld [vmem:[#allocation11 + $0x1510] sm:$0xff] }
 0x2cd   :  { %2187 = vmatprep.mubr.f32.mxu0 %v6487_v4  ;;  %2329 = vmatprep.mubr.f32.mxu1 %v6487_v4  ;;  %v1634_v55 = vld [vmem:[#allocation11 + $0x1590] sm:$0xff] }
 0x2ce   :  { %4717 = vmatprep.subr.bf16.mxu0 %v4716_v63  ;;  %4845 = vmatprep.subr.bf16.mxu1 %v4844_v0  ;;  %v4862_v63 = vpack.c.bf16 %v1634_v55, %v1618_v54  ;;  %v1648_v0 = vld [vmem:[#allocation11 + $0x1600] sm:$0xff]  ;;  %v4750_v54 = vpack.c.bf16 %v1760_v45, %v1744_v40  ;;  %v1890_v40 = vld [vmem:[#allocation11 + $0x1d90] sm:$0xff]  ;;  %v1905_v45 = vld [vmem:[#allocation11 + $0x1e08] sm:$0xff] }
 0x2cf   :  { %v4738_v11 = vpack.c.bf16 %v1664_v1, %v1648_v0  ;;  %v1809_v0 = vld [vmem:[#allocation11 + $0x1b08] sm:$0xff] }
 0x2d0   :  { %4719 = vmatpush1.bf16.msra.mxu0 %v4718_v5  ;;  %4847 = vmatpush1.bf16.msra.mxu1 %v4846_v6  ;;  %v1650_v5 = vld [vmem:[#allocation11 + $0x1610] sm:$0xff]  ;;  %v1825_v1 = vld [vmem:[#allocation11 + $0x1b88] sm:$0xff] }
 0x2d1   :  { %4721 = vmatprep.subr.bf16.mxu0 %v4720_v9  ;;  %4849 = vmatprep.subr.bf16.mxu1 %v4848_v10  ;;  %v1666_v6 = vld [vmem:[#allocation11 + $0x1690] sm:$0xff]  ;;  %v1683_v9 = vld [vmem:[#allocation11 + $0x1718] sm:$0xff] }
 0x2d2   :  { %v1699_v10 = vld [vmem:[#allocation11 + $0x1798] sm:$0xff]  ;;  %v4866_v12 = vpack.c.bf16 %v1666_v6, %v1650_v5  ;;  %v4754_v5 = vpack.c.bf16 %v1792_v57, %v1776_v56  ;;  %v1922_v56 = vld [vmem:[#allocation11 + $0x1e90] sm:$0xff]  ;;  %v1937_v57 = vld [vmem:[#allocation11 + $0x1f08] sm:$0xff] }
 0x2d3   :  { %v4868_v16 = vpack.c.bf16 %v1699_v10, %v1683_v9  ;;  %v4756_v9 = vpack.c.bf16 %v1825_v1, %v1809_v0  ;;  %v1936_v0 = vld [vmem:[#allocation11 + $0x1f00] sm:$0xff] }
 0x2d4   :  { %4723 = vmatpush1.bf16.msra.mxu0 %v4722_v17  ;;  %4851 = vmatpush1.bf16.msra.mxu1 %v4850_v18  ;;  %v1682_v17 = vld [vmem:[#allocation11 + $0x1710] sm:$0xff]  ;;  %v1952_v1 = vld [vmem:[#allocation11 + $0x1f80] sm:$0xff] }
 0x2d5   :  { %4725 = vmatprep.subr.bf16.mxu0 %v4724_v22  ;;  %4853 = vmatprep.subr.bf16.mxu1 %v4852_v23  ;;  %v1698_v18 = vld [vmem:[#allocation11 + $0x1790] sm:$0xff]  ;;  %v1715_v22 = vld [vmem:[#allocation11 + $0x1818] sm:$0xff] }
 0x2d6   :  { %v1731_v23 = vld [vmem:[#allocation11 + $0x1898] sm:$0xff]  ;;  %v4870_v25 = vpack.c.bf16 %v1698_v18, %v1682_v17  ;;  %v4758_v17 = vpack.c.bf16 %v1824_v8, %v1808_v7  ;;  %v949_v7 = vld [vmem:[#allocation11 + $0x28] sm:$0xff] }
 0x2d7   :  { %v4872_v29 = vpack.c.bf16 %v1731_v23, %v1715_v22  ;;  %v4760_v22 = vpack.c.bf16 %v1857_v14, %v1841_v13  ;;  %v965_v8 = vld [vmem:[#allocation11 + $0xa8] sm:$0xff] }
 0x2d8   :  { %4727 = vmatpush1.bf16.msra.mxu0 %v4726_v30  ;;  %4855 = vmatpush1.bf16.msra.mxu1 %v4854_v32  ;;  %v1714_v30 = vld [vmem:[#allocation11 + $0x1810] sm:$0xff]  ;;  %v4904_v13 = vpack.c.bf16 %v965_v8, %v949_v7  ;;  %v1076_v7 = vld [vmem:[#allocation11 + $0x420] sm:$0xff] }
 0x2d9   :  { %4729 = vmatprep.subr.bf16.mxu0 %v4728_v36  ;;  %4857 = vmatprep.subr.bf16.mxu1 %v4856_v37  ;;  %v1730_v32 = vld [vmem:[#allocation11 + $0x1890] sm:$0xff]  ;;  %v1747_v36 = vld [vmem:[#allocation11 + $0x1918] sm:$0xff]  ;;  %v1092_v8 = vld [vmem:[#allocation11 + $0x4a0] sm:$0xff] }
 0x2da   :  { %v1763_v37 = vld [vmem:[#allocation11 + $0x1998] sm:$0xff]  ;;  %v4874_v39 = vpack.c.bf16 %v1730_v32, %v1714_v30  ;;  %v647_v30 = vrot.slane %v6469_v31, %v6464_v21  ;;  %v4762_v32 = vpack.c.bf16 %v1856_v20, %v1840_v19  ;;  %v981_v19 = vld [vmem:[#allocation11 + $0x128] sm:$0xff] }
 0x2db   :  { %v4876_v47 = vpack.c.bf16 %v1763_v37, %v1747_v36  ;;  %v1888_v36 = vld [vmem:[#allocation11 + $0x1d80] sm:$0xff]  ;;  %v4764_v37 = vpack.c.bf16 %v1889_v27, %v1873_v26  ;;  %v997_v20 = vld [vmem:[#allocation11 + $0x1a8] sm:$0xff] }
 0x2dc   :  { %4731 = vmatpush1.bf16.msra.mxu0 %v4730_v48  ;;  %4859 = vmatpush1.bf16.msra.mxu1 %v4858_v49  ;;  %v1746_v48 = vld [vmem:[#allocation11 + $0x1910] sm:$0xff]  ;;  %v4766_v31 = vpack.c.bf16 %v1888_v36, %v1872_v34  ;;  %v980_v26 = vld [vmem:[#allocation11 + $0x120] sm:$0xff]  ;;  %v1013_v34 = vld [vmem:[#allocation11 + $0x228] sm:$0xff] }
 0x2dd   :  { %4733 = vmatprep.subr.bf16.mxu0 %v4732_v52  ;;  %4861 = vmatprep.subr.bf16.mxu1 %v4860_v53  ;;  %v1762_v49 = vld [vmem:[#allocation11 + $0x1990] sm:$0xff]  ;;  %v1779_v52 = vld [vmem:[#allocation11 + $0x1a18] sm:$0xff]  ;;  %v996_v27 = vld [vmem:[#allocation11 + $0x1a0] sm:$0xff] }
 0x2de   :  { %v1795_v53 = vld [vmem:[#allocation11 + $0x1a98] sm:$0xff]  ;;  %v4878_v55 = vpack.c.bf16 %v1762_v49, %v1746_v48  ;;  %v5930_v49 = vadd.f32 %v6475_v35, %v647_v30  ;;  %v4908_v30 = vpack.c.bf16 %v997_v20, %v981_v19  ;;  %v1029_v36 = vld [vmem:[#allocation11 + $0x2a8] sm:$0xff]  ;;  %v1108_v19 = vld [vmem:[#allocation11 + $0x520] sm:$0xff] }
 0x2df   :  { %v4880_v60 = vpack.c.bf16 %v1795_v53, %v1779_v52  ;;  %v1923_v48 = vld [vmem:[#allocation11 + $0x1e98] sm:$0xff]  ;;  %v1920_v52 = vld [vmem:[#allocation11 + $0x1e80] sm:$0xff] }
 0x2e0   :  { %4735 = vmatpush1.bf16.msra.mxu0 %v4734_v62  ;;  %4863 = vmatpush1.bf16.msra.mxu1 %v4862_v63  ;;  %v1778_v62 = vld [vmem:[#allocation11 + $0x1a10] sm:$0xff]  ;;  %5998 = vtanh.f32 %v5930_v49  ;;  %v4770_v35 = vpack.c.bf16 %v1920_v52, %v1904_v43  ;;  %v1061_v43 = vld [vmem:[#allocation11 + $0x3a8] sm:$0xff]  ;;  %v1047_v52 = vld [vmem:[#allocation11 + $0x338] sm:$0xff] }
 0x2e1   :  { %4737 = vmatprep.subr.bf16.mxu0 %v4736_v2  ;;  %4865 = vmatprep.subr.bf16.mxu1 %v4864_v3  ;;  %v1794_v63 = vld [vmem:[#allocation11 + $0x1a90] sm:$0xff]  ;;  %v1811_v2 = vld [vmem:[#allocation11 + $0x1b18] sm:$0xff]  ;;  %v1124_v20 = vld [vmem:[#allocation11 + $0x5a0] sm:$0xff] }
 0x2e2   :  { %v1827_v3 = vld [vmem:[#allocation11 + $0x1b98] sm:$0xff]  ;;  %v4882_v6 = vpack.c.bf16 %v1794_v63, %v1778_v62 }
 0x2e3   :  { %v4884_v10 = vpack.c.bf16 %v1827_v3, %v1811_v2  ;;  %v1955_v62 = vld [vmem:[#allocation11 + $0x1f98] sm:$0xff] }
 0x2e4   :  { %4739 = vmatpush1.bf16.msra.mxu0 %v4738_v11  ;;  %4867 = vmatpush1.bf16.msra.mxu1 %v4866_v12  ;;  %v1810_v11 = vld [vmem:[#allocation11 + $0x1b10] sm:$0xff] }
 0x2e5   :  { %4741 = vmatprep.subr.bf16.mxu0 %v4740_v15  ;;  %4869 = vmatprep.subr.bf16.mxu1 %v4868_v16  ;;  %v1826_v12 = vld [vmem:[#allocation11 + $0x1b90] sm:$0xff]  ;;  %v1843_v15 = vld [vmem:[#allocation11 + $0x1c18] sm:$0xff] }
 0x2e6   :  { %v1859_v16 = vld [vmem:[#allocation11 + $0x1c98] sm:$0xff]  ;;  %v4886_v18 = vpack.c.bf16 %v1826_v12, %v1810_v11  ;;  %v4774_v11 = vpack.c.bf16 %v1952_v1, %v1936_v0  ;;  %v1093_v0 = vld [vmem:[#allocation11 + $0x4a8] sm:$0xff] }
 0x2e7   :  { %v4888_v23 = vpack.c.bf16 %v1859_v16, %v1843_v15  ;;  %v948_v15 = vld [vmem:[#allocation11 + $0x20] sm:$0xff]  ;;  %v1079_v1 = vld [vmem:[#allocation11 + $0x438] sm:$0xff] }
 0x2e8   :  { %4743 = vmatpush1.bf16.msra.mxu0 %v4742_v24  ;;  %4871 = vmatpush1.bf16.msra.mxu1 %v4870_v25  ;;  %v1842_v24 = vld [vmem:[#allocation11 + $0x1c10] sm:$0xff]  ;;  %v964_v16 = vld [vmem:[#allocation11 + $0xa0] sm:$0xff] }
 0x2e9   :  { %4745 = vmatprep.subr.bf16.mxu0 %v4744_v28  ;;  %4873 = vmatprep.subr.bf16.mxu1 %v4872_v29  ;;  %v1858_v25 = vld [vmem:[#allocation11 + $0x1c90] sm:$0xff]  ;;  %v1875_v28 = vld [vmem:[#allocation11 + $0x1d18] sm:$0xff] }
 0x2ea   :  { %v1891_v29 = vld [vmem:[#allocation11 + $0x1d98] sm:$0xff]  ;;  %v4890_v33 = vpack.c.bf16 %v1858_v25, %v1842_v24  ;;  %v4906_v24 = vpack.c.bf16 %v964_v16, %v948_v15  ;;  %v4922_v16 = vpack.c.bf16 %v1092_v8, %v1076_v7 }
 0x2eb   :  { %v1127_v15 = vld [vmem:[#allocation11 + $0x5b8] sm:$0xff] }
 0x2ec   :  { %4747 = vmatpush1.bf16.msra.mxu0 %v4746_v38  ;;  %4875 = vmatpush1.bf16.msra.mxu1 %v4874_v39  ;;  %v4892_v38 = vpack.c.bf16 %v1891_v29, %v1875_v28  ;;  %v1874_v39 = vld [vmem:[#allocation11 + $0x1d10] sm:$0xff]  ;;  %v6494_v29 = vpop.eup %5998  ;;  %v1239_v7 = vld [vmem:[#allocation11 + $0x938] sm:$0xff] }
 0x2ed   :  { %4749 = vmatprep.subr.bf16.mxu0 %v4748_v46  ;;  %4877 = vmatprep.subr.bf16.mxu1 %v4876_v47  ;;  %v1921_v46 = vld [vmem:[#allocation11 + $0x1e88] sm:$0xff]  ;;  %v1907_v47 = vld [vmem:[#allocation11 + $0x1e18] sm:$0xff]  ;;  %v4894_v50 = vpack.c.bf16 %v1890_v40, %v1874_v39  ;;  %v982_v28 = vld [vmem:[#allocation11 + $0x130] sm:$0xff]  ;;  %v4910_v39 = vpack.c.bf16 %v996_v27, %v980_v26 }
 0x2ee   :  { %v4768_v53 = vpack.c.bf16 %v1921_v46, %v1905_v45  ;;  %v4912_v45 = vpack.c.bf16 %v1029_v36, %v1013_v34  ;;  %v1012_v46 = vld [vmem:[#allocation11 + $0x220] sm:$0xff]  ;;  %v1157_v26 = vld [vmem:[#allocation11 + $0x6a8] sm:$0xff]  ;;  %v1143_v27 = vld [vmem:[#allocation11 + $0x638] sm:$0xff] }
 0x2ef   :  { %v1140_v34 = vld [vmem:[#allocation11 + $0x620] sm:$0xff]  ;;  %v1255_v8 = vld [vmem:[#allocation11 + $0x9b8] sm:$0xff] }
 0x2f0   :  { %4751 = vmatpush1.bf16.msra.mxu0 %v4750_v54  ;;  %4879 = vmatpush1.bf16.msra.mxu1 %v4878_v55  ;;  %v4896_v54 = vpack.c.bf16 %v1923_v48, %v1907_v47  ;;  %v1906_v55 = vld [vmem:[#allocation11 + $0x1e10] sm:$0xff]  ;;  %v1028_v47 = vld [vmem:[#allocation11 + $0x2a0] sm:$0xff] }
 0x2f1   :  { %4753 = vmatprep.subr.bf16.mxu0 %v4752_v59  ;;  %4881 = vmatprep.subr.bf16.mxu1 %v4880_v60  ;;  %v1953_v59 = vld [vmem:[#allocation11 + $0x1f88] sm:$0xff]  ;;  %v1939_v60 = vld [vmem:[#allocation11 + $0x1f18] sm:$0xff]  ;;  %v4898_v63 = vpack.c.bf16 %v1922_v56, %v1906_v55  ;;  %v1014_v48 = vld [vmem:[#allocation11 + $0x230] sm:$0xff] }
 0x2f2   :  { %v4772_v2 = vpack.c.bf16 %v1953_v59, %v1937_v57  ;;  %v4900_v3 = vpack.c.bf16 %v1955_v62, %v1939_v60  ;;  %v1044_v57 = vld [vmem:[#allocation11 + $0x320] sm:$0xff]  ;;  %v1046_v60 = vld [vmem:[#allocation11 + $0x330] sm:$0xff] }
 0x2f3   :  { %v1060_v59 = vld [vmem:[#allocation11 + $0x3a0] sm:$0xff] }
 0x2f4   :  { %4755 = vmatpush1.bf16.msra.mxu0 %v4754_v5  ;;  %4883 = vmatpush1.bf16.msra.mxu1 %v4882_v6  ;;  %v1938_v5 = vld [vmem:[#allocation11 + $0x1f10] sm:$0xff]  ;;  %v1156_v36 = vld [vmem:[#allocation11 + $0x6a0] sm:$0xff] }
 0x2f5   :  { %4757 = vmatprep.subr.bf16.mxu0 %v4756_v9  ;;  %4885 = vmatprep.subr.bf16.mxu1 %v4884_v10  ;;  %v1954_v6 = vld [vmem:[#allocation11 + $0x1f90] sm:$0xff]  ;;  %v951_v9 = vld [vmem:[#allocation11 + $0x38] sm:$0xff] }
 0x2f6   :  { %v967_v10 = vld [vmem:[#allocation11 + $0xb8] sm:$0xff]  ;;  %v4902_v12 = vpack.c.bf16 %v1954_v6, %v1938_v5 }
 0x2f7   :  { %v5032_v14 = vpack.c.bf16 %v967_v10, %v951_v9  ;;  %v1078_v9 = vld [vmem:[#allocation11 + $0x430] sm:$0xff] }
 0x2f8   :  { %4759 = vmatpush1.bf16.msra.mxu0 %v4758_v17  ;;  %4887 = vmatpush1.bf16.msra.mxu1 %v4886_v18  ;;  %v950_v17 = vld [vmem:[#allocation11 + $0x30] sm:$0xff] }
 0x2f9   :  { %4761 = vmatprep.subr.bf16.mxu0 %v4760_v22  ;;  %4889 = vmatprep.subr.bf16.mxu1 %v4888_v23  ;;  %v966_v18 = vld [vmem:[#allocation11 + $0xb0] sm:$0xff]  ;;  %v983_v22 = vld [vmem:[#allocation11 + $0x138] sm:$0xff] }
 0x2fa   :  { %v999_v23 = vld [vmem:[#allocation11 + $0x1b8] sm:$0xff]  ;;  %v5034_v25 = vpack.c.bf16 %v966_v18, %v950_v17 }
 0x2fc   :  { %4763 = vmatpush1.bf16.msra.mxu0 %v4762_v32  ;;  %4891 = vmatpush1.bf16.msra.mxu1 %v4890_v33  ;;  %v5036_v32 = vpack.c.bf16 %v999_v23, %v983_v22  ;;  %v998_v33 = vld [vmem:[#allocation11 + $0x1b0] sm:$0xff] }
 0x2fd   :  { %4765 = vmatprep.subr.bf16.mxu0 %v4764_v37  ;;  %4893 = vmatprep.subr.bf16.mxu1 %v4892_v38  ;;  %v1015_v37 = vld [vmem:[#allocation11 + $0x238] sm:$0xff]  ;;  %v5038_v40 = vpack.c.bf16 %v998_v33, %v982_v28  ;;  %v1110_v22 = vld [vmem:[#allocation11 + $0x530] sm:$0xff] }
 0x2fe   :  { %v1031_v38 = vld [vmem:[#allocation11 + $0x2b8] sm:$0xff] }
 0x2ff   :  { %v5040_v49 = vpack.c.bf16 %v1031_v38, %v1015_v37  ;;  %v1159_v28 = vld [vmem:[#allocation11 + $0x6b8] sm:$0xff]  ;;  %v1142_v37 = vld [vmem:[#allocation11 + $0x630] sm:$0xff] }
 0x300   :  { %4767 = vmatpush1.bf16.msra.mxu0 %v4766_v31  ;;  %4895 = vmatpush1.bf16.msra.mxu1 %v4894_v50  ;;  %v1030_v31 = vld [vmem:[#allocation11 + $0x2b0] sm:$0xff]  ;;  %v1045_v50 = vld [vmem:[#allocation11 + $0x328] sm:$0xff]  ;;  %v5056_v38 = vpack.c.bf16 %v1159_v28, %v1143_v27 }
 0x301   :  { %4769 = vmatprep.subr.bf16.mxu0 %v4768_v53  ;;  %4897 = vmatprep.subr.bf16.mxu1 %v4896_v54  ;;  %v1063_v53 = vld [vmem:[#allocation11 + $0x3b8] sm:$0xff]  ;;  %v4914_v54 = vpack.c.bf16 %v1028_v47, %v1012_v46  ;;  %v5042_v55 = vpack.c.bf16 %v1030_v31, %v1014_v48  ;;  %v4916_v56 = vpack.c.bf16 %v1061_v43, %v1045_v50  ;;  %v1172_v50 = vld [vmem:[#allocation11 + $0x720] sm:$0xff]  ;;  %v1270_v27 = vld [vmem:[#allocation11 + $0xa30] sm:$0xff] }
 0x302   :  { %v5044_v62 = vpack.c.bf16 %v1063_v53, %v1047_v52  ;;  %v1175_v46 = vld [vmem:[#allocation11 + $0x738] sm:$0xff]  ;;  %v4930_v48 = vpack.c.bf16 %v1156_v36, %v1140_v34  ;;  %v1188_v43 = vld [vmem:[#allocation11 + $0x7a0] sm:$0xff]  ;;  %v1174_v52 = vld [vmem:[#allocation11 + $0x730] sm:$0xff] }
 0x303   :  { %v1191_v47 = vld [vmem:[#allocation11 + $0x7b8] sm:$0xff] }
 0x304   :  { %4771 = vmatpush1.bf16.msra.mxu0 %v4770_v35  ;;  %4899 = vmatpush1.bf16.msra.mxu1 %v4898_v63  ;;  %v1062_v35 = vld [vmem:[#allocation11 + $0x3b0] sm:$0xff]  ;;  %v1077_v63 = vld [vmem:[#allocation11 + $0x428] sm:$0xff]  ;;  %v5060_v53 = vpack.c.bf16 %v1191_v47, %v1175_v46  ;;  %v1303_v34 = vld [vmem:[#allocation11 + $0xb38] sm:$0xff] }
 0x305   :  { %4773 = vmatprep.subr.bf16.mxu0 %v4772_v2  ;;  %4901 = vmatprep.subr.bf16.mxu1 %v4900_v3  ;;  %v1095_v2 = vld [vmem:[#allocation11 + $0x4b8] sm:$0xff]  ;;  %v4918_v3 = vpack.c.bf16 %v1060_v59, %v1044_v57  ;;  %v5046_v5 = vpack.c.bf16 %v1062_v35, %v1046_v60  ;;  %v4920_v6 = vpack.c.bf16 %v1093_v0, %v1077_v63  ;;  %v1204_v63 = vld [vmem:[#allocation11 + $0x820] sm:$0xff]  ;;  %v1302_v46 = vld [vmem:[#allocation11 + $0xb30] sm:$0xff] }
 0x306   :  { %v5048_v10 = vpack.c.bf16 %v1095_v2, %v1079_v1  ;;  %v1207_v57 = vld [vmem:[#allocation11 + $0x838] sm:$0xff]  ;;  %v4934_v60 = vpack.c.bf16 %v1188_v43, %v1172_v50  ;;  %v1220_v0 = vld [vmem:[#allocation11 + $0x8a0] sm:$0xff]  ;;  %v1206_v1 = vld [vmem:[#allocation11 + $0x830] sm:$0xff] }
 0x307   :  { %v1223_v59 = vld [vmem:[#allocation11 + $0x8b8] sm:$0xff] }
 0x308   :  { %4775 = vmatpush1.bf16.msra.mxu0 %v4774_v11  ;;  %4903 = vmatpush1.bf16.msra.mxu1 %v4902_v12  ;;  %v1094_v11 = vld [vmem:[#allocation11 + $0x4b0] sm:$0xff]  ;;  %v1109_v12 = vld [vmem:[#allocation11 + $0x528] sm:$0xff]  ;;  %v5064_v2 = vpack.c.bf16 %v1223_v59, %v1207_v57  ;;  %v1319_v36 = vld [vmem:[#allocation11 + $0xbb8] sm:$0xff] }
 0x309   :  { %4905 = vmatprep.subr.bf16.mxu0 %v4904_v13  ;;  %5033 = vmatprep.subr.bf16.mxu1 %v5032_v14  ;;  %v1125_v13 = vld [vmem:[#allocation11 + $0x5a8] sm:$0xff]  ;;  %v1111_v14 = vld [vmem:[#allocation11 + $0x538] sm:$0xff]  ;;  %v5050_v17 = vpack.c.bf16 %v1094_v11, %v1078_v9  ;;  %v4938_v9 = vpack.c.bf16 %v1220_v0, %v1204_v63  ;;  %v5076_v47 = vpack.c.bf16 %v1319_v36, %v1303_v34  ;;  %v1334_v57 = vld [vmem:[#allocation11 + $0xc30] sm:$0xff] }
 0x30a   :  { %v4924_v18 = vpack.c.bf16 %v1125_v13, %v1109_v12  ;;  %v5052_v23 = vpack.c.bf16 %v1127_v15, %v1111_v14  ;;  %v1236_v12 = vld [vmem:[#allocation11 + $0x920] sm:$0xff]  ;;  %v1238_v14 = vld [vmem:[#allocation11 + $0x930] sm:$0xff]  ;;  %v5068_v15 = vpack.c.bf16 %v1255_v8, %v1239_v7  ;;  %v1335_v50 = vld [vmem:[#allocation11 + $0xc38] sm:$0xff] }
 0x30b   :  { %2188 = vmatmul.mubr.f32.vlgmr.msra.gmra.mrb[4].mxu0 %v6494_v29  ;;  %2330 = vmatmul.mubr.f32.vlgmr.msra.gmra.mrb[4].mxu1 %v6494_v29  ;;  %v1252_v13 = vld [vmem:[#allocation11 + $0x9a0] sm:$0xff]  ;;  %v1351_v43 = vld [vmem:[#allocation11 + $0xcb8] sm:$0xff]  ;;  %v1366_v7 = vld [vmem:[#allocation11 + $0xd30] sm:$0xff] }
 0x30c   :  { %4907 = vmatpush1.bf16.msra.mxu0 %v4906_v24  ;;  %2400 = vmatprep.mubr.f32.mxu0 %v6479_v58  ;;  %v1126_v24 = vld [vmem:[#allocation11 + $0x5b0] sm:$0xff]  ;;  %v5080_v59 = vpack.c.bf16 %v1351_v43, %v1335_v50  ;;  %v1367_v63 = vld [vmem:[#allocation11 + $0xd38] sm:$0xff] }
 0x30d   :  { %5035 = vmatpush1.bf16.msra.mxu1 %v5034_v25  ;;  %2542 = vmatprep.mubr.f32.mxu1 %v6479_v58  ;;  %v1141_v25 = vld [vmem:[#allocation11 + $0x628] sm:$0xff]  ;;  %v1383_v0 = vld [vmem:[#allocation11 + $0xdb8] sm:$0xff]  ;;  %v1430_v34 = vld [vmem:[#allocation11 + $0xf30] sm:$0xff] }
 0x30e   :  { %4909 = vmatprep.subr.bf16.mxu0 %v4908_v30  ;;  %5037 = vmatprep.subr.bf16.mxu1 %v5036_v32  ;;  %v4926_v30 = vpack.c.bf16 %v1124_v20, %v1108_v19  ;;  %v5054_v32 = vpack.c.bf16 %v1126_v24, %v1110_v22  ;;  %v4928_v33 = vpack.c.bf16 %v1157_v26, %v1141_v25  ;;  %v1271_v19 = vld [vmem:[#allocation11 + $0xa38] sm:$0xff]  ;;  %v1268_v25 = vld [vmem:[#allocation11 + $0xa20] sm:$0xff]  ;;  %v1462_v43 = vld [vmem:[#allocation11 + $0x1030] sm:$0xff] }
 0x30f   :  { %v1287_v20 = vld [vmem:[#allocation11 + $0xab8] sm:$0xff]  ;;  %v4942_v22 = vpack.c.bf16 %v1252_v13, %v1236_v12  ;;  %v1284_v26 = vld [vmem:[#allocation11 + $0xaa0] sm:$0xff]  ;;  %v5084_v8 = vpack.c.bf16 %v1383_v0, %v1367_v63  ;;  %v1510_v0 = vld [vmem:[#allocation11 + $0x11b0] sm:$0xff] }
 0x310   :  { %4911 = vmatpush1.bf16.msra.mxu0 %v4910_v39  ;;  %v1158_v39 = vld [vmem:[#allocation11 + $0x6b0] sm:$0xff]  ;;  %v5072_v28 = vpack.c.bf16 %v1287_v20, %v1271_v19  ;;  %v1399_v12 = vld [vmem:[#allocation11 + $0xe38] sm:$0xff] }
 0x311   :  { %5039 = vmatpush1.bf16.msra.mxu1 %v5038_v40  ;;  %4913 = vmatprep.subr.bf16.mxu0 %v4912_v45  ;;  %v1173_v40 = vld [vmem:[#allocation11 + $0x728] sm:$0xff]  ;;  %v1415_v13 = vld [vmem:[#allocation11 + $0xeb8] sm:$0xff]  ;;  %v1398_v19 = vld [vmem:[#allocation11 + $0xe30] sm:$0xff] }
 0x312   :  { %5041 = vmatprep.subr.bf16.mxu1 %v5040_v49  ;;  %v1189_v45 = vld [vmem:[#allocation11 + $0x7a8] sm:$0xff]  ;;  %v5058_v49 = vpack.c.bf16 %v1158_v39, %v1142_v37  ;;  %v4946_v37 = vpack.c.bf16 %v1284_v26, %v1268_v25  ;;  %v5088_v20 = vpack.c.bf16 %v1415_v13, %v1399_v12  ;;  %v1431_v25 = vld [vmem:[#allocation11 + $0xf38] sm:$0xff]  ;;  %v1526_v12 = vld [vmem:[#allocation11 + $0x1230] sm:$0xff] }
 0x313   :  { %v4932_v31 = vpack.c.bf16 %v1189_v45, %v1173_v40  ;;  %v1300_v40 = vld [vmem:[#allocation11 + $0xb20] sm:$0xff]  ;;  %v1447_v26 = vld [vmem:[#allocation11 + $0xfb8] sm:$0xff] }
 0x314   :  { %4915 = vmatpush1.bf16.msra.mxu0 %v4914_v54  ;;  %v1190_v54 = vld [vmem:[#allocation11 + $0x7b0] sm:$0xff]  ;;  %v1316_v45 = vld [vmem:[#allocation11 + $0xba0] sm:$0xff]  ;;  %v5092_v36 = vpack.c.bf16 %v1447_v26, %v1431_v25 }
 0x315   :  { %5043 = vmatpush1.bf16.msra.mxu1 %v5042_v55  ;;  %4917 = vmatprep.subr.bf16.mxu0 %v4916_v56  ;;  %v1205_v55 = vld [vmem:[#allocation11 + $0x828] sm:$0xff]  ;;  %v1558_v25 = vld [vmem:[#allocation11 + $0x1330] sm:$0xff] }
 0x316   :  { %5045 = vmatprep.subr.bf16.mxu1 %v5044_v62  ;;  %v1221_v56 = vld [vmem:[#allocation11 + $0x8a8] sm:$0xff]  ;;  %v5062_v62 = vpack.c.bf16 %v1190_v54, %v1174_v52  ;;  %v4950_v52 = vpack.c.bf16 %v1316_v45, %v1300_v40  ;;  %v1463_v40 = vld [vmem:[#allocation11 + $0x1038] sm:$0xff] }
 0x317   :  { %v4936_v35 = vpack.c.bf16 %v1221_v56, %v1205_v55  ;;  %v1332_v55 = vld [vmem:[#allocation11 + $0xc20] sm:$0xff]  ;;  %v1479_v45 = vld [vmem:[#allocation11 + $0x10b8] sm:$0xff] }
 0x318   :  { %4919 = vmatpush1.bf16.msra.mxu0 %v4918_v3  ;;  %v1222_v3 = vld [vmem:[#allocation11 + $0x8b0] sm:$0xff]  ;;  %v1348_v56 = vld [vmem:[#allocation11 + $0xca0] sm:$0xff]  ;;  %v5096_v50 = vpack.c.bf16 %v1479_v45, %v1463_v40 }
 0x319   :  { %5047 = vmatpush1.bf16.msra.mxu1 %v5046_v5  ;;  %4921 = vmatprep.subr.bf16.mxu0 %v4920_v6  ;;  %v1237_v5 = vld [vmem:[#allocation11 + $0x928] sm:$0xff]  ;;  %v1590_v40 = vld [vmem:[#allocation11 + $0x1430] sm:$0xff] }
 0x31a   :  { %5049 = vmatprep.subr.bf16.mxu1 %v5048_v10  ;;  %v1253_v6 = vld [vmem:[#allocation11 + $0x9a8] sm:$0xff]  ;;  %v5066_v10 = vpack.c.bf16 %v1222_v3, %v1206_v1  ;;  %v4954_v1 = vpack.c.bf16 %v1348_v56, %v1332_v55  ;;  %v1495_v56 = vld [vmem:[#allocation11 + $0x1138] sm:$0xff] }
 0x31b   :  { %v4940_v11 = vpack.c.bf16 %v1253_v6, %v1237_v5  ;;  %v1364_v5 = vld [vmem:[#allocation11 + $0xd20] sm:$0xff] }
 0x31c   :  { %4923 = vmatpush1.bf16.msra.mxu0 %v4922_v16  ;;  %v1254_v16 = vld [vmem:[#allocation11 + $0x9b0] sm:$0xff]  ;;  %v1380_v6 = vld [vmem:[#allocation11 + $0xda0] sm:$0xff] }
 0x31d   :  { %5051 = vmatpush1.bf16.msra.mxu1 %v5050_v17  ;;  %4925 = vmatprep.subr.bf16.mxu0 %v4924_v18  ;;  %v1269_v17 = vld [vmem:[#allocation11 + $0xa28] sm:$0xff] }
 0x31e   :  { %5053 = vmatprep.subr.bf16.mxu1 %v5052_v23  ;;  %v1285_v18 = vld [vmem:[#allocation11 + $0xaa8] sm:$0xff]  ;;  %v5070_v23 = vpack.c.bf16 %v1254_v16, %v1238_v14  ;;  %v4958_v14 = vpack.c.bf16 %v1380_v6, %v1364_v5  ;;  %v1527_v5 = vld [vmem:[#allocation11 + $0x1238] sm:$0xff] }
 0x31f   :  { %v4944_v24 = vpack.c.bf16 %v1285_v18, %v1269_v17  ;;  %v1396_v17 = vld [vmem:[#allocation11 + $0xe20] sm:$0xff]  ;;  %v1543_v6 = vld [vmem:[#allocation11 + $0x12b8] sm:$0xff] }
 0x320   :  { %4927 = vmatpush1.bf16.msra.mxu0 %v4926_v30  ;;  %v1286_v30 = vld [vmem:[#allocation11 + $0xab0] sm:$0xff]  ;;  %v1412_v18 = vld [vmem:[#allocation11 + $0xea0] sm:$0xff]  ;;  %v5104_v13 = vpack.c.bf16 %v1543_v6, %v1527_v5 }
 0x321   :  { %5055 = vmatpush1.bf16.msra.mxu1 %v5054_v32  ;;  %4929 = vmatprep.subr.bf16.mxu0 %v4928_v33  ;;  %v1301_v32 = vld [vmem:[#allocation11 + $0xb28] sm:$0xff]  ;;  %v1654_v5 = vld [vmem:[#allocation11 + $0x1630] sm:$0xff] }
 0x322   :  { %5057 = vmatprep.subr.bf16.mxu1 %v5056_v38  ;;  %v1317_v33 = vld [vmem:[#allocation11 + $0xba8] sm:$0xff]  ;;  %v5074_v38 = vpack.c.bf16 %v1286_v30, %v1270_v27  ;;  %v4962_v27 = vpack.c.bf16 %v1412_v18, %v1396_v17  ;;  %v1559_v17 = vld [vmem:[#allocation11 + $0x1338] sm:$0xff] }
 0x323   :  { %v4948_v39 = vpack.c.bf16 %v1317_v33, %v1301_v32  ;;  %v1428_v32 = vld [vmem:[#allocation11 + $0xf20] sm:$0xff]  ;;  %v1575_v18 = vld [vmem:[#allocation11 + $0x13b8] sm:$0xff] }
 0x324   :  { %4931 = vmatpush1.bf16.msra.mxu0 %v4930_v48  ;;  %v1318_v48 = vld [vmem:[#allocation11 + $0xbb0] sm:$0xff]  ;;  %v1444_v33 = vld [vmem:[#allocation11 + $0xfa0] sm:$0xff]  ;;  %v5108_v26 = vpack.c.bf16 %v1575_v18, %v1559_v17 }
 0x325   :  { %5059 = vmatpush1.bf16.msra.mxu1 %v5058_v49  ;;  %4933 = vmatprep.subr.bf16.mxu0 %v4932_v31  ;;  %v1333_v49 = vld [vmem:[#allocation11 + $0xc28] sm:$0xff]  ;;  %v1686_v17 = vld [vmem:[#allocation11 + $0x1730] sm:$0xff] }
 0x326   :  { %5061 = vmatprep.subr.bf16.mxu1 %v5060_v53  ;;  %v1349_v31 = vld [vmem:[#allocation11 + $0xca8] sm:$0xff]  ;;  %v5078_v53 = vpack.c.bf16 %v1318_v48, %v1302_v46  ;;  %v4966_v46 = vpack.c.bf16 %v1444_v33, %v1428_v32  ;;  %v1591_v32 = vld [vmem:[#allocation11 + $0x1438] sm:$0xff] }
 0x327   :  { %v4952_v54 = vpack.c.bf16 %v1349_v31, %v1333_v49  ;;  %v1460_v49 = vld [vmem:[#allocation11 + $0x1020] sm:$0xff]  ;;  %v1607_v33 = vld [vmem:[#allocation11 + $0x14b8] sm:$0xff] }
 0x328   :  { %4935 = vmatpush1.bf16.msra.mxu0 %v4934_v60  ;;  %v1350_v60 = vld [vmem:[#allocation11 + $0xcb0] sm:$0xff]  ;;  %v1476_v31 = vld [vmem:[#allocation11 + $0x10a0] sm:$0xff]  ;;  %v5112_v45 = vpack.c.bf16 %v1607_v33, %v1591_v32 }
 0x329   :  { %5063 = vmatpush1.bf16.msra.mxu1 %v5062_v62  ;;  %4937 = vmatprep.subr.bf16.mxu0 %v4936_v35  ;;  %v1365_v62 = vld [vmem:[#allocation11 + $0xd28] sm:$0xff]  ;;  %v4970_v55 = vpack.c.bf16 %v1476_v31, %v1460_v49  ;;  %v1623_v49 = vld [vmem:[#allocation11 + $0x1538] sm:$0xff]  ;;  %v1718_v32 = vld [vmem:[#allocation11 + $0x1830] sm:$0xff] }
 0x32a   :  { %5065 = vmatprep.subr.bf16.mxu1 %v5064_v2  ;;  %v1381_v35 = vld [vmem:[#allocation11 + $0xda8] sm:$0xff]  ;;  %v5082_v2 = vpack.c.bf16 %v1350_v60, %v1334_v57  ;;  %v1511_v57 = vld [vmem:[#allocation11 + $0x11b8] sm:$0xff]  ;;  %v1492_v60 = vld [vmem:[#allocation11 + $0x1120] sm:$0xff] }
 0x32b   :  { %v4956_v3 = vpack.c.bf16 %v1381_v35, %v1365_v62  ;;  %v1508_v62 = vld [vmem:[#allocation11 + $0x11a0] sm:$0xff]  ;;  %v1494_v35 = vld [vmem:[#allocation11 + $0x1130] sm:$0xff]  ;;  %v1639_v31 = vld [vmem:[#allocation11 + $0x15b8] sm:$0xff] }
 0x32c   :  { %4939 = vmatpush1.bf16.msra.mxu0 %v4938_v9  ;;  %v1382_v9 = vld [vmem:[#allocation11 + $0xdb0] sm:$0xff] }
 0x32d   :  { %5067 = vmatpush1.bf16.msra.mxu1 %v5066_v10  ;;  %4941 = vmatprep.subr.bf16.mxu0 %v4940_v11  ;;  %v1397_v10 = vld [vmem:[#allocation11 + $0xe28] sm:$0xff] }
 0x32e   :  { %5069 = vmatprep.subr.bf16.mxu1 %v5068_v15  ;;  %v1413_v11 = vld [vmem:[#allocation11 + $0xea8] sm:$0xff]  ;;  %v5086_v15 = vpack.c.bf16 %v1382_v9, %v1366_v7  ;;  %v4974_v7 = vpack.c.bf16 %v1508_v62, %v1492_v60  ;;  %v1655_v62 = vld [vmem:[#allocation11 + $0x1638] sm:$0xff] }
 0x32f   :  { %v4960_v16 = vpack.c.bf16 %v1413_v11, %v1397_v10  ;;  %v1524_v10 = vld [vmem:[#allocation11 + $0x1220] sm:$0xff]  ;;  %v1669_v60 = vld [vmem:[#allocation11 + $0x16a8] sm:$0xff] }
 0x330   :  { %4943 = vmatpush1.bf16.msra.mxu0 %v4942_v22  ;;  %v1414_v22 = vld [vmem:[#allocation11 + $0xeb0] sm:$0xff]  ;;  %v1540_v11 = vld [vmem:[#allocation11 + $0x12a0] sm:$0xff] }
 0x331   :  { %5071 = vmatpush1.bf16.msra.mxu1 %v5070_v23  ;;  %4945 = vmatprep.subr.bf16.mxu0 %v4944_v24  ;;  %v1429_v23 = vld [vmem:[#allocation11 + $0xf28] sm:$0xff] }
 0x332   :  { %5073 = vmatprep.subr.bf16.mxu1 %v5072_v28  ;;  %v1445_v24 = vld [vmem:[#allocation11 + $0xfa8] sm:$0xff]  ;;  %v5090_v28 = vpack.c.bf16 %v1414_v22, %v1398_v19  ;;  %v4978_v19 = vpack.c.bf16 %v1540_v11, %v1524_v10  ;;  %v1687_v10 = vld [vmem:[#allocation11 + $0x1738] sm:$0xff] }
 0x333   :  { %v4964_v30 = vpack.c.bf16 %v1445_v24, %v1429_v23  ;;  %v1556_v23 = vld [vmem:[#allocation11 + $0x1320] sm:$0xff]  ;;  %v1703_v11 = vld [vmem:[#allocation11 + $0x17b8] sm:$0xff] }
 0x334   :  { %4947 = vmatpush1.bf16.msra.mxu0 %v4946_v37  ;;  %v1446_v37 = vld [vmem:[#allocation11 + $0xfb0] sm:$0xff]  ;;  %v1572_v24 = vld [vmem:[#allocation11 + $0x13a0] sm:$0xff]  ;;  %v5124_v18 = vpack.c.bf16 %v1703_v11, %v1687_v10 }
 0x335   :  { %5075 = vmatpush1.bf16.msra.mxu1 %v5074_v38  ;;  %4949 = vmatprep.subr.bf16.mxu0 %v4948_v39  ;;  %v1461_v38 = vld [vmem:[#allocation11 + $0x1028] sm:$0xff]  ;;  %v1814_v10 = vld [vmem:[#allocation11 + $0x1b30] sm:$0xff] }
 0x336   :  { %5077 = vmatprep.subr.bf16.mxu1 %v5076_v47  ;;  %v1477_v39 = vld [vmem:[#allocation11 + $0x10a8] sm:$0xff]  ;;  %v5094_v47 = vpack.c.bf16 %v1446_v37, %v1430_v34  ;;  %v4982_v34 = vpack.c.bf16 %v1572_v24, %v1556_v23  ;;  %v1719_v23 = vld [vmem:[#allocation11 + $0x1838] sm:$0xff] }
 0x337   :  { %v4968_v48 = vpack.c.bf16 %v1477_v39, %v1461_v38  ;;  %v1588_v38 = vld [vmem:[#allocation11 + $0x1420] sm:$0xff]  ;;  %v1735_v24 = vld [vmem:[#allocation11 + $0x18b8] sm:$0xff] }
 0x338   :  { %4951 = vmatpush1.bf16.msra.mxu0 %v4950_v52  ;;  %v1478_v52 = vld [vmem:[#allocation11 + $0x10b0] sm:$0xff]  ;;  %v1604_v39 = vld [vmem:[#allocation11 + $0x14a0] sm:$0xff]  ;;  %v5128_v33 = vpack.c.bf16 %v1735_v24, %v1719_v23 }
 0x339   :  { %5079 = vmatpush1.bf16.msra.mxu1 %v5078_v53  ;;  %4953 = vmatprep.subr.bf16.mxu0 %v4952_v54  ;;  %v1493_v53 = vld [vmem:[#allocation11 + $0x1128] sm:$0xff]  ;;  %v1846_v23 = vld [vmem:[#allocation11 + $0x1c30] sm:$0xff] }
 0x33a   :  { %5081 = vmatprep.subr.bf16.mxu1 %v5080_v59  ;;  %v1509_v54 = vld [vmem:[#allocation11 + $0x11a8] sm:$0xff]  ;;  %v5098_v59 = vpack.c.bf16 %v1478_v52, %v1462_v43 }
 0x33b   :  { %v4972_v63 = vpack.c.bf16 %v1509_v54, %v1493_v53  ;;  %v1620_v53 = vld [vmem:[#allocation11 + $0x1520] sm:$0xff] }
 0x33c   :  { %4955 = vmatpush1.bf16.msra.mxu0 %v4954_v1  ;;  %v1525_v1 = vld [vmem:[#allocation11 + $0x1228] sm:$0xff]  ;;  %v1636_v54 = vld [vmem:[#allocation11 + $0x15a0] sm:$0xff] }
 0x33d   :  { %5083 = vmatpush1.bf16.msra.mxu1 %v5082_v2  ;;  %4957 = vmatprep.subr.bf16.mxu0 %v4956_v3  ;;  %v1541_v2 = vld [vmem:[#allocation11 + $0x12a8] sm:$0xff]  ;;  %v5100_v3 = vpack.c.bf16 %v1511_v57, %v1495_v56  ;;  %v5116_v56 = vpack.c.bf16 %v1639_v31, %v1623_v49  ;;  %v1638_v57 = vld [vmem:[#allocation11 + $0x15b0] sm:$0xff] }
 0x33e   :  { %5085 = vmatprep.subr.bf16.mxu1 %v5084_v8  ;;  %v5102_v8 = vpack.c.bf16 %v1510_v0, %v1494_v35  ;;  %v4976_v9 = vpack.c.bf16 %v1541_v2, %v1525_v1  ;;  %v1671_v35 = vld [vmem:[#allocation11 + $0x16b8] sm:$0xff]  ;;  %v1652_v2 = vld [vmem:[#allocation11 + $0x1620] sm:$0xff]  ;;  %v1750_v49 = vld [vmem:[#allocation11 + $0x1930] sm:$0xff] }
 0x33f   :  { %v5120_v6 = vpack.c.bf16 %v1671_v35, %v1655_v62  ;;  %v1782_v62 = vld [vmem:[#allocation11 + $0x1a30] sm:$0xff] }
 0x340   :  { %4959 = vmatpush1.bf16.msra.mxu0 %v4958_v14  ;;  %v1542_v14 = vld [vmem:[#allocation11 + $0x12b0] sm:$0xff] }
 0x341   :  { %5087 = vmatpush1.bf16.msra.mxu1 %v5086_v15  ;;  %4961 = vmatprep.subr.bf16.mxu0 %v4960_v16  ;;  %v1557_v15 = vld [vmem:[#allocation11 + $0x1328] sm:$0xff] }
 0x342   :  { %5089 = vmatprep.subr.bf16.mxu1 %v5088_v20  ;;  %v1573_v16 = vld [vmem:[#allocation11 + $0x13a8] sm:$0xff]  ;;  %v5106_v20 = vpack.c.bf16 %v1542_v14, %v1526_v12 }
 0x343   :  { %v4980_v22 = vpack.c.bf16 %v1573_v16, %v1557_v15  ;;  %v1684_v15 = vld [vmem:[#allocation11 + $0x1720] sm:$0xff] }
 0x344   :  { %4963 = vmatpush1.bf16.msra.mxu0 %v4962_v27  ;;  %v1574_v27 = vld [vmem:[#allocation11 + $0x13b0] sm:$0xff]  ;;  %v1700_v16 = vld [vmem:[#allocation11 + $0x17a0] sm:$0xff] }
 0x345   :  { %5091 = vmatpush1.bf16.msra.mxu1 %v5090_v28  ;;  %4965 = vmatprep.subr.bf16.mxu0 %v4964_v30  ;;  %v1589_v28 = vld [vmem:[#allocation11 + $0x1428] sm:$0xff] }
 0x346   :  { %5093 = vmatprep.subr.bf16.mxu1 %v5092_v36  ;;  %v1605_v30 = vld [vmem:[#allocation11 + $0x14a8] sm:$0xff]  ;;  %v5110_v36 = vpack.c.bf16 %v1574_v27, %v1558_v25  ;;  %v4998_v25 = vpack.c.bf16 %v1700_v16, %v1684_v15  ;;  %v1847_v15 = vld [vmem:[#allocation11 + $0x1c38] sm:$0xff] }
 0x347   :  { %v4984_v37 = vpack.c.bf16 %v1605_v30, %v1589_v28  ;;  %v1716_v28 = vld [vmem:[#allocation11 + $0x1820] sm:$0xff]  ;;  %v1863_v16 = vld [vmem:[#allocation11 + $0x1cb8] sm:$0xff] }
 0x348   :  { %4967 = vmatpush1.bf16.msra.mxu0 %v4966_v46  ;;  %v1606_v46 = vld [vmem:[#allocation11 + $0x14b0] sm:$0xff]  ;;  %v1732_v30 = vld [vmem:[#allocation11 + $0x18a0] sm:$0xff]  ;;  %v5144_v24 = vpack.c.bf16 %v1863_v16, %v1847_v15 }
 0x349   :  { %5095 = vmatpush1.bf16.msra.mxu1 %v5094_v47  ;;  %4969 = vmatprep.subr.bf16.mxu0 %v4968_v48  ;;  %v1621_v47 = vld [vmem:[#allocation11 + $0x1528] sm:$0xff]  ;;  %v5114_v43 = vpack.c.bf16 %v1606_v46, %v1590_v40  ;;  %v5002_v40 = vpack.c.bf16 %v1732_v30, %v1716_v28  ;;  %v1879_v28 = vld [vmem:[#allocation11 + $0x1d38] sm:$0xff]  ;;  %v954_v16 = vld [vmem:[#allocation11 + $0x50] sm:$0xff] }
 0x34a   :  { %5097 = vmatprep.subr.bf16.mxu1 %v5096_v50  ;;  %v1637_v48 = vld [vmem:[#allocation11 + $0x15a8] sm:$0xff]  ;;  %v4986_v50 = vpack.c.bf16 %v1604_v39, %v1588_v38  ;;  %v1751_v38 = vld [vmem:[#allocation11 + $0x1938] sm:$0xff] }
 0x34b   :  { %2401 = vmatmul.mubr.f32.vlgmr.msra.gmra.mrb[6].mxu0 %v6481_v61  ;;  %v4988_v52 = vpack.c.bf16 %v1637_v48, %v1621_v47  ;;  %v1767_v39 = vld [vmem:[#allocation11 + $0x19b8] sm:$0xff]  ;;  %v1748_v47 = vld [vmem:[#allocation11 + $0x1920] sm:$0xff] }
 0x34c   :  { %2543 = vmatmul.mubr.f32.vlgmr.msra.gmra.mrb[6].mxu1 %v6481_v61  ;;  %4971 = vmatpush1.bf16.msra.mxu0 %v4970_v55  ;;  %v1622_v55 = vld [vmem:[#allocation11 + $0x1530] sm:$0xff]  ;;  %v1764_v48 = vld [vmem:[#allocation11 + $0x19a0] sm:$0xff]  ;;  %v5132_v31 = vpack.c.bf16 %v1767_v39, %v1751_v38  ;;  %v1895_v30 = vld [vmem:[#allocation11 + $0x1db8] sm:$0xff] }
 0x34d   :  { %2471 = vmatprep.mubr.f32.mxu0 %v6487_v4  ;;  %5099 = vmatpush1.bf16.msra.mxu1 %v5098_v59  ;;  %v1653_v59 = vld [vmem:[#allocation11 + $0x1628] sm:$0xff]  ;;  %v5118_v0 = vpack.c.bf16 %v1638_v57, %v1622_v55  ;;  %v5006_v55 = vpack.c.bf16 %v1764_v48, %v1748_v47  ;;  %v1878_v38 = vld [vmem:[#allocation11 + $0x1d30] sm:$0xff]  ;;  %v5148_v39 = vpack.c.bf16 %v1895_v30, %v1879_v28  ;;  %v1911_v47 = vld [vmem:[#allocation11 + $0x1e38] sm:$0xff] }
 0x34e   :  { %2613 = vmatprep.mubr.f32.mxu1 %v6487_v4  ;;  %4973 = vmatprep.subr.bf16.mxu0 %v4972_v63  ;;  %v4990_v63 = vpack.c.bf16 %v1636_v54, %v1620_v53  ;;  %v4992_v1 = vpack.c.bf16 %v1669_v60, %v1653_v59  ;;  %v1783_v53 = vld [vmem:[#allocation11 + $0x1a38] sm:$0xff]  ;;  %v1780_v59 = vld [vmem:[#allocation11 + $0x1a20] sm:$0xff]  ;;  %v1002_v30 = vld [vmem:[#allocation11 + $0x1d0] sm:$0xff] }
 0x34f   :  { %5101 = vmatprep.subr.bf16.mxu1 %v5100_v3  ;;  %v1668_v3 = vld [vmem:[#allocation11 + $0x16a0] sm:$0xff]  ;;  %v1799_v54 = vld [vmem:[#allocation11 + $0x1ab8] sm:$0xff] }
 0x350   :  { %4975 = vmatpush1.bf16.msra.mxu0 %v4974_v7  ;;  %v1670_v7 = vld [vmem:[#allocation11 + $0x16b0] sm:$0xff]  ;;  %v4994_v12 = vpack.c.bf16 %v1668_v3, %v1652_v2  ;;  %v1796_v60 = vld [vmem:[#allocation11 + $0x1aa0] sm:$0xff]  ;;  %v5136_v35 = vpack.c.bf16 %v1799_v54, %v1783_v53  ;;  %v1815_v2 = vld [vmem:[#allocation11 + $0x1b38] sm:$0xff] }
 0x351   :  { %5103 = vmatpush1.bf16.msra.mxu1 %v5102_v8  ;;  %4977 = vmatprep.subr.bf16.mxu0 %v4976_v9  ;;  %v1685_v8 = vld [vmem:[#allocation11 + $0x1728] sm:$0xff]  ;;  %v1831_v3 = vld [vmem:[#allocation11 + $0x1bb8] sm:$0xff]  ;;  %v1910_v53 = vld [vmem:[#allocation11 + $0x1e30] sm:$0xff] }
 0x352   :  { %5105 = vmatprep.subr.bf16.mxu1 %v5104_v13  ;;  %v1701_v9 = vld [vmem:[#allocation11 + $0x17a8] sm:$0xff]  ;;  %v5122_v13 = vpack.c.bf16 %v1670_v7, %v1654_v5  ;;  %v5010_v5 = vpack.c.bf16 %v1796_v60, %v1780_v59  ;;  %v5140_v11 = vpack.c.bf16 %v1831_v3, %v1815_v2  ;;  %v1927_v48 = vld [vmem:[#allocation11 + $0x1eb8] sm:$0xff]  ;;  %v1942_v2 = vld [vmem:[#allocation11 + $0x1f30] sm:$0xff] }
 0x353   :  { %v4996_v14 = vpack.c.bf16 %v1701_v9, %v1685_v8  ;;  %v1812_v8 = vld [vmem:[#allocation11 + $0x1b20] sm:$0xff]  ;;  %v5152_v54 = vpack.c.bf16 %v1927_v48, %v1911_v47  ;;  %v1943_v59 = vld [vmem:[#allocation11 + $0x1f38] sm:$0xff]  ;;  %v1018_v47 = vld [vmem:[#allocation11 + $0x250] sm:$0xff] }
 0x354   :  { %4979 = vmatpush1.bf16.msra.mxu0 %v4978_v19  ;;  %v1702_v19 = vld [vmem:[#allocation11 + $0x17b0] sm:$0xff]  ;;  %v1828_v9 = vld [vmem:[#allocation11 + $0x1ba0] sm:$0xff]  ;;  %v1959_v60 = vld [vmem:[#allocation11 + $0x1fb8] sm:$0xff] }
 0x355   :  { %5107 = vmatpush1.bf16.msra.mxu1 %v5106_v20  ;;  %4981 = vmatprep.subr.bf16.mxu0 %v4980_v22  ;;  %v1717_v20 = vld [vmem:[#allocation11 + $0x1828] sm:$0xff]  ;;  %v5156_v3 = vpack.c.bf16 %v1959_v60, %v1943_v59  ;;  %v1050_v59 = vld [vmem:[#allocation11 + $0x350] sm:$0xff] }
 0x356   :  { %5109 = vmatprep.subr.bf16.mxu1 %v5108_v26  ;;  %v1733_v22 = vld [vmem:[#allocation11 + $0x18a8] sm:$0xff]  ;;  %v5126_v26 = vpack.c.bf16 %v1702_v19, %v1686_v17  ;;  %v5014_v17 = vpack.c.bf16 %v1828_v9, %v1812_v8  ;;  %v955_v8 = vld [vmem:[#allocation11 + $0x58] sm:$0xff] }
 0x357   :  { %v5000_v27 = vpack.c.bf16 %v1733_v22, %v1717_v20  ;;  %v1844_v20 = vld [vmem:[#allocation11 + $0x1c20] sm:$0xff]  ;;  %v971_v9 = vld [vmem:[#allocation11 + $0xd8] sm:$0xff] }
 0x358   :  { %4983 = vmatpush1.bf16.msra.mxu0 %v4982_v34  ;;  %v1734_v34 = vld [vmem:[#allocation11 + $0x18b0] sm:$0xff]  ;;  %v1860_v22 = vld [vmem:[#allocation11 + $0x1ca0] sm:$0xff]  ;;  %v5288_v15 = vpack.c.bf16 %v971_v9, %v955_v8 }
 0x359   :  { %5111 = vmatpush1.bf16.msra.mxu1 %v5110_v36  ;;  %4985 = vmatprep.subr.bf16.mxu0 %v4984_v37  ;;  %v1749_v36 = vld [vmem:[#allocation11 + $0x1928] sm:$0xff]  ;;  %v1082_v8 = vld [vmem:[#allocation11 + $0x450] sm:$0xff] }
 0x35a   :  { %5113 = vmatprep.subr.bf16.mxu1 %v5112_v45  ;;  %v1765_v37 = vld [vmem:[#allocation11 + $0x19a8] sm:$0xff]  ;;  %v5130_v45 = vpack.c.bf16 %v1734_v34, %v1718_v32  ;;  %v5018_v32 = vpack.c.bf16 %v1860_v22, %v1844_v20  ;;  %v987_v22 = vld [vmem:[#allocation11 + $0x158] sm:$0xff] }
 0x35b   :  { %v5004_v46 = vpack.c.bf16 %v1765_v37, %v1749_v36  ;;  %v1876_v36 = vld [vmem:[#allocation11 + $0x1d20] sm:$0xff] }
 0x35c   :  { %4987 = vmatpush1.bf16.msra.mxu0 %v4986_v50  ;;  %v1766_v50 = vld [vmem:[#allocation11 + $0x19b0] sm:$0xff]  ;;  %v1892_v37 = vld [vmem:[#allocation11 + $0x1da0] sm:$0xff] }
 0x35d   :  { %5115 = vmatpush1.bf16.msra.mxu1 %v5114_v43  ;;  %4989 = vmatprep.subr.bf16.mxu0 %v4988_v52  ;;  %v1781_v43 = vld [vmem:[#allocation11 + $0x1a28] sm:$0xff] }
 0x35e   :  { %5117 = vmatprep.subr.bf16.mxu1 %v5116_v56  ;;  %v1797_v52 = vld [vmem:[#allocation11 + $0x1aa8] sm:$0xff]  ;;  %v5134_v56 = vpack.c.bf16 %v1766_v50, %v1750_v49  ;;  %v5022_v49 = vpack.c.bf16 %v1892_v37, %v1876_v36  ;;  %v1019_v36 = vld [vmem:[#allocation11 + $0x258] sm:$0xff] }
 0x35f   :  { %v5008_v57 = vpack.c.bf16 %v1797_v52, %v1781_v43  ;;  %v1908_v43 = vld [vmem:[#allocation11 + $0x1e20] sm:$0xff]  ;;  %v1035_v37 = vld [vmem:[#allocation11 + $0x2d8] sm:$0xff] }
 0x360   :  { %4991 = vmatpush1.bf16.msra.mxu0 %v4990_v63  ;;  %v1798_v63 = vld [vmem:[#allocation11 + $0x1ab0] sm:$0xff]  ;;  %v1924_v52 = vld [vmem:[#allocation11 + $0x1ea0] sm:$0xff]  ;;  %v5296_v48 = vpack.c.bf16 %v1035_v37, %v1019_v36 }
 0x361   :  { %5119 = vmatpush1.bf16.msra.mxu1 %v5118_v0  ;;  %4993 = vmatprep.subr.bf16.mxu0 %v4992_v1  ;;  %v1813_v0 = vld [vmem:[#allocation11 + $0x1b28] sm:$0xff]  ;;  %v1146_v36 = vld [vmem:[#allocation11 + $0x650] sm:$0xff] }
 0x362   :  { %5121 = vmatprep.subr.bf16.mxu1 %v5120_v6  ;;  %v1829_v1 = vld [vmem:[#allocation11 + $0x1ba8] sm:$0xff]  ;;  %v5138_v6 = vpack.c.bf16 %v1798_v63, %v1782_v62  ;;  %v5026_v62 = vpack.c.bf16 %v1924_v52, %v1908_v43  ;;  %v1051_v43 = vld [vmem:[#allocation11 + $0x358] sm:$0xff] }
 0x363   :  { %v5012_v7 = vpack.c.bf16 %v1829_v1, %v1813_v0  ;;  %v1940_v0 = vld [vmem:[#allocation11 + $0x1f20] sm:$0xff]  ;;  %v1067_v52 = vld [vmem:[#allocation11 + $0x3d8] sm:$0xff] }
 0x364   :  { %4995 = vmatpush1.bf16.msra.mxu0 %v4994_v12  ;;  %v1830_v12 = vld [vmem:[#allocation11 + $0x1bb0] sm:$0xff]  ;;  %v1956_v1 = vld [vmem:[#allocation11 + $0x1fa0] sm:$0xff]  ;;  %v5300_v60 = vpack.c.bf16 %v1067_v52, %v1051_v43 }
 0x365   :  { %5123 = vmatpush1.bf16.msra.mxu1 %v5122_v13  ;;  %4997 = vmatprep.subr.bf16.mxu0 %v4996_v14  ;;  %v1845_v13 = vld [vmem:[#allocation11 + $0x1c28] sm:$0xff]  ;;  %v1178_v43 = vld [vmem:[#allocation11 + $0x750] sm:$0xff] }
 0x366   :  { %5125 = vmatprep.subr.bf16.mxu1 %v5124_v18  ;;  %v1861_v14 = vld [vmem:[#allocation11 + $0x1ca8] sm:$0xff]  ;;  %v5142_v18 = vpack.c.bf16 %v1830_v12, %v1814_v10  ;;  %v5030_v10 = vpack.c.bf16 %v1956_v1, %v1940_v0  ;;  %v1083_v0 = vld [vmem:[#allocation11 + $0x458] sm:$0xff] }
 0x367   :  { %v5016_v19 = vpack.c.bf16 %v1861_v14, %v1845_v13  ;;  %v952_v13 = vld [vmem:[#allocation11 + $0x40] sm:$0xff]  ;;  %v1099_v1 = vld [vmem:[#allocation11 + $0x4d8] sm:$0xff] }
 0x368   :  { %4999 = vmatpush1.bf16.msra.mxu0 %v4998_v25  ;;  %v1862_v25 = vld [vmem:[#allocation11 + $0x1cb0] sm:$0xff]  ;;  %v968_v14 = vld [vmem:[#allocation11 + $0xc0] sm:$0xff]  ;;  %v5304_v9 = vpack.c.bf16 %v1099_v1, %v1083_v0 }
 0x369   :  { %5127 = vmatpush1.bf16.msra.mxu1 %v5126_v26  ;;  %5001 = vmatprep.subr.bf16.mxu0 %v5000_v27  ;;  %v1877_v26 = vld [vmem:[#allocation11 + $0x1d28] sm:$0xff]  ;;  %v5162_v20 = vpack.c.bf16 %v968_v14, %v952_v13  ;;  %v1115_v13 = vld [vmem:[#allocation11 + $0x558] sm:$0xff]  ;;  %v1210_v0 = vld [vmem:[#allocation11 + $0x850] sm:$0xff] }
 0x36a   :  { %5129 = vmatprep.subr.bf16.mxu1 %v5128_v33  ;;  %v1893_v27 = vld [vmem:[#allocation11 + $0x1da8] sm:$0xff]  ;;  %v5146_v33 = vpack.c.bf16 %v1862_v25, %v1846_v23  ;;  %v1003_v23 = vld [vmem:[#allocation11 + $0x1d8] sm:$0xff]  ;;  %v984_v25 = vld [vmem:[#allocation11 + $0x140] sm:$0xff] }
 0x36b   :  { %v5020_v34 = vpack.c.bf16 %v1893_v27, %v1877_v26  ;;  %v1000_v26 = vld [vmem:[#allocation11 + $0x1c0] sm:$0xff]  ;;  %v986_v27 = vld [vmem:[#allocation11 + $0x150] sm:$0xff]  ;;  %v1131_v14 = vld [vmem:[#allocation11 + $0x5d8] sm:$0xff] }
 0x36c   :  { %5003 = vmatpush1.bf16.msra.mxu0 %v5002_v40  ;;  %v1894_v40 = vld [vmem:[#allocation11 + $0x1db0] sm:$0xff] }
 0x36d   :  { %5131 = vmatpush1.bf16.msra.mxu1 %v5130_v45  ;;  %5005 = vmatprep.subr.bf16.mxu0 %v5004_v46  ;;  %v1909_v45 = vld [vmem:[#allocation11 + $0x1e28] sm:$0xff] }
 0x36e   :  { %5133 = vmatprep.subr.bf16.mxu1 %v5132_v31  ;;  %v1925_v46 = vld [vmem:[#allocation11 + $0x1ea8] sm:$0xff]  ;;  %v5150_v31 = vpack.c.bf16 %v1894_v40, %v1878_v38  ;;  %v5166_v38 = vpack.c.bf16 %v1000_v26, %v984_v25  ;;  %v1147_v26 = vld [vmem:[#allocation11 + $0x658] sm:$0xff] }
 0x36f   :  { %v5024_v50 = vpack.c.bf16 %v1925_v46, %v1909_v45  ;;  %v1016_v45 = vld [vmem:[#allocation11 + $0x240] sm:$0xff]  ;;  %v1161_v25 = vld [vmem:[#allocation11 + $0x6c8] sm:$0xff] }
 0x370   :  { %5007 = vmatpush1.bf16.msra.mxu0 %v5006_v55  ;;  %v1926_v55 = vld [vmem:[#allocation11 + $0x1eb0] sm:$0xff]  ;;  %v1032_v46 = vld [vmem:[#allocation11 + $0x2c0] sm:$0xff] }
 0x371   :  { %5135 = vmatpush1.bf16.msra.mxu1 %v5134_v56  ;;  %5009 = vmatprep.subr.bf16.mxu0 %v5008_v57  ;;  %v1941_v56 = vld [vmem:[#allocation11 + $0x1f28] sm:$0xff] }
 0x372   :  { %5137 = vmatprep.subr.bf16.mxu1 %v5136_v35  ;;  %v1957_v57 = vld [vmem:[#allocation11 + $0x1fa8] sm:$0xff]  ;;  %v5154_v35 = vpack.c.bf16 %v1926_v55, %v1910_v53  ;;  %v5170_v53 = vpack.c.bf16 %v1032_v46, %v1016_v45  ;;  %v1179_v45 = vld [vmem:[#allocation11 + $0x758] sm:$0xff] }
 0x373   :  { %v5028_v63 = vpack.c.bf16 %v1957_v57, %v1941_v56  ;;  %v1048_v56 = vld [vmem:[#allocation11 + $0x340] sm:$0xff]  ;;  %v1195_v46 = vld [vmem:[#allocation11 + $0x7d8] sm:$0xff] }
 0x374   :  { %5011 = vmatpush1.bf16.msra.mxu0 %v5010_v5  ;;  %v1958_v5 = vld [vmem:[#allocation11 + $0x1fb0] sm:$0xff]  ;;  %v1064_v57 = vld [vmem:[#allocation11 + $0x3c0] sm:$0xff]  ;;  %v5316_v52 = vpack.c.bf16 %v1195_v46, %v1179_v45 }
 0x375   :  { %5139 = vmatpush1.bf16.msra.mxu1 %v5138_v6  ;;  %5013 = vmatprep.subr.bf16.mxu0 %v5012_v7  ;;  %v953_v6 = vld [vmem:[#allocation11 + $0x48] sm:$0xff]  ;;  %v1306_v45 = vld [vmem:[#allocation11 + $0xb50] sm:$0xff] }
 0x376   :  { %5141 = vmatprep.subr.bf16.mxu1 %v5140_v11  ;;  %v969_v7 = vld [vmem:[#allocation11 + $0xc8] sm:$0xff]  ;;  %v5158_v11 = vpack.c.bf16 %v1958_v5, %v1942_v2  ;;  %v5174_v2 = vpack.c.bf16 %v1064_v57, %v1048_v56  ;;  %v1211_v56 = vld [vmem:[#allocation11 + $0x858] sm:$0xff] }
 0x377   :  { %v5160_v12 = vpack.c.bf16 %v969_v7, %v953_v6  ;;  %v1080_v6 = vld [vmem:[#allocation11 + $0x440] sm:$0xff]  ;;  %v1227_v57 = vld [vmem:[#allocation11 + $0x8d8] sm:$0xff] }
 0x378   :  { %5015 = vmatpush1.bf16.msra.mxu0 %v5014_v17  ;;  %v970_v17 = vld [vmem:[#allocation11 + $0xd0] sm:$0xff]  ;;  %v1096_v7 = vld [vmem:[#allocation11 + $0x4c0] sm:$0xff]  ;;  %v5320_v1 = vpack.c.bf16 %v1227_v57, %v1211_v56 }
 0x379   :  { %5143 = vmatpush1.bf16.msra.mxu1 %v5142_v18  ;;  %5017 = vmatprep.subr.bf16.mxu0 %v5016_v19  ;;  %v985_v18 = vld [vmem:[#allocation11 + $0x148] sm:$0xff]  ;;  %v1338_v56 = vld [vmem:[#allocation11 + $0xc50] sm:$0xff] }
 0x37a   :  { %5145 = vmatprep.subr.bf16.mxu1 %v5144_v24  ;;  %v1001_v19 = vld [vmem:[#allocation11 + $0x1c8] sm:$0xff]  ;;  %v5290_v24 = vpack.c.bf16 %v970_v17, %v954_v16 }
 0x37b   :  { %v5164_v28 = vpack.c.bf16 %v1001_v19, %v985_v18  ;;  %v1112_v18 = vld [vmem:[#allocation11 + $0x540] sm:$0xff] }
 0x37c   :  { %5019 = vmatpush1.bf16.msra.mxu0 %v5018_v32  ;;  %v1017_v32 = vld [vmem:[#allocation11 + $0x248] sm:$0xff]  ;;  %v1128_v19 = vld [vmem:[#allocation11 + $0x5c0] sm:$0xff] }
 0x37d   :  { %5147 = vmatpush1.bf16.msra.mxu1 %v5146_v33  ;;  %5021 = vmatprep.subr.bf16.mxu0 %v5020_v34  ;;  %v1033_v33 = vld [vmem:[#allocation11 + $0x2c8] sm:$0xff]  ;;  %v5292_v34 = vpack.c.bf16 %v1003_v23, %v987_v22  ;;  %v5308_v22 = vpack.c.bf16 %v1131_v14, %v1115_v13  ;;  %v1130_v23 = vld [vmem:[#allocation11 + $0x5d0] sm:$0xff] }
 0x37e   :  { %5149 = vmatprep.subr.bf16.mxu1 %v5148_v39  ;;  %v5294_v39 = vpack.c.bf16 %v1002_v30, %v986_v27  ;;  %v5168_v40 = vpack.c.bf16 %v1033_v33, %v1017_v32  ;;  %v1163_v27 = vld [vmem:[#allocation11 + $0x6d8] sm:$0xff]  ;;  %v1144_v33 = vld [vmem:[#allocation11 + $0x640] sm:$0xff]  ;;  %v1242_v13 = vld [vmem:[#allocation11 + $0x950] sm:$0xff] }
 0x37f   :  { %v5312_v37 = vpack.c.bf16 %v1163_v27, %v1147_v26  ;;  %v1274_v26 = vld [vmem:[#allocation11 + $0xa50] sm:$0xff] }
 0x380   :  { %5023 = vmatpush1.bf16.msra.mxu0 %v5022_v49  ;;  %v1034_v49 = vld [vmem:[#allocation11 + $0x2d0] sm:$0xff] }
 0x381   :  { %5151 = vmatpush1.bf16.msra.mxu1 %v5150_v31  ;;  %5025 = vmatprep.subr.bf16.mxu0 %v5024_v50  ;;  %v1049_v31 = vld [vmem:[#allocation11 + $0x348] sm:$0xff] }
 0x382   :  { %5153 = vmatprep.subr.bf16.mxu1 %v5152_v54  ;;  %v1065_v50 = vld [vmem:[#allocation11 + $0x3c8] sm:$0xff]  ;;  %v5298_v54 = vpack.c.bf16 %v1034_v49, %v1018_v47 }
 0x383   :  { %v5172_v55 = vpack.c.bf16 %v1065_v50, %v1049_v31  ;;  %v1176_v31 = vld [vmem:[#allocation11 + $0x740] sm:$0xff] }
 0x384   :  { %5027 = vmatpush1.bf16.msra.mxu0 %v5026_v62  ;;  %v1066_v62 = vld [vmem:[#allocation11 + $0x3d0] sm:$0xff]  ;;  %v1192_v50 = vld [vmem:[#allocation11 + $0x7c0] sm:$0xff] }
 0x385   :  { %5155 = vmatpush1.bf16.msra.mxu1 %v5154_v35  ;;  %5029 = vmatprep.subr.bf16.mxu0 %v5028_v63  ;;  %v1081_v35 = vld [vmem:[#allocation11 + $0x448] sm:$0xff] }
 0x386   :  { %5157 = vmatprep.subr.bf16.mxu1 %v5156_v3  ;;  %v1097_v63 = vld [vmem:[#allocation11 + $0x4c8] sm:$0xff]  ;;  %v5302_v3 = vpack.c.bf16 %v1066_v62, %v1050_v59  ;;  %v5190_v59 = vpack.c.bf16 %v1192_v50, %v1176_v31  ;;  %v1339_v31 = vld [vmem:[#allocation11 + $0xc58] sm:$0xff] }
 0x387   :  { %v5176_v5 = vpack.c.bf16 %v1097_v63, %v1081_v35  ;;  %v1208_v35 = vld [vmem:[#allocation11 + $0x840] sm:$0xff]  ;;  %v1355_v50 = vld [vmem:[#allocation11 + $0xcd8] sm:$0xff] }
 0x388   :  { %5031 = vmatpush1.bf16.msra.mxu0 %v5030_v10  ;;  %v1098_v10 = vld [vmem:[#allocation11 + $0x4d0] sm:$0xff]  ;;  %v1224_v63 = vld [vmem:[#allocation11 + $0x8c0] sm:$0xff]  ;;  %v5336_v57 = vpack.c.bf16 %v1355_v50, %v1339_v31 }
 0x389   :  { %5159 = vmatpush1.bf16.msra.mxu1 %v5158_v11  ;;  %5161 = vmatprep.subr.bf16.mxu0 %v5160_v12  ;;  %v1113_v11 = vld [vmem:[#allocation11 + $0x548] sm:$0xff]  ;;  %v5306_v16 = vpack.c.bf16 %v1098_v10, %v1082_v8  ;;  %v5194_v8 = vpack.c.bf16 %v1224_v63, %v1208_v35  ;;  %v1371_v35 = vld [vmem:[#allocation11 + $0xd58] sm:$0xff]  ;;  %v1466_v50 = vld [vmem:[#allocation11 + $0x1050] sm:$0xff] }
 0x38a   :  { %5289 = vmatprep.subr.bf16.mxu1 %v5288_v15  ;;  %v1129_v12 = vld [vmem:[#allocation11 + $0x5c8] sm:$0xff]  ;;  %v5178_v15 = vpack.c.bf16 %v1096_v7, %v1080_v6  ;;  %v1243_v6 = vld [vmem:[#allocation11 + $0x958] sm:$0xff] }
 0x38b   :  { %2472 = vmatmul.mubr.f32.vlgmr.msra.gmra.mrb[6].mxu0 %v6494_v29  ;;  %v5180_v17 = vpack.c.bf16 %v1129_v12, %v1113_v11  ;;  %v1259_v7 = vld [vmem:[#allocation11 + $0x9d8] sm:$0xff]  ;;  %v1240_v11 = vld [vmem:[#allocation11 + $0x940] sm:$0xff] }
 0x38c   :  { %2614 = vmatmul.mubr.f32.vlgmr.msra.gmra.mrb[6].mxu1 %v6494_v29  ;;  %5163 = vmatpush1.bf16.msra.mxu0 %v5162_v20  ;;  %v1114_v20 = vld [vmem:[#allocation11 + $0x550] sm:$0xff]  ;;  %v1256_v12 = vld [vmem:[#allocation11 + $0x9c0] sm:$0xff]  ;;  %v5324_v14 = vpack.c.bf16 %v1259_v7, %v1243_v6  ;;  %v1387_v63 = vld [vmem:[#allocation11 + $0xdd8] sm:$0xff] }
 0x38d   :  { %2684 = vmatprep.mubr.f32.mxu0 %v6479_v58  ;;  %5291 = vmatpush1.bf16.msra.mxu1 %v5290_v24  ;;  %v1145_v24 = vld [vmem:[#allocation11 + $0x648] sm:$0xff]  ;;  %v5310_v30 = vpack.c.bf16 %v1130_v23, %v1114_v20  ;;  %v5198_v20 = vpack.c.bf16 %v1256_v12, %v1240_v11  ;;  %v1370_v6 = vld [vmem:[#allocation11 + $0xd50] sm:$0xff]  ;;  %v5340_v7 = vpack.c.bf16 %v1387_v63, %v1371_v35  ;;  %v1403_v11 = vld [vmem:[#allocation11 + $0xe58] sm:$0xff] }
 0x38e   :  { %2826 = vmatprep.mubr.f32.mxu1 %v6479_v58  ;;  %5165 = vmatprep.subr.bf16.mxu0 %v5164_v28  ;;  %v5182_v28 = vpack.c.bf16 %v1128_v19, %v1112_v18  ;;  %v5184_v32 = vpack.c.bf16 %v1161_v25, %v1145_v24  ;;  %v1275_v18 = vld [vmem:[#allocation11 + $0xa58] sm:$0xff]  ;;  %v1272_v24 = vld [vmem:[#allocation11 + $0xa40] sm:$0xff]  ;;  %v1514_v63 = vld [vmem:[#allocation11 + $0x11d0] sm:$0xff] }
 0x38f   :  { %5293 = vmatprep.subr.bf16.mxu1 %v5292_v34  ;;  %v1160_v34 = vld [vmem:[#allocation11 + $0x6c0] sm:$0xff]  ;;  %v1291_v19 = vld [vmem:[#allocation11 + $0xad8] sm:$0xff] }
 0x390   :  { %5167 = vmatpush1.bf16.msra.mxu0 %v5166_v38  ;;  %v1162_v38 = vld [vmem:[#allocation11 + $0x6d0] sm:$0xff]  ;;  %v5186_v47 = vpack.c.bf16 %v1160_v34, %v1144_v33  ;;  %v1288_v25 = vld [vmem:[#allocation11 + $0xac0] sm:$0xff]  ;;  %v5328_v27 = vpack.c.bf16 %v1291_v19, %v1275_v18  ;;  %v1307_v33 = vld [vmem:[#allocation11 + $0xb58] sm:$0xff] }
 0x391   :  { %5295 = vmatpush1.bf16.msra.mxu1 %v5294_v39  ;;  %5169 = vmatprep.subr.bf16.mxu0 %v5168_v40  ;;  %v1177_v39 = vld [vmem:[#allocation11 + $0x748] sm:$0xff]  ;;  %v1323_v34 = vld [vmem:[#allocation11 + $0xbd8] sm:$0xff]  ;;  %v1402_v18 = vld [vmem:[#allocation11 + $0xe50] sm:$0xff] }
 0x392   :  { %5297 = vmatprep.subr.bf16.mxu1 %v5296_v48  ;;  %v1193_v40 = vld [vmem:[#allocation11 + $0x7c8] sm:$0xff]  ;;  %v5314_v48 = vpack.c.bf16 %v1162_v38, %v1146_v36  ;;  %v5202_v36 = vpack.c.bf16 %v1288_v25, %v1272_v24  ;;  %v5332_v46 = vpack.c.bf16 %v1323_v34, %v1307_v33  ;;  %v1419_v12 = vld [vmem:[#allocation11 + $0xed8] sm:$0xff]  ;;  %v1434_v33 = vld [vmem:[#allocation11 + $0xf50] sm:$0xff] }
 0x393   :  { %v5188_v49 = vpack.c.bf16 %v1193_v40, %v1177_v39  ;;  %v1304_v39 = vld [vmem:[#allocation11 + $0xb40] sm:$0xff]  ;;  %v5344_v19 = vpack.c.bf16 %v1419_v12, %v1403_v11  ;;  %v1435_v24 = vld [vmem:[#allocation11 + $0xf58] sm:$0xff]  ;;  %v1530_v11 = vld [vmem:[#allocation11 + $0x1250] sm:$0xff] }
 0x394   :  { %5171 = vmatpush1.bf16.msra.mxu0 %v5170_v53  ;;  %v1194_v53 = vld [vmem:[#allocation11 + $0x7d0] sm:$0xff]  ;;  %v1320_v40 = vld [vmem:[#allocation11 + $0xbc0] sm:$0xff]  ;;  %v1451_v25 = vld [vmem:[#allocation11 + $0xfd8] sm:$0xff] }
 0x395   :  { %5299 = vmatpush1.bf16.msra.mxu1 %v5298_v54  ;;  %5173 = vmatprep.subr.bf16.mxu0 %v5172_v55  ;;  %v1209_v54 = vld [vmem:[#allocation11 + $0x848] sm:$0xff]  ;;  %v5348_v34 = vpack.c.bf16 %v1451_v25, %v1435_v24  ;;  %v1562_v24 = vld [vmem:[#allocation11 + $0x1350] sm:$0xff] }
 0x396   :  { %5301 = vmatprep.subr.bf16.mxu1 %v5300_v60  ;;  %v1225_v55 = vld [vmem:[#allocation11 + $0x8c8] sm:$0xff]  ;;  %v5318_v60 = vpack.c.bf16 %v1194_v53, %v1178_v43  ;;  %v5206_v43 = vpack.c.bf16 %v1320_v40, %v1304_v39  ;;  %v1467_v39 = vld [vmem:[#allocation11 + $0x1058] sm:$0xff] }
 0x397   :  { %v5192_v62 = vpack.c.bf16 %v1225_v55, %v1209_v54  ;;  %v1336_v54 = vld [vmem:[#allocation11 + $0xc40] sm:$0xff]  ;;  %v1483_v40 = vld [vmem:[#allocation11 + $0x10d8] sm:$0xff] }
 0x398   :  { %5175 = vmatpush1.bf16.msra.mxu0 %v5174_v2  ;;  %v1226_v2 = vld [vmem:[#allocation11 + $0x8d0] sm:$0xff]  ;;  %v1352_v55 = vld [vmem:[#allocation11 + $0xcc0] sm:$0xff]  ;;  %v5352_v31 = vpack.c.bf16 %v1483_v40, %v1467_v39 }
 0x399   :  { %5303 = vmatpush1.bf16.msra.mxu1 %v5302_v3  ;;  %5177 = vmatprep.subr.bf16.mxu0 %v5176_v5  ;;  %v1241_v3 = vld [vmem:[#allocation11 + $0x948] sm:$0xff]  ;;  %v1594_v39 = vld [vmem:[#allocation11 + $0x1450] sm:$0xff] }
 0x39a   :  { %5305 = vmatprep.subr.bf16.mxu1 %v5304_v9  ;;  %v1257_v5 = vld [vmem:[#allocation11 + $0x9c8] sm:$0xff]  ;;  %v5322_v9 = vpack.c.bf16 %v1226_v2, %v1210_v0  ;;  %v5210_v0 = vpack.c.bf16 %v1352_v55, %v1336_v54  ;;  %v1499_v55 = vld [vmem:[#allocation11 + $0x1158] sm:$0xff] }
 0x39b   :  { %v5196_v10 = vpack.c.bf16 %v1257_v5, %v1241_v3  ;;  %v1368_v3 = vld [vmem:[#allocation11 + $0xd40] sm:$0xff] }
 0x39c   :  { %5179 = vmatpush1.bf16.msra.mxu0 %v5178_v15  ;;  %v1258_v15 = vld [vmem:[#allocation11 + $0x9d0] sm:$0xff]  ;;  %v1384_v5 = vld [vmem:[#allocation11 + $0xdc0] sm:$0xff] }
 0x39d   :  { %5307 = vmatpush1.bf16.msra.mxu1 %v5306_v16  ;;  %5181 = vmatprep.subr.bf16.mxu0 %v5180_v17  ;;  %v1273_v16 = vld [vmem:[#allocation11 + $0xa48] sm:$0xff] }
 0x39e   :  { %5309 = vmatprep.subr.bf16.mxu1 %v5308_v22  ;;  %v1289_v17 = vld [vmem:[#allocation11 + $0xac8] sm:$0xff]  ;;  %v5326_v22 = vpack.c.bf16 %v1258_v15, %v1242_v13  ;;  %v5214_v13 = vpack.c.bf16 %v1384_v5, %v1368_v3  ;;  %v1531_v3 = vld [vmem:[#allocation11 + $0x1258] sm:$0xff] }
 0x39f   :  { %v5200_v23 = vpack.c.bf16 %v1289_v17, %v1273_v16  ;;  %v1400_v16 = vld [vmem:[#allocation11 + $0xe40] sm:$0xff]  ;;  %v1547_v5 = vld [vmem:[#allocation11 + $0x12d8] sm:$0xff] }
 0x3a0   :  { %5183 = vmatpush1.bf16.msra.mxu0 %v5182_v28  ;;  %v1290_v28 = vld [vmem:[#allocation11 + $0xad0] sm:$0xff]  ;;  %v1416_v17 = vld [vmem:[#allocation11 + $0xec0] sm:$0xff]  ;;  %v5360_v12 = vpack.c.bf16 %v1547_v5, %v1531_v3 }
 0x3a1   :  { %5311 = vmatpush1.bf16.msra.mxu1 %v5310_v30  ;;  %5185 = vmatprep.subr.bf16.mxu0 %v5184_v32  ;;  %v1305_v30 = vld [vmem:[#allocation11 + $0xb48] sm:$0xff]  ;;  %v1658_v3 = vld [vmem:[#allocation11 + $0x1650] sm:$0xff] }
 0x3a2   :  { %5313 = vmatprep.subr.bf16.mxu1 %v5312_v37  ;;  %v1321_v32 = vld [vmem:[#allocation11 + $0xbc8] sm:$0xff]  ;;  %v5330_v37 = vpack.c.bf16 %v1290_v28, %v1274_v26  ;;  %v5218_v26 = vpack.c.bf16 %v1416_v17, %v1400_v16  ;;  %v1563_v16 = vld [vmem:[#allocation11 + $0x1358] sm:$0xff] }
 0x3a3   :  { %v5204_v38 = vpack.c.bf16 %v1321_v32, %v1305_v30  ;;  %v1432_v30 = vld [vmem:[#allocation11 + $0xf40] sm:$0xff]  ;;  %v1579_v17 = vld [vmem:[#allocation11 + $0x13d8] sm:$0xff] }
 0x3a4   :  { %5187 = vmatpush1.bf16.msra.mxu0 %v5186_v47  ;;  %v1322_v47 = vld [vmem:[#allocation11 + $0xbd0] sm:$0xff]  ;;  %v1448_v32 = vld [vmem:[#allocation11 + $0xfc0] sm:$0xff]  ;;  %v5364_v25 = vpack.c.bf16 %v1579_v17, %v1563_v16 }
 0x3a5   :  { %5315 = vmatpush1.bf16.msra.mxu1 %v5314_v48  ;;  %5189 = vmatprep.subr.bf16.mxu0 %v5188_v49  ;;  %v1337_v48 = vld [vmem:[#allocation11 + $0xc48] sm:$0xff] }
 0x3a6   :  { %5317 = vmatprep.subr.bf16.mxu1 %v5316_v52  ;;  %v1353_v49 = vld [vmem:[#allocation11 + $0xcc8] sm:$0xff]  ;;  %v5334_v52 = vpack.c.bf16 %v1322_v47, %v1306_v45  ;;  %v5222_v45 = vpack.c.bf16 %v1448_v32, %v1432_v30  ;;  %v1595_v30 = vld [vmem:[#allocation11 + $0x1458] sm:$0xff] }
 0x3a7   :  { %v5208_v53 = vpack.c.bf16 %v1353_v49, %v1337_v48  ;;  %v1464_v48 = vld [vmem:[#allocation11 + $0x1040] sm:$0xff]  ;;  %v1611_v32 = vld [vmem:[#allocation11 + $0x14d8] sm:$0xff] }
 0x3a8   :  { %5191 = vmatpush1.bf16.msra.mxu0 %v5190_v59  ;;  %v1354_v59 = vld [vmem:[#allocation11 + $0xcd0] sm:$0xff]  ;;  %v1480_v49 = vld [vmem:[#allocation11 + $0x10c0] sm:$0xff]  ;;  %v5368_v40 = vpack.c.bf16 %v1611_v32, %v1595_v30 }
 0x3a9   :  { %5319 = vmatpush1.bf16.msra.mxu1 %v5318_v60  ;;  %5193 = vmatprep.subr.bf16.mxu0 %v5192_v62  ;;  %v1369_v60 = vld [vmem:[#allocation11 + $0xd48] sm:$0xff]  ;;  %v5226_v54 = vpack.c.bf16 %v1480_v49, %v1464_v48  ;;  %v1627_v48 = vld [vmem:[#allocation11 + $0x1558] sm:$0xff] }
 0x3aa   :  { %5321 = vmatprep.subr.bf16.mxu1 %v5320_v1  ;;  %v1385_v62 = vld [vmem:[#allocation11 + $0xdc8] sm:$0xff]  ;;  %v5338_v1 = vpack.c.bf16 %v1354_v59, %v1338_v56  ;;  %v1515_v56 = vld [vmem:[#allocation11 + $0x11d8] sm:$0xff]  ;;  %v1496_v59 = vld [vmem:[#allocation11 + $0x1140] sm:$0xff] }
 0x3ab   :  { %v5212_v2 = vpack.c.bf16 %v1385_v62, %v1369_v60  ;;  %v1512_v60 = vld [vmem:[#allocation11 + $0x11c0] sm:$0xff]  ;;  %v1498_v62 = vld [vmem:[#allocation11 + $0x1150] sm:$0xff]  ;;  %v1643_v49 = vld [vmem:[#allocation11 + $0x15d8] sm:$0xff] }
 0x3ac   :  { %5195 = vmatpush1.bf16.msra.mxu0 %v5194_v8  ;;  %v1386_v8 = vld [vmem:[#allocation11 + $0xdd0] sm:$0xff] }
 0x3ad   :  { %5323 = vmatpush1.bf16.msra.mxu1 %v5322_v9  ;;  %5197 = vmatprep.subr.bf16.mxu0 %v5196_v10  ;;  %v1401_v9 = vld [vmem:[#allocation11 + $0xe48] sm:$0xff] }
 0x3ae   :  { %5325 = vmatprep.subr.bf16.mxu1 %v5324_v14  ;;  %v1417_v10 = vld [vmem:[#allocation11 + $0xec8] sm:$0xff]  ;;  %v5342_v14 = vpack.c.bf16 %v1386_v8, %v1370_v6  ;;  %v5230_v6 = vpack.c.bf16 %v1512_v60, %v1496_v59  ;;  %v1659_v60 = vld [vmem:[#allocation11 + $0x1658] sm:$0xff] }
 0x3af   :  { %v5216_v15 = vpack.c.bf16 %v1417_v10, %v1401_v9  ;;  %v1528_v9 = vld [vmem:[#allocation11 + $0x1240] sm:$0xff]  ;;  %v1673_v59 = vld [vmem:[#allocation11 + $0x16c8] sm:$0xff] }
 0x3b0   :  { %5199 = vmatpush1.bf16.msra.mxu0 %v5198_v20  ;;  %v1418_v20 = vld [vmem:[#allocation11 + $0xed0] sm:$0xff]  ;;  %v1544_v10 = vld [vmem:[#allocation11 + $0x12c0] sm:$0xff] }
 0x3b1   :  { %5327 = vmatpush1.bf16.msra.mxu1 %v5326_v22  ;;  %5201 = vmatprep.subr.bf16.mxu0 %v5200_v23  ;;  %v1433_v22 = vld [vmem:[#allocation11 + $0xf48] sm:$0xff] }
 0x3b2   :  { %5329 = vmatprep.subr.bf16.mxu1 %v5328_v27  ;;  %v1449_v23 = vld [vmem:[#allocation11 + $0xfc8] sm:$0xff]  ;;  %v5346_v27 = vpack.c.bf16 %v1418_v20, %v1402_v18  ;;  %v5234_v18 = vpack.c.bf16 %v1544_v10, %v1528_v9 }
 0x3b3   :  { %v5220_v28 = vpack.c.bf16 %v1449_v23, %v1433_v22  ;;  %v1560_v22 = vld [vmem:[#allocation11 + $0x1340] sm:$0xff]  ;;  %v1689_v9 = vld [vmem:[#allocation11 + $0x1748] sm:$0xff] }
 0x3b4   :  { %5203 = vmatpush1.bf16.msra.mxu0 %v5202_v36  ;;  %v1450_v36 = vld [vmem:[#allocation11 + $0xfd0] sm:$0xff]  ;;  %v1576_v23 = vld [vmem:[#allocation11 + $0x13c0] sm:$0xff]  ;;  %v1705_v10 = vld [vmem:[#allocation11 + $0x17c8] sm:$0xff] }
 0x3b5   :  { %5331 = vmatpush1.bf16.msra.mxu1 %v5330_v37  ;;  %5205 = vmatprep.subr.bf16.mxu0 %v5204_v38  ;;  %v1465_v37 = vld [vmem:[#allocation11 + $0x1048] sm:$0xff]  ;;  %v5252_v17 = vpack.c.bf16 %v1705_v10, %v1689_v9  ;;  %v1835_v9 = vld [vmem:[#allocation11 + $0x1bd8] sm:$0xff] }
 0x3b6   :  { %5333 = vmatprep.subr.bf16.mxu1 %v5332_v46  ;;  %v1481_v38 = vld [vmem:[#allocation11 + $0x10c8] sm:$0xff]  ;;  %v5350_v46 = vpack.c.bf16 %v1450_v36, %v1434_v33  ;;  %v5238_v33 = vpack.c.bf16 %v1576_v23, %v1560_v22  ;;  %v1706_v23 = vld [vmem:[#allocation11 + $0x17d0] sm:$0xff] }
 0x3b7   :  { %v5224_v47 = vpack.c.bf16 %v1481_v38, %v1465_v37  ;;  %v1592_v37 = vld [vmem:[#allocation11 + $0x1440] sm:$0xff] }
 0x3b8   :  { %5207 = vmatpush1.bf16.msra.mxu0 %v5206_v43  ;;  %v1482_v43 = vld [vmem:[#allocation11 + $0x10d0] sm:$0xff]  ;;  %v1608_v38 = vld [vmem:[#allocation11 + $0x14c0] sm:$0xff] }
 0x3b9   :  { %5335 = vmatpush1.bf16.msra.mxu1 %v5334_v52  ;;  %5209 = vmatprep.subr.bf16.mxu0 %v5208_v53  ;;  %v1497_v52 = vld [vmem:[#allocation11 + $0x1148] sm:$0xff] }
 0x3ba   :  { %5337 = vmatprep.subr.bf16.mxu1 %v5336_v57  ;;  %v1513_v53 = vld [vmem:[#allocation11 + $0x11c8] sm:$0xff]  ;;  %v5354_v57 = vpack.c.bf16 %v1482_v43, %v1466_v50 }
 0x3bb   :  { %v5228_v35 = vpack.c.bf16 %v1513_v53, %v1497_v52  ;;  %v1624_v52 = vld [vmem:[#allocation11 + $0x1540] sm:$0xff] }
 0x3bc   :  { %5211 = vmatpush1.bf16.msra.mxu0 %v5210_v0  ;;  %v1529_v0 = vld [vmem:[#allocation11 + $0x1248] sm:$0xff]  ;;  %v1640_v53 = vld [vmem:[#allocation11 + $0x15c0] sm:$0xff] }
 0x3bd   :  { %5339 = vmatpush1.bf16.msra.mxu1 %v5338_v1  ;;  %5213 = vmatprep.subr.bf16.mxu0 %v5212_v2  ;;  %v1545_v1 = vld [vmem:[#allocation11 + $0x12c8] sm:$0xff]  ;;  %v5356_v2 = vpack.c.bf16 %v1515_v56, %v1499_v55  ;;  %v5372_v55 = vpack.c.bf16 %v1643_v49, %v1627_v48  ;;  %v1642_v56 = vld [vmem:[#allocation11 + $0x15d0] sm:$0xff] }
 0x3be   :  { %5341 = vmatprep.subr.bf16.mxu1 %v5340_v7  ;;  %v5358_v7 = vpack.c.bf16 %v1514_v63, %v1498_v62  ;;  %v5232_v8 = vpack.c.bf16 %v1545_v1, %v1529_v0  ;;  %v1675_v62 = vld [vmem:[#allocation11 + $0x16d8] sm:$0xff]  ;;  %v1656_v1 = vld [vmem:[#allocation11 + $0x1640] sm:$0xff] }
 0x3c0   :  { %5215 = vmatpush1.bf16.msra.mxu0 %v5214_v13  ;;  %v1546_v13 = vld [vmem:[#allocation11 + $0x12d0] sm:$0xff] }
 0x3c1   :  { %5343 = vmatpush1.bf16.msra.mxu1 %v5342_v14  ;;  %5217 = vmatprep.subr.bf16.mxu0 %v5216_v15  ;;  %v1561_v14 = vld [vmem:[#allocation11 + $0x1348] sm:$0xff] }
 0x3c2   :  { %5345 = vmatprep.subr.bf16.mxu1 %v5344_v19  ;;  %v1577_v15 = vld [vmem:[#allocation11 + $0x13c8] sm:$0xff]  ;;  %v5362_v19 = vpack.c.bf16 %v1546_v13, %v1530_v11  ;;  %v1691_v13 = vld [vmem:[#allocation11 + $0x1758] sm:$0xff] }
 0x3c3   :  { %v5236_v20 = vpack.c.bf16 %v1577_v15, %v1561_v14  ;;  %v1707_v14 = vld [vmem:[#allocation11 + $0x17d8] sm:$0xff] }
 0x3c4   :  { %5219 = vmatpush1.bf16.msra.mxu0 %v5218_v26  ;;  %v1578_v26 = vld [vmem:[#allocation11 + $0x13d0] sm:$0xff]  ;;  %v5380_v22 = vpack.c.bf16 %v1707_v14, %v1691_v13 }
 0x3c5   :  { %5347 = vmatpush1.bf16.msra.mxu1 %v5346_v27  ;;  %5221 = vmatprep.subr.bf16.mxu0 %v5220_v28  ;;  %v1593_v27 = vld [vmem:[#allocation11 + $0x1448] sm:$0xff] }
 0x3c6   :  { %5349 = vmatprep.subr.bf16.mxu1 %v5348_v34  ;;  %v1609_v28 = vld [vmem:[#allocation11 + $0x14c8] sm:$0xff]  ;;  %v5366_v34 = vpack.c.bf16 %v1578_v26, %v1562_v24  ;;  %v1723_v26 = vld [vmem:[#allocation11 + $0x1858] sm:$0xff] }
 0x3c7   :  { %v5240_v36 = vpack.c.bf16 %v1609_v28, %v1593_v27  ;;  %v1721_v24 = vld [vmem:[#allocation11 + $0x1848] sm:$0xff]  ;;  %v1739_v27 = vld [vmem:[#allocation11 + $0x18d8] sm:$0xff] }
 0x3c8   :  { %5223 = vmatpush1.bf16.msra.mxu0 %v5222_v45  ;;  %v1610_v45 = vld [vmem:[#allocation11 + $0x14d0] sm:$0xff] }
 0x3c9   :  { %5351 = vmatpush1.bf16.msra.mxu1 %v5350_v46  ;;  %5225 = vmatprep.subr.bf16.mxu0 %v5224_v47  ;;  %v1625_v46 = vld [vmem:[#allocation11 + $0x1548] sm:$0xff]  ;;  %v5370_v50 = vpack.c.bf16 %v1610_v45, %v1594_v39  ;;  %v1755_v45 = vld [vmem:[#allocation11 + $0x1958] sm:$0xff] }
 0x3ca   :  { %5353 = vmatprep.subr.bf16.mxu1 %v5352_v31  ;;  %v1641_v47 = vld [vmem:[#allocation11 + $0x15c8] sm:$0xff]  ;;  %v5242_v31 = vpack.c.bf16 %v1608_v38, %v1592_v37  ;;  %v5384_v37 = vpack.c.bf16 %v1739_v27, %v1723_v26  ;;  %v1738_v38 = vld [vmem:[#allocation11 + $0x18d0] sm:$0xff] }
 0x3cb   :  { %2685 = vmatmul.mubr.f32.vlgmr.msra.gmra.mrb[8].mxu0 %v6481_v61  ;;  %v5244_v43 = vpack.c.bf16 %v1641_v47, %v1625_v46  ;;  %v1753_v39 = vld [vmem:[#allocation11 + $0x1948] sm:$0xff]  ;;  %v1771_v46 = vld [vmem:[#allocation11 + $0x19d8] sm:$0xff] }
 0x3cc   :  { %2827 = vmatmul.mubr.f32.vlgmr.msra.gmra.mrb[8].mxu1 %v6481_v61  ;;  %5227 = vmatpush1.bf16.msra.mxu0 %v5226_v54  ;;  %v1626_v54 = vld [vmem:[#allocation11 + $0x1550] sm:$0xff] }
 0x3cd   :  { %2755 = vmatprep.mubr.f32.mxu0 %v6487_v4  ;;  %5355 = vmatpush1.bf16.msra.mxu1 %v5354_v57  ;;  %v1657_v57 = vld [vmem:[#allocation11 + $0x1648] sm:$0xff]  ;;  %v5374_v63 = vpack.c.bf16 %v1642_v56, %v1626_v54  ;;  %v1787_v56 = vld [vmem:[#allocation11 + $0x1a58] sm:$0xff] }
 0x3ce   :  { %2897 = vmatprep.mubr.f32.mxu1 %v6487_v4  ;;  %5229 = vmatprep.subr.bf16.mxu0 %v5228_v35  ;;  %v5246_v35 = vpack.c.bf16 %v1640_v53, %v1624_v52  ;;  %v5248_v0 = vpack.c.bf16 %v1673_v59, %v1657_v57  ;;  %v5388_v52 = vpack.c.bf16 %v1771_v46, %v1755_v45  ;;  %v1770_v53 = vld [vmem:[#allocation11 + $0x19d0] sm:$0xff]  ;;  %v1785_v54 = vld [vmem:[#allocation11 + $0x1a48] sm:$0xff]  ;;  %v1803_v57 = vld [vmem:[#allocation11 + $0x1ad8] sm:$0xff] }
 0x3cf   :  { %5357 = vmatprep.subr.bf16.mxu1 %v5356_v2  ;;  %v1672_v2 = vld [vmem:[#allocation11 + $0x16c0] sm:$0xff] }
 0x3d0   :  { %5231 = vmatpush1.bf16.msra.mxu0 %v5230_v6  ;;  %v5250_v15 = vpack.c.bf16 %v1672_v2, %v1656_v1  ;;  %v5392_v1 = vpack.c.bf16 %v1803_v57, %v1787_v56  ;;  %v1802_v2 = vld [vmem:[#allocation11 + $0x1ad0] sm:$0xff] }
 0x3d1   :  { %5359 = vmatpush1.bf16.msra.mxu1 %v5358_v7  ;;  %5233 = vmatprep.subr.bf16.mxu0 %v5232_v8  ;;  %v5376_v7 = vpack.c.bf16 %v1675_v62, %v1659_v60  ;;  %v1674_v8 = vld [vmem:[#allocation11 + $0x16d0] sm:$0xff] }
 0x3d2   :  { %5361 = vmatprep.subr.bf16.mxu1 %v5360_v12  ;;  %v5378_v16 = vpack.c.bf16 %v1674_v8, %v1658_v3  ;;  %v1817_v3 = vld [vmem:[#allocation11 + $0x1b48] sm:$0xff]  ;;  %v1819_v8 = vld [vmem:[#allocation11 + $0x1b58] sm:$0xff] }
 0x3d4   :  { %5235 = vmatpush1.bf16.msra.mxu0 %v5234_v18  ;;  %v1688_v18 = vld [vmem:[#allocation11 + $0x1740] sm:$0xff] }
 0x3d5   :  { %5363 = vmatpush1.bf16.msra.mxu1 %v5362_v19  ;;  %5237 = vmatprep.subr.bf16.mxu0 %v5236_v20  ;;  %v1704_v19 = vld [vmem:[#allocation11 + $0x17c0] sm:$0xff]  ;;  %v1690_v20 = vld [vmem:[#allocation11 + $0x1750] sm:$0xff] }
 0x3d6   :  { %5365 = vmatprep.subr.bf16.mxu1 %v5364_v25  ;;  %v1737_v25 = vld [vmem:[#allocation11 + $0x18c8] sm:$0xff]  ;;  %v5254_v28 = vpack.c.bf16 %v1704_v19, %v1688_v18  ;;  %v5382_v30 = vpack.c.bf16 %v1706_v23, %v1690_v20  ;;  %v5396_v18 = vpack.c.bf16 %v1835_v9, %v1819_v8  ;;  %v1834_v19 = vld [vmem:[#allocation11 + $0x1bd0] sm:$0xff]  ;;  %v1851_v23 = vld [vmem:[#allocation11 + $0x1c58] sm:$0xff] }
 0x3d7   :  { %v5256_v32 = vpack.c.bf16 %v1737_v25, %v1721_v24  ;;  %v1849_v20 = vld [vmem:[#allocation11 + $0x1c48] sm:$0xff]  ;;  %v1867_v24 = vld [vmem:[#allocation11 + $0x1cd8] sm:$0xff] }
 0x3d8   :  { %5239 = vmatpush1.bf16.msra.mxu0 %v5238_v33  ;;  %v1720_v33 = vld [vmem:[#allocation11 + $0x1840] sm:$0xff] }
 0x3d9   :  { %5367 = vmatpush1.bf16.msra.mxu1 %v5366_v34  ;;  %5241 = vmatprep.subr.bf16.mxu0 %v5240_v36  ;;  %v1736_v34 = vld [vmem:[#allocation11 + $0x18c0] sm:$0xff]  ;;  %v1722_v36 = vld [vmem:[#allocation11 + $0x1850] sm:$0xff] }
 0x3da   :  { %5369 = vmatprep.subr.bf16.mxu1 %v5368_v40  ;;  %v1769_v40 = vld [vmem:[#allocation11 + $0x19c8] sm:$0xff]  ;;  %v5258_v47 = vpack.c.bf16 %v1736_v34, %v1720_v33  ;;  %v5386_v48 = vpack.c.bf16 %v1738_v38, %v1722_v36  ;;  %v5400_v33 = vpack.c.bf16 %v1867_v24, %v1851_v23  ;;  %v1866_v34 = vld [vmem:[#allocation11 + $0x1cd0] sm:$0xff]  ;;  %v1883_v38 = vld [vmem:[#allocation11 + $0x1d58] sm:$0xff] }
 0x3db   :  { %v5260_v49 = vpack.c.bf16 %v1769_v40, %v1753_v39  ;;  %v1881_v36 = vld [vmem:[#allocation11 + $0x1d48] sm:$0xff]  ;;  %v1899_v39 = vld [vmem:[#allocation11 + $0x1dd8] sm:$0xff] }
 0x3dc   :  { %5243 = vmatpush1.bf16.msra.mxu0 %v5242_v31  ;;  %v1752_v31 = vld [vmem:[#allocation11 + $0x1940] sm:$0xff] }
 0x3dd   :  { %5371 = vmatpush1.bf16.msra.mxu1 %v5370_v50  ;;  %5245 = vmatprep.subr.bf16.mxu0 %v5244_v43  ;;  %v1768_v50 = vld [vmem:[#allocation11 + $0x19c0] sm:$0xff]  ;;  %v1754_v43 = vld [vmem:[#allocation11 + $0x1950] sm:$0xff] }
 0x3de   :  { %v6512_v5 = vpop.f32.mrb[4].mxu0  ;;  %v6514_v6 = vpop.f32.mrb[4].mxu1  ;;  %5373 = vmatprep.subr.bf16.mxu1 %v5372_v55  ;;  %v1801_v55 = vld [vmem:[#allocation11 + $0x1ac8] sm:$0xff]  ;;  %v5262_v59 = vpack.c.bf16 %v1768_v50, %v1752_v31  ;;  %v5390_v60 = vpack.c.bf16 %v1770_v53, %v1754_v43  ;;  %v5404_v31 = vpack.c.bf16 %v1899_v39, %v1883_v38  ;;  %v1898_v50 = vld [vmem:[#allocation11 + $0x1dd0] sm:$0xff]  ;;  %v1915_v53 = vld [vmem:[#allocation11 + $0x1e58] sm:$0xff] }
 0x3df   :  { %v6516_v11 = vpop.f32.mrb[5].mxu0  ;;  %v6518_v12 = vpop.f32.mrb[5].mxu1  ;;  %v5264_v62 = vpack.c.bf16 %v1801_v55, %v1785_v54  ;;  %v1913_v43 = vld [vmem:[#allocation11 + $0x1e48] sm:$0xff]  ;;  %v1931_v54 = vld [vmem:[#allocation11 + $0x1ed8] sm:$0xff]  ;;  %v988_v39 = vld [vmem:[#allocation11 + $0x160] sm:$0xff] }
 0x3e0   :  { %5247 = vmatpush1.bf16.msra.mxu0 %v5246_v35  ;;  %v1784_v35 = vld [vmem:[#allocation11 + $0x1a40] sm:$0xff] }
 0x3e1   :  { %5375 = vmatpush1.bf16.msra.mxu1 %v5374_v63  ;;  %5249 = vmatprep.subr.bf16.mxu0 %v5248_v0  ;;  %v1800_v63 = vld [vmem:[#allocation11 + $0x1ac0] sm:$0xff]  ;;  %v1786_v0 = vld [vmem:[#allocation11 + $0x1a50] sm:$0xff] }
 0x3e2   :  { %5377 = vmatprep.subr.bf16.mxu1 %v5376_v7  ;;  %v1833_v7 = vld [vmem:[#allocation11 + $0x1bc8] sm:$0xff]  ;;  %v5266_v10 = vpack.c.bf16 %v1800_v63, %v1784_v35  ;;  %v5394_v13 = vpack.c.bf16 %v1802_v2, %v1786_v0  ;;  %v5408_v35 = vpack.c.bf16 %v1931_v54, %v1915_v53  ;;  %v1930_v63 = vld [vmem:[#allocation11 + $0x1ed0] sm:$0xff]  ;;  %v1947_v2 = vld [vmem:[#allocation11 + $0x1f58] sm:$0xff] }
 0x3e3   :  { %v5268_v14 = vpack.c.bf16 %v1833_v7, %v1817_v3  ;;  %v1945_v0 = vld [vmem:[#allocation11 + $0x1f48] sm:$0xff]  ;;  %v1963_v3 = vld [vmem:[#allocation11 + $0x1fd8] sm:$0xff] }
 0x3e4   :  { %5251 = vmatpush1.bf16.msra.mxu0 %v5250_v15  ;;  %v1816_v15 = vld [vmem:[#allocation11 + $0x1b40] sm:$0xff] }
 0x3e5   :  { %5379 = vmatpush1.bf16.msra.mxu1 %v5378_v16  ;;  %5253 = vmatprep.subr.bf16.mxu0 %v5252_v17  ;;  %v1832_v16 = vld [vmem:[#allocation11 + $0x1bc0] sm:$0xff]  ;;  %v1818_v17 = vld [vmem:[#allocation11 + $0x1b50] sm:$0xff] }
 0x3e6   :  { %5381 = vmatprep.subr.bf16.mxu1 %v5380_v22  ;;  %v1865_v22 = vld [vmem:[#allocation11 + $0x1cc8] sm:$0xff]  ;;  %v5270_v25 = vpack.c.bf16 %v1832_v16, %v1816_v15  ;;  %v5398_v26 = vpack.c.bf16 %v1834_v19, %v1818_v17  ;;  %v5412_v15 = vpack.c.bf16 %v1963_v3, %v1947_v2  ;;  %v1962_v16 = vld [vmem:[#allocation11 + $0x1fd0] sm:$0xff]  ;;  %v959_v19 = vld [vmem:[#allocation11 + $0x78] sm:$0xff] }
 0x3e7   :  { %v5272_v27 = vpack.c.bf16 %v1865_v22, %v1849_v20  ;;  %v957_v17 = vld [vmem:[#allocation11 + $0x68] sm:$0xff]  ;;  %v975_v20 = vld [vmem:[#allocation11 + $0xf8] sm:$0xff] }
 0x3e8   :  { %5255 = vmatpush1.bf16.msra.mxu0 %v5254_v28  ;;  %v1848_v28 = vld [vmem:[#allocation11 + $0x1c40] sm:$0xff] }
 0x3e9   :  { %5383 = vmatpush1.bf16.msra.mxu1 %v5382_v30  ;;  %5257 = vmatprep.subr.bf16.mxu0 %v5256_v32  ;;  %v1864_v30 = vld [vmem:[#allocation11 + $0x1cc0] sm:$0xff]  ;;  %v1850_v32 = vld [vmem:[#allocation11 + $0x1c50] sm:$0xff] }
 0x3ea   :  { %5385 = vmatprep.subr.bf16.mxu1 %v5384_v37  ;;  %v1897_v37 = vld [vmem:[#allocation11 + $0x1dc8] sm:$0xff]  ;;  %v5274_v40 = vpack.c.bf16 %v1864_v30, %v1848_v28  ;;  %v5402_v45 = vpack.c.bf16 %v1866_v34, %v1850_v32  ;;  %v958_v28 = vld [vmem:[#allocation11 + $0x70] sm:$0xff] }
 0x3eb   :  { %v5276_v46 = vpack.c.bf16 %v1897_v37, %v1881_v36  ;;  %v974_v30 = vld [vmem:[#allocation11 + $0xf0] sm:$0xff]  ;;  %v989_v32 = vld [vmem:[#allocation11 + $0x168] sm:$0xff]  ;;  %v991_v36 = vld [vmem:[#allocation11 + $0x178] sm:$0xff] }
 0x3ec   :  { %5259 = vmatpush1.bf16.msra.mxu0 %v5258_v47  ;;  %v1880_v47 = vld [vmem:[#allocation11 + $0x1d40] sm:$0xff]  ;;  %v1007_v37 = vld [vmem:[#allocation11 + $0x1f8] sm:$0xff]  ;;  %v5546_v38 = vpack.c.bf16 %v974_v30, %v958_v28 }
 0x3ed   :  { %5387 = vmatpush1.bf16.msra.mxu1 %v5386_v48  ;;  %5261 = vmatprep.subr.bf16.mxu0 %v5260_v49  ;;  %v1896_v48 = vld [vmem:[#allocation11 + $0x1dc0] sm:$0xff]  ;;  %v1882_v49 = vld [vmem:[#allocation11 + $0x1d50] sm:$0xff]  ;;  %v1119_v28 = vld [vmem:[#allocation11 + $0x578] sm:$0xff] }
 0x3ee   :  { %5389 = vmatprep.subr.bf16.mxu1 %v5388_v52  ;;  %v1929_v52 = vld [vmem:[#allocation11 + $0x1ec8] sm:$0xff]  ;;  %v5278_v55 = vpack.c.bf16 %v1896_v48, %v1880_v47  ;;  %v5406_v56 = vpack.c.bf16 %v1898_v50, %v1882_v49  ;;  %v1006_v47 = vld [vmem:[#allocation11 + $0x1f0] sm:$0xff]  ;;  %v1023_v50 = vld [vmem:[#allocation11 + $0x278] sm:$0xff] }
 0x3ef   :  { %v5280_v57 = vpack.c.bf16 %v1929_v52, %v1913_v43  ;;  %v1021_v48 = vld [vmem:[#allocation11 + $0x268] sm:$0xff]  ;;  %v1039_v43 = vld [vmem:[#allocation11 + $0x2f8] sm:$0xff] }
 0x3f0   :  { %5263 = vmatpush1.bf16.msra.mxu0 %v5262_v59  ;;  %v1912_v59 = vld [vmem:[#allocation11 + $0x1e40] sm:$0xff]  ;;  %v1037_v49 = vld [vmem:[#allocation11 + $0x2e8] sm:$0xff]  ;;  %v1135_v30 = vld [vmem:[#allocation11 + $0x5f8] sm:$0xff] }
 0x3f1   :  { %5391 = vmatpush1.bf16.msra.mxu1 %v5390_v60  ;;  %5265 = vmatprep.subr.bf16.mxu0 %v5264_v62  ;;  %v1928_v60 = vld [vmem:[#allocation11 + $0x1ec0] sm:$0xff]  ;;  %v1914_v62 = vld [vmem:[#allocation11 + $0x1e50] sm:$0xff]  ;;  %v5424_v54 = vpack.c.bf16 %v1037_v49, %v1021_v48  ;;  %v1167_v48 = vld [vmem:[#allocation11 + $0x6f8] sm:$0xff] }
 0x3f2   :  { %5393 = vmatprep.subr.bf16.mxu1 %v5392_v1  ;;  %v1961_v1 = vld [vmem:[#allocation11 + $0x1fc8] sm:$0xff]  ;;  %v5282_v7 = vpack.c.bf16 %v1928_v60, %v1912_v59  ;;  %v5410_v8 = vpack.c.bf16 %v1930_v63, %v1914_v62  ;;  %v5552_v59 = vpack.c.bf16 %v1039_v43, %v1023_v50  ;;  %v1038_v60 = vld [vmem:[#allocation11 + $0x2f0] sm:$0xff]  ;;  %v1055_v63 = vld [vmem:[#allocation11 + $0x378] sm:$0xff] }
 0x3f3   :  { %v5284_v9 = vpack.c.bf16 %v1961_v1, %v1945_v0  ;;  %v1053_v62 = vld [vmem:[#allocation11 + $0x368] sm:$0xff]  ;;  %v1071_v0 = vld [vmem:[#allocation11 + $0x3f8] sm:$0xff]  ;;  %v1148_v43 = vld [vmem:[#allocation11 + $0x660] sm:$0xff] }
 0x3f4   :  { %5267 = vmatpush1.bf16.msra.mxu0 %v5266_v10  ;;  %v1944_v10 = vld [vmem:[#allocation11 + $0x1f40] sm:$0xff] }
 0x3f5   :  { %5395 = vmatpush1.bf16.msra.mxu1 %v5394_v13  ;;  %5269 = vmatprep.subr.bf16.mxu0 %v5268_v14  ;;  %v1960_v13 = vld [vmem:[#allocation11 + $0x1fc0] sm:$0xff]  ;;  %v1946_v14 = vld [vmem:[#allocation11 + $0x1f50] sm:$0xff] }
 0x3f6   :  { %5397 = vmatprep.subr.bf16.mxu1 %v5396_v18  ;;  %v973_v18 = vld [vmem:[#allocation11 + $0xe8] sm:$0xff]  ;;  %v5286_v22 = vpack.c.bf16 %v1960_v13, %v1944_v10  ;;  %v5414_v23 = vpack.c.bf16 %v1962_v16, %v1946_v14  ;;  %v5556_v10 = vpack.c.bf16 %v1071_v0, %v1055_v63  ;;  %v1103_v16 = vld [vmem:[#allocation11 + $0x4f8] sm:$0xff]  ;;  %v1180_v0 = vld [vmem:[#allocation11 + $0x760] sm:$0xff] }
 0x3f7   :  { %v5416_v24 = vpack.c.bf16 %v973_v18, %v957_v17  ;;  %v1085_v13 = vld [vmem:[#allocation11 + $0x468] sm:$0xff] }
 0x3f8   :  { %5271 = vmatpush1.bf16.msra.mxu0 %v5270_v25  ;;  %v956_v25 = vld [vmem:[#allocation11 + $0x60] sm:$0xff]  ;;  %v1101_v14 = vld [vmem:[#allocation11 + $0x4e8] sm:$0xff] }
 0x3f9   :  { %5399 = vmatpush1.bf16.msra.mxu1 %v5398_v26  ;;  %5273 = vmatprep.subr.bf16.mxu0 %v5272_v27  ;;  %v972_v26 = vld [vmem:[#allocation11 + $0xe0] sm:$0xff]  ;;  %v5544_v27 = vpack.c.bf16 %v975_v20, %v959_v19  ;;  %v5432_v19 = vpack.c.bf16 %v1101_v14, %v1085_v13 }
 0x3fa   :  { %5401 = vmatprep.subr.bf16.mxu1 %v5400_v33  ;;  %v1005_v33 = vld [vmem:[#allocation11 + $0x1e8] sm:$0xff]  ;;  %v5418_v34 = vpack.c.bf16 %v972_v26, %v956_v25  ;;  %v1084_v20 = vld [vmem:[#allocation11 + $0x460] sm:$0xff]  ;;  %v1102_v25 = vld [vmem:[#allocation11 + $0x4f0] sm:$0xff] }
 0x3fb   :  { %v1117_v26 = vld [vmem:[#allocation11 + $0x568] sm:$0xff] }
 0x3fc   :  { %5275 = vmatpush1.bf16.msra.mxu0 %v5274_v40  ;;  %v1004_v40 = vld [vmem:[#allocation11 + $0x1e0] sm:$0xff] }
 0x3fd   :  { %5403 = vmatpush1.bf16.msra.mxu1 %v5402_v45  ;;  %5277 = vmatprep.subr.bf16.mxu0 %v5276_v46  ;;  %v990_v45 = vld [vmem:[#allocation11 + $0x170] sm:$0xff]  ;;  %v5420_v46 = vpack.c.bf16 %v1005_v33, %v989_v32  ;;  %v5422_v52 = vpack.c.bf16 %v1004_v40, %v988_v39  ;;  %v5564_v39 = vpack.c.bf16 %v1135_v30, %v1119_v28  ;;  %v1244_v30 = vld [vmem:[#allocation11 + $0x960] sm:$0xff] }
 0x3fe   :  { %5405 = vmatprep.subr.bf16.mxu1 %v5404_v31  ;;  %v5548_v31 = vpack.c.bf16 %v1007_v37, %v991_v36  ;;  %v5550_v53 = vpack.c.bf16 %v1006_v47, %v990_v45  ;;  %v1116_v36 = vld [vmem:[#allocation11 + $0x560] sm:$0xff]  ;;  %v1134_v40 = vld [vmem:[#allocation11 + $0x5f0] sm:$0xff]  ;;  %v1149_v45 = vld [vmem:[#allocation11 + $0x668] sm:$0xff] }
 0x3ff   :  { %v1132_v37 = vld [vmem:[#allocation11 + $0x5e0] sm:$0xff]  ;;  %v1151_v47 = vld [vmem:[#allocation11 + $0x678] sm:$0xff] }
 0x400   :  { %5279 = vmatpush1.bf16.msra.mxu0 %v5278_v55  ;;  %v1020_v55 = vld [vmem:[#allocation11 + $0x260] sm:$0xff]  ;;  %v5438_v49 = vpack.c.bf16 %v1132_v37, %v1116_v36  ;;  %v1262_v36 = vld [vmem:[#allocation11 + $0x9f0] sm:$0xff]  ;;  %v1277_v37 = vld [vmem:[#allocation11 + $0xa68] sm:$0xff] }
 0x401   :  { %5407 = vmatpush1.bf16.msra.mxu1 %v5406_v56  ;;  %5281 = vmatprep.subr.bf16.mxu0 %v5280_v57  ;;  %v1036_v56 = vld [vmem:[#allocation11 + $0x2e0] sm:$0xff]  ;;  %v1022_v57 = vld [vmem:[#allocation11 + $0x270] sm:$0xff] }
 0x402   :  { %5409 = vmatprep.subr.bf16.mxu1 %v5408_v35  ;;  %v1069_v35 = vld [vmem:[#allocation11 + $0x3e8] sm:$0xff]  ;;  %v5426_v1 = vpack.c.bf16 %v1036_v56, %v1020_v55  ;;  %v5554_v2 = vpack.c.bf16 %v1038_v60, %v1022_v57  ;;  %v1166_v55 = vld [vmem:[#allocation11 + $0x6f0] sm:$0xff]  ;;  %v1199_v60 = vld [vmem:[#allocation11 + $0x7f8] sm:$0xff] }
 0x403   :  { %v5428_v3 = vpack.c.bf16 %v1069_v35, %v1053_v62  ;;  %v1181_v56 = vld [vmem:[#allocation11 + $0x768] sm:$0xff] }
 0x404   :  { %5283 = vmatpush1.bf16.msra.mxu0 %v5282_v7  ;;  %v1052_v7 = vld [vmem:[#allocation11 + $0x360] sm:$0xff]  ;;  %v1197_v57 = vld [vmem:[#allocation11 + $0x7e8] sm:$0xff] }
 0x405   :  { %5411 = vmatpush1.bf16.msra.mxu1 %v5410_v8  ;;  %5285 = vmatprep.subr.bf16.mxu0 %v5284_v9  ;;  %v1068_v8 = vld [vmem:[#allocation11 + $0x3e0] sm:$0xff]  ;;  %v1054_v9 = vld [vmem:[#allocation11 + $0x370] sm:$0xff]  ;;  %v5444_v63 = vpack.c.bf16 %v1197_v57, %v1181_v56 }
 0x406   :  { %5413 = vmatprep.subr.bf16.mxu1 %v5412_v15  ;;  %v1087_v15 = vld [vmem:[#allocation11 + $0x478] sm:$0xff]  ;;  %v5430_v17 = vpack.c.bf16 %v1068_v8, %v1052_v7  ;;  %v1198_v7 = vld [vmem:[#allocation11 + $0x7f0] sm:$0xff]  ;;  %v1213_v8 = vld [vmem:[#allocation11 + $0x868] sm:$0xff] }
 0x408   :  { %5287 = vmatpush1.bf16.msra.mxu0 %v5286_v22  ;;  %v1100_v22 = vld [vmem:[#allocation11 + $0x4e0] sm:$0xff] }
 0x409   :  { %5415 = vmatpush1.bf16.msra.mxu1 %v5414_v23  ;;  %5417 = vmatprep.subr.bf16.mxu0 %v5416_v24  ;;  %v1086_v23 = vld [vmem:[#allocation11 + $0x470] sm:$0xff]  ;;  %v5560_v24 = vpack.c.bf16 %v1103_v16, %v1087_v15  ;;  %v5434_v32 = vpack.c.bf16 %v1100_v22, %v1084_v20  ;;  %v1212_v16 = vld [vmem:[#allocation11 + $0x860] sm:$0xff]  ;;  %v1245_v22 = vld [vmem:[#allocation11 + $0x968] sm:$0xff] }
 0x40a   :  { %5545 = vmatprep.subr.bf16.mxu1 %v5544_v27  ;;  %v1133_v27 = vld [vmem:[#allocation11 + $0x5e8] sm:$0xff]  ;;  %v5562_v33 = vpack.c.bf16 %v1102_v25, %v1086_v23  ;;  %v1230_v20 = vld [vmem:[#allocation11 + $0x8f0] sm:$0xff]  ;;  %v1263_v25 = vld [vmem:[#allocation11 + $0x9f8] sm:$0xff] }
 0x40b   :  { %2756 = vmatmul.mubr.f32.vlgmr.msra.gmra.mrb[8].mxu0 %v6494_v29  ;;  %v1261_v23 = vld [vmem:[#allocation11 + $0x9e8] sm:$0xff] }
 0x40c   :  { %2898 = vmatmul.mubr.f32.vlgmr.msra.gmra.mrb[8].mxu1 %v6494_v29  ;;  %5419 = vmatpush1.bf16.msra.mxu0 %v5418_v34  ;;  %v5436_v34 = vpack.c.bf16 %v1133_v27, %v1117_v26  ;;  %v5452_v28 = vpack.c.bf16 %v1261_v23, %v1245_v22 }
 0x40d   :  { %2968 = vmatprep.mubr.f32.mxu0 %v6479_v58  ;;  %5547 = vmatpush1.bf16.msra.mxu1 %v5546_v38  ;;  %v1118_v38 = vld [vmem:[#allocation11 + $0x570] sm:$0xff] }
 0x40e   :  { %3110 = vmatprep.mubr.f32.mxu1 %v6479_v58  ;;  %5421 = vmatprep.subr.bf16.mxu0 %v5420_v46  ;;  %v1070_v58 = vld [vmem:[#allocation11 + $0x3f0] sm:$0xff]  ;;  %v1165_v46 = vld [vmem:[#allocation11 + $0x6e8] sm:$0xff] }
 0x40f   :  { %5549 = vmatprep.subr.bf16.mxu1 %v5548_v31  ;;  %v5558_v18 = vpack.c.bf16 %v1070_v58, %v1054_v9  ;;  %v5566_v31 = vpack.c.bf16 %v1134_v40, %v1118_v38  ;;  %v5440_v50 = vpack.c.bf16 %v1165_v46, %v1149_v45  ;;  %v1229_v9 = vld [vmem:[#allocation11 + $0x8e8] sm:$0xff]  ;;  %v1231_v58 = vld [vmem:[#allocation11 + $0x8f8] sm:$0xff] }
 0x410   :  { %5423 = vmatpush1.bf16.msra.mxu0 %v5422_v52  ;;  %v1164_v52 = vld [vmem:[#allocation11 + $0x6e0] sm:$0xff]  ;;  %v5448_v15 = vpack.c.bf16 %v1229_v9, %v1213_v8  ;;  %v1293_v38 = vld [vmem:[#allocation11 + $0xae8] sm:$0xff]  ;;  %v1295_v40 = vld [vmem:[#allocation11 + $0xaf8] sm:$0xff] }
 0x411   :  { %5551 = vmatpush1.bf16.msra.mxu1 %v5550_v53  ;;  %5425 = vmatprep.subr.bf16.mxu0 %v5424_v54  ;;  %v1150_v53 = vld [vmem:[#allocation11 + $0x670] sm:$0xff]  ;;  %v5568_v54 = vpack.c.bf16 %v1167_v48, %v1151_v47  ;;  %v5442_v62 = vpack.c.bf16 %v1164_v52, %v1148_v43  ;;  %v5456_v47 = vpack.c.bf16 %v1293_v38, %v1277_v37  ;;  %v1276_v48 = vld [vmem:[#allocation11 + $0xa60] sm:$0xff]  ;;  %v1309_v52 = vld [vmem:[#allocation11 + $0xb68] sm:$0xff] }
 0x412   :  { %5553 = vmatprep.subr.bf16.mxu1 %v5552_v59  ;;  %v1183_v59 = vld [vmem:[#allocation11 + $0x778] sm:$0xff]  ;;  %v5570_v35 = vpack.c.bf16 %v1166_v55, %v1150_v53  ;;  %v1294_v43 = vld [vmem:[#allocation11 + $0xaf0] sm:$0xff]  ;;  %v1325_v53 = vld [vmem:[#allocation11 + $0xbe8] sm:$0xff] }
 0x413   :  { %v1327_v55 = vld [vmem:[#allocation11 + $0xbf8] sm:$0xff] }
 0x414   :  { %5427 = vmatpush1.bf16.msra.mxu0 %v5426_v1  ;;  %v1196_v1 = vld [vmem:[#allocation11 + $0x7e0] sm:$0xff] }
 0x415   :  { %5555 = vmatpush1.bf16.msra.mxu1 %v5554_v2  ;;  %5429 = vmatprep.subr.bf16.mxu0 %v5428_v3  ;;  %v1182_v2 = vld [vmem:[#allocation11 + $0x770] sm:$0xff]  ;;  %v5572_v3 = vpack.c.bf16 %v1199_v60, %v1183_v59  ;;  %v5446_v13 = vpack.c.bf16 %v1196_v1, %v1180_v0  ;;  %v5460_v59 = vpack.c.bf16 %v1325_v53, %v1309_v52  ;;  %v1308_v60 = vld [vmem:[#allocation11 + $0xb60] sm:$0xff]  ;;  %v1341_v1 = vld [vmem:[#allocation11 + $0xc68] sm:$0xff] }
 0x416   :  { %5557 = vmatprep.subr.bf16.mxu1 %v5556_v10  ;;  %v1215_v10 = vld [vmem:[#allocation11 + $0x878] sm:$0xff]  ;;  %v5574_v14 = vpack.c.bf16 %v1198_v7, %v1182_v2  ;;  %v1326_v0 = vld [vmem:[#allocation11 + $0xbf0] sm:$0xff]  ;;  %v1357_v2 = vld [vmem:[#allocation11 + $0xce8] sm:$0xff] }
 0x417   :  { %v1359_v7 = vld [vmem:[#allocation11 + $0xcf8] sm:$0xff] }
 0x418   :  { %5431 = vmatpush1.bf16.msra.mxu0 %v5430_v17  ;;  %v1228_v17 = vld [vmem:[#allocation11 + $0x8e0] sm:$0xff] }
 0x419   :  { %5559 = vmatpush1.bf16.msra.mxu1 %v5558_v18  ;;  %5433 = vmatprep.subr.bf16.mxu0 %v5432_v19  ;;  %v1214_v18 = vld [vmem:[#allocation11 + $0x870] sm:$0xff]  ;;  %v5576_v19 = vpack.c.bf16 %v1231_v58, %v1215_v10  ;;  %v5450_v26 = vpack.c.bf16 %v1228_v17, %v1212_v16  ;;  %v5464_v10 = vpack.c.bf16 %v1357_v2, %v1341_v1  ;;  %v1340_v58 = vld [vmem:[#allocation11 + $0xc60] sm:$0xff]  ;;  %v1373_v17 = vld [vmem:[#allocation11 + $0xd68] sm:$0xff] }
 0x41a   :  { %5561 = vmatprep.subr.bf16.mxu1 %v5560_v24  ;;  %v1247_v24 = vld [vmem:[#allocation11 + $0x978] sm:$0xff]  ;;  %v5578_v27 = vpack.c.bf16 %v1230_v20, %v1214_v18  ;;  %v1358_v16 = vld [vmem:[#allocation11 + $0xcf0] sm:$0xff]  ;;  %v1389_v18 = vld [vmem:[#allocation11 + $0xde8] sm:$0xff] }
 0x41b   :  { %v1391_v20 = vld [vmem:[#allocation11 + $0xdf8] sm:$0xff] }
 0x41c   :  { %5435 = vmatpush1.bf16.msra.mxu0 %v5434_v32  ;;  %v1260_v32 = vld [vmem:[#allocation11 + $0x9e0] sm:$0xff] }
 0x41d   :  { %5563 = vmatpush1.bf16.msra.mxu1 %v5562_v33  ;;  %5437 = vmatprep.subr.bf16.mxu0 %v5436_v34  ;;  %v1246_v33 = vld [vmem:[#allocation11 + $0x970] sm:$0xff]  ;;  %v5580_v34 = vpack.c.bf16 %v1263_v25, %v1247_v24  ;;  %v5454_v45 = vpack.c.bf16 %v1260_v32, %v1244_v30  ;;  %v5468_v24 = vpack.c.bf16 %v1389_v18, %v1373_v17  ;;  %v1372_v25 = vld [vmem:[#allocation11 + $0xd60] sm:$0xff]  ;;  %v1405_v32 = vld [vmem:[#allocation11 + $0xe68] sm:$0xff] }
 0x41e   :  { %5565 = vmatprep.subr.bf16.mxu1 %v5564_v39  ;;  %v1279_v39 = vld [vmem:[#allocation11 + $0xa78] sm:$0xff]  ;;  %v5582_v46 = vpack.c.bf16 %v1262_v36, %v1246_v33  ;;  %v1390_v30 = vld [vmem:[#allocation11 + $0xdf0] sm:$0xff]  ;;  %v1421_v33 = vld [vmem:[#allocation11 + $0xee8] sm:$0xff] }
 0x41f   :  { %v1423_v36 = vld [vmem:[#allocation11 + $0xef8] sm:$0xff] }
 0x420   :  { %5439 = vmatpush1.bf16.msra.mxu0 %v5438_v49  ;;  %v1292_v49 = vld [vmem:[#allocation11 + $0xae0] sm:$0xff]  ;;  %v1519_v17 = vld [vmem:[#allocation11 + $0x11f8] sm:$0xff] }
 0x421   :  { %5567 = vmatpush1.bf16.msra.mxu1 %v5566_v31  ;;  %5441 = vmatprep.subr.bf16.mxu0 %v5440_v50  ;;  %v1278_v31 = vld [vmem:[#allocation11 + $0xa70] sm:$0xff]  ;;  %v5584_v50 = vpack.c.bf16 %v1295_v40, %v1279_v39  ;;  %v5458_v56 = vpack.c.bf16 %v1292_v49, %v1276_v48  ;;  %v5472_v39 = vpack.c.bf16 %v1421_v33, %v1405_v32  ;;  %v1404_v40 = vld [vmem:[#allocation11 + $0xe60] sm:$0xff]  ;;  %v1437_v49 = vld [vmem:[#allocation11 + $0xf68] sm:$0xff] }
 0x422   :  { %5569 = vmatprep.subr.bf16.mxu1 %v5568_v54  ;;  %v1311_v54 = vld [vmem:[#allocation11 + $0xb78] sm:$0xff]  ;;  %v5586_v57 = vpack.c.bf16 %v1294_v43, %v1278_v31  ;;  %v1422_v48 = vld [vmem:[#allocation11 + $0xef0] sm:$0xff]  ;;  %v1453_v31 = vld [vmem:[#allocation11 + $0xfe8] sm:$0xff] }
 0x423   :  { %v1455_v43 = vld [vmem:[#allocation11 + $0xff8] sm:$0xff] }
 0x424   :  { %5443 = vmatpush1.bf16.msra.mxu0 %v5442_v62  ;;  %v1324_v62 = vld [vmem:[#allocation11 + $0xbe0] sm:$0xff] }
 0x425   :  { %5571 = vmatpush1.bf16.msra.mxu1 %v5570_v35  ;;  %5445 = vmatprep.subr.bf16.mxu0 %v5444_v63  ;;  %v1310_v35 = vld [vmem:[#allocation11 + $0xb70] sm:$0xff]  ;;  %v5588_v63 = vpack.c.bf16 %v1327_v55, %v1311_v54  ;;  %v5462_v8 = vpack.c.bf16 %v1324_v62, %v1308_v60  ;;  %v5476_v54 = vpack.c.bf16 %v1453_v31, %v1437_v49  ;;  %v1436_v55 = vld [vmem:[#allocation11 + $0xf60] sm:$0xff]  ;;  %v1469_v62 = vld [vmem:[#allocation11 + $0x1068] sm:$0xff] }
 0x426   :  { %5573 = vmatprep.subr.bf16.mxu1 %v5572_v3  ;;  %v1343_v3 = vld [vmem:[#allocation11 + $0xc78] sm:$0xff]  ;;  %v5590_v9 = vpack.c.bf16 %v1326_v0, %v1310_v35  ;;  %v1454_v60 = vld [vmem:[#allocation11 + $0xff0] sm:$0xff]  ;;  %v1485_v35 = vld [vmem:[#allocation11 + $0x10e8] sm:$0xff] }
 0x427   :  { %v1487_v0 = vld [vmem:[#allocation11 + $0x10f8] sm:$0xff] }
 0x428   :  { %5447 = vmatpush1.bf16.msra.mxu0 %v5446_v13  ;;  %v1356_v13 = vld [vmem:[#allocation11 + $0xce0] sm:$0xff] }
 0x429   :  { %5575 = vmatpush1.bf16.msra.mxu1 %v5574_v14  ;;  %5449 = vmatprep.subr.bf16.mxu0 %v5448_v15  ;;  %v1342_v14 = vld [vmem:[#allocation11 + $0xc70] sm:$0xff]  ;;  %v5592_v15 = vpack.c.bf16 %v1359_v7, %v1343_v3  ;;  %v5466_v22 = vpack.c.bf16 %v1356_v13, %v1340_v58  ;;  %v5480_v3 = vpack.c.bf16 %v1485_v35, %v1469_v62  ;;  %v1468_v7 = vld [vmem:[#allocation11 + $0x1060] sm:$0xff]  ;;  %v1501_v13 = vld [vmem:[#allocation11 + $0x1168] sm:$0xff] }
 0x42a   :  { %5577 = vmatprep.subr.bf16.mxu1 %v5576_v19  ;;  %v1375_v19 = vld [vmem:[#allocation11 + $0xd78] sm:$0xff]  ;;  %v5594_v23 = vpack.c.bf16 %v1358_v16, %v1342_v14  ;;  %v1486_v58 = vld [vmem:[#allocation11 + $0x10f0] sm:$0xff]  ;;  %v1517_v14 = vld [vmem:[#allocation11 + $0x11e8] sm:$0xff] }
 0x42b   :  { %v1503_v16 = vld [vmem:[#allocation11 + $0x1178] sm:$0xff]  ;;  %v1596_v35 = vld [vmem:[#allocation11 + $0x1460] sm:$0xff] }
 0x42c   :  { %5451 = vmatpush1.bf16.msra.mxu0 %v5450_v26  ;;  %v1388_v26 = vld [vmem:[#allocation11 + $0xde0] sm:$0xff] }
 0x42d   :  { %5579 = vmatpush1.bf16.msra.mxu1 %v5578_v27  ;;  %5453 = vmatprep.subr.bf16.mxu0 %v5452_v28  ;;  %v1374_v27 = vld [vmem:[#allocation11 + $0xd70] sm:$0xff]  ;;  %v5596_v28 = vpack.c.bf16 %v1391_v20, %v1375_v19  ;;  %v5470_v37 = vpack.c.bf16 %v1388_v26, %v1372_v25  ;;  %v1500_v19 = vld [vmem:[#allocation11 + $0x1160] sm:$0xff]  ;;  %v1533_v25 = vld [vmem:[#allocation11 + $0x1268] sm:$0xff] }
 0x42e   :  { %5581 = vmatprep.subr.bf16.mxu1 %v5580_v34  ;;  %v1407_v34 = vld [vmem:[#allocation11 + $0xe78] sm:$0xff]  ;;  %v5598_v38 = vpack.c.bf16 %v1390_v30, %v1374_v27  ;;  %v1516_v20 = vld [vmem:[#allocation11 + $0x11e0] sm:$0xff]  ;;  %v1549_v26 = vld [vmem:[#allocation11 + $0x12e8] sm:$0xff]  ;;  %v5612_v27 = vpack.c.bf16 %v1519_v17, %v1503_v16 }
 0x42f   :  { %v1551_v30 = vld [vmem:[#allocation11 + $0x12f8] sm:$0xff]  ;;  %v5486_v32 = vpack.c.bf16 %v1516_v20, %v1500_v19  ;;  %v1630_v16 = vld [vmem:[#allocation11 + $0x1570] sm:$0xff]  ;;  %v1661_v19 = vld [vmem:[#allocation11 + $0x1668] sm:$0xff] }
 0x430   :  { %5455 = vmatpush1.bf16.msra.mxu0 %v5454_v45  ;;  %v1420_v45 = vld [vmem:[#allocation11 + $0xee0] sm:$0xff]  ;;  %v1677_v20 = vld [vmem:[#allocation11 + $0x16e8] sm:$0xff] }
 0x431   :  { %5583 = vmatpush1.bf16.msra.mxu1 %v5582_v46  ;;  %5457 = vmatprep.subr.bf16.mxu0 %v5456_v47  ;;  %v1406_v46 = vld [vmem:[#allocation11 + $0xe70] sm:$0xff]  ;;  %v5600_v47 = vpack.c.bf16 %v1423_v36, %v1407_v34  ;;  %v5474_v52 = vpack.c.bf16 %v1420_v45, %v1404_v40  ;;  %v5488_v34 = vpack.c.bf16 %v1549_v26, %v1533_v25  ;;  %v1532_v36 = vld [vmem:[#allocation11 + $0x1260] sm:$0xff]  ;;  %v1565_v45 = vld [vmem:[#allocation11 + $0x1368] sm:$0xff] }
 0x432   :  { %5585 = vmatprep.subr.bf16.mxu1 %v5584_v50  ;;  %v1439_v50 = vld [vmem:[#allocation11 + $0xf78] sm:$0xff]  ;;  %v5602_v53 = vpack.c.bf16 %v1422_v48, %v1406_v46  ;;  %v1550_v40 = vld [vmem:[#allocation11 + $0x12f0] sm:$0xff]  ;;  %v1581_v46 = vld [vmem:[#allocation11 + $0x13e8] sm:$0xff]  ;;  %v5504_v26 = vpack.c.bf16 %v1677_v20, %v1661_v19 }
 0x433   :  { %v5492_v31 = vpack.c.bf16 %v1581_v46, %v1565_v45  ;;  %v1711_v45 = vld [vmem:[#allocation11 + $0x17f8] sm:$0xff] }
 0x434   :  { %5459 = vmatpush1.bf16.msra.mxu0 %v5458_v56  ;;  %v1452_v56 = vld [vmem:[#allocation11 + $0xfe0] sm:$0xff]  ;;  %v1791_v19 = vld [vmem:[#allocation11 + $0x1a78] sm:$0xff] }
 0x435   :  { %5587 = vmatpush1.bf16.msra.mxu1 %v5586_v57  ;;  %5461 = vmatprep.subr.bf16.mxu0 %v5460_v59  ;;  %v1438_v57 = vld [vmem:[#allocation11 + $0xf70] sm:$0xff]  ;;  %v5604_v59 = vpack.c.bf16 %v1455_v43, %v1439_v50  ;;  %v5478_v1 = vpack.c.bf16 %v1452_v56, %v1436_v55  ;;  %v1564_v50 = vld [vmem:[#allocation11 + $0x1360] sm:$0xff]  ;;  %v1613_v55 = vld [vmem:[#allocation11 + $0x14e8] sm:$0xff] }
 0x436   :  { %5589 = vmatprep.subr.bf16.mxu1 %v5588_v63  ;;  %v1471_v63 = vld [vmem:[#allocation11 + $0x1078] sm:$0xff]  ;;  %v5606_v2 = vpack.c.bf16 %v1454_v60, %v1438_v57  ;;  %v1580_v43 = vld [vmem:[#allocation11 + $0x13e0] sm:$0xff] }
 0x437   :  { %v1599_v56 = vld [vmem:[#allocation11 + $0x1478] sm:$0xff] }
 0x438   :  { %5463 = vmatpush1.bf16.msra.mxu0 %v5462_v8  ;;  %v1484_v8 = vld [vmem:[#allocation11 + $0x10e0] sm:$0xff]  ;;  %v1615_v57 = vld [vmem:[#allocation11 + $0x14f8] sm:$0xff] }
 0x439   :  { %5591 = vmatpush1.bf16.msra.mxu1 %v5590_v9  ;;  %5465 = vmatprep.subr.bf16.mxu0 %v5464_v10  ;;  %v5608_v9 = vpack.c.bf16 %v1487_v0, %v1471_v63  ;;  %v1470_v10 = vld [vmem:[#allocation11 + $0x1070] sm:$0xff]  ;;  %v1612_v63 = vld [vmem:[#allocation11 + $0x14e0] sm:$0xff]  ;;  %v1807_v20 = vld [vmem:[#allocation11 + $0x1af8] sm:$0xff] }
 0x43a   :  { %5593 = vmatprep.subr.bf16.mxu1 %v5592_v15  ;;  %v5482_v15 = vpack.c.bf16 %v1484_v8, %v1468_v7  ;;  %v5610_v18 = vpack.c.bf16 %v1486_v58, %v1470_v10  ;;  %v1598_v0 = vld [vmem:[#allocation11 + $0x1470] sm:$0xff]  ;;  %v1645_v7 = vld [vmem:[#allocation11 + $0x15e8] sm:$0xff]  ;;  %v1631_v8 = vld [vmem:[#allocation11 + $0x1578] sm:$0xff]  ;;  %v5498_v10 = vpack.c.bf16 %v1612_v63, %v1596_v35 }
 0x43b   :  { %v1726_v35 = vld [vmem:[#allocation11 + $0x1870] sm:$0xff] }
 0x43c   :  { %5467 = vmatpush1.bf16.msra.mxu0 %v5466_v22  ;;  %v1502_v22 = vld [vmem:[#allocation11 + $0x1170] sm:$0xff] }
 0x43d   :  { %5595 = vmatpush1.bf16.msra.mxu1 %v5594_v23  ;;  %5469 = vmatprep.subr.bf16.mxu0 %v5468_v24  ;;  %v5484_v23 = vpack.c.bf16 %v1517_v14, %v1501_v13  ;;  %v1518_v24 = vld [vmem:[#allocation11 + $0x11f0] sm:$0xff]  ;;  %v1628_v14 = vld [vmem:[#allocation11 + $0x1560] sm:$0xff] }
 0x43e   :  { %5597 = vmatprep.subr.bf16.mxu1 %v5596_v28  ;;  %v1535_v28 = vld [vmem:[#allocation11 + $0x1278] sm:$0xff]  ;;  %v5614_v33 = vpack.c.bf16 %v1518_v24, %v1502_v22 }
 0x43f   :  { %v1663_v22 = vld [vmem:[#allocation11 + $0x1678] sm:$0xff] }
 0x440   :  { %5471 = vmatpush1.bf16.msra.mxu0 %v5470_v37  ;;  %v1548_v37 = vld [vmem:[#allocation11 + $0x12e0] sm:$0xff] }
 0x441   :  { %5599 = vmatpush1.bf16.msra.mxu1 %v5598_v38  ;;  %5473 = vmatprep.subr.bf16.mxu0 %v5472_v39  ;;  %v1534_v38 = vld [vmem:[#allocation11 + $0x1270] sm:$0xff]  ;;  %v5616_v39 = vpack.c.bf16 %v1551_v30, %v1535_v28  ;;  %v5490_v48 = vpack.c.bf16 %v1548_v37, %v1532_v36  ;;  %v1676_v28 = vld [vmem:[#allocation11 + $0x16e0] sm:$0xff]  ;;  %v1693_v36 = vld [vmem:[#allocation11 + $0x1768] sm:$0xff] }
 0x442   :  { %5601 = vmatprep.subr.bf16.mxu1 %v5600_v47  ;;  %v1567_v47 = vld [vmem:[#allocation11 + $0x1378] sm:$0xff]  ;;  %v5618_v49 = vpack.c.bf16 %v1550_v40, %v1534_v38  ;;  %v1662_v30 = vld [vmem:[#allocation11 + $0x1670] sm:$0xff]  ;;  %v1709_v37 = vld [vmem:[#allocation11 + $0x17e8] sm:$0xff] }
 0x443   :  { %v1695_v40 = vld [vmem:[#allocation11 + $0x1778] sm:$0xff] }
 0x444   :  { %5475 = vmatpush1.bf16.msra.mxu0 %v5474_v52  ;;  %v1566_v52 = vld [vmem:[#allocation11 + $0x1370] sm:$0xff] }
 0x445   :  { %5603 = vmatpush1.bf16.msra.mxu1 %v5602_v53  ;;  %5477 = vmatprep.subr.bf16.mxu0 %v5476_v54  ;;  %v1597_v54 = vld [vmem:[#allocation11 + $0x1468] sm:$0xff] }
 0x446   :  { %5605 = vmatprep.subr.bf16.mxu1 %v5604_v59  ;;  %v5494_v59 = vpack.c.bf16 %v1580_v43, %v1564_v50  ;;  %v5496_v62 = vpack.c.bf16 %v1613_v55, %v1597_v54  ;;  %v1694_v50 = vld [vmem:[#allocation11 + $0x1770] sm:$0xff]  ;;  %v5636_v43 = vpack.c.bf16 %v1711_v45, %v1695_v40  ;;  %v1727_v54 = vld [vmem:[#allocation11 + $0x1878] sm:$0xff] }
 0x447   :  { %v1743_v55 = vld [vmem:[#allocation11 + $0x18f8] sm:$0xff] }
 0x448   :  { %5479 = vmatpush1.bf16.msra.mxu0 %v5478_v1  ;;  %v5624_v1 = vpack.c.bf16 %v1615_v57, %v1599_v56  ;;  %v5640_v63 = vpack.c.bf16 %v1743_v55, %v1727_v54 }
 0x449   :  { %5607 = vmatpush1.bf16.msra.mxu1 %v5606_v2  ;;  %5481 = vmatprep.subr.bf16.mxu0 %v5480_v3  ;;  %v1614_v2 = vld [vmem:[#allocation11 + $0x14f0] sm:$0xff]  ;;  %v1629_v3 = vld [vmem:[#allocation11 + $0x1568] sm:$0xff] }
 0x44a   :  { %5609 = vmatprep.subr.bf16.mxu1 %v5608_v9  ;;  %v1647_v9 = vld [vmem:[#allocation11 + $0x15f8] sm:$0xff]  ;;  %v5626_v58 = vpack.c.bf16 %v1614_v2, %v1598_v0  ;;  %v5500_v13 = vpack.c.bf16 %v1645_v7, %v1629_v3  ;;  %v1742_v0 = vld [vmem:[#allocation11 + $0x18f0] sm:$0xff]  ;;  %v1773_v2 = vld [vmem:[#allocation11 + $0x19e8] sm:$0xff] }
 0x44b   :  { %2969 = vmatmul.mubr.f32.vlgmr.msra.gmra.mrb[10].mxu0 %v6481_v61  ;;  %v5628_v17 = vpack.c.bf16 %v1647_v9, %v1631_v8  ;;  %v1759_v3 = vld [vmem:[#allocation11 + $0x1978] sm:$0xff]  ;;  %v5642_v9 = vpack.c.bf16 %v1742_v0, %v1726_v35  ;;  %v1870_v35 = vld [vmem:[#allocation11 + $0x1cf0] sm:$0xff]  ;;  %v1901_v0 = vld [vmem:[#allocation11 + $0x1de8] sm:$0xff] }
 0x44c   :  { %3111 = vmatmul.mubr.f32.vlgmr.msra.gmra.mrb[10].mxu1 %v6481_v61  ;;  %5483 = vmatpush1.bf16.msra.mxu0 %v5482_v15  ;;  %v1583_v61 = vld [vmem:[#allocation11 + $0x13f8] sm:$0xff]  ;;  %v1644_v15 = vld [vmem:[#allocation11 + $0x15e0] sm:$0xff] }
 0x44d   :  { %3039 = vmatprep.mubr.f32.mxu0 %v6487_v4  ;;  %5611 = vmatpush1.bf16.msra.mxu1 %v5610_v18  ;;  %v5620_v53 = vpack.c.bf16 %v1583_v61, %v1567_v47  ;;  %v1646_v18 = vld [vmem:[#allocation11 + $0x15f0] sm:$0xff]  ;;  %v5502_v24 = vpack.c.bf16 %v1644_v15, %v1628_v14  ;;  %v1775_v7 = vld [vmem:[#allocation11 + $0x19f8] sm:$0xff] }
 0x44e   :  { %3181 = vmatprep.mubr.f32.mxu1 %v6487_v4  ;;  %5485 = vmatprep.subr.bf16.mxu0 %v5484_v23  ;;  %v1582_v4 = vld [vmem:[#allocation11 + $0x13f0] sm:$0xff]  ;;  %v1679_v23 = vld [vmem:[#allocation11 + $0x16f8] sm:$0xff]  ;;  %v5630_v25 = vpack.c.bf16 %v1646_v18, %v1630_v16  ;;  %v5644_v15 = vpack.c.bf16 %v1775_v7, %v1759_v3  ;;  %v1805_v18 = vld [vmem:[#allocation11 + $0x1ae8] sm:$0xff] }
 0x44f   :  { %5613 = vmatprep.subr.bf16.mxu1 %v5612_v27  ;;  %v5622_v60 = vpack.c.bf16 %v1582_v4, %v1566_v52  ;;  %v1660_v27 = vld [vmem:[#allocation11 + $0x1660] sm:$0xff]  ;;  %v1710_v52 = vld [vmem:[#allocation11 + $0x17f0] sm:$0xff]  ;;  %v1741_v4 = vld [vmem:[#allocation11 + $0x18e8] sm:$0xff] }
 0x450   :  { %5487 = vmatpush1.bf16.msra.mxu0 %v5486_v32  ;;  %v5506_v47 = vpack.c.bf16 %v1676_v28, %v1660_v27  ;;  %v5638_v57 = vpack.c.bf16 %v1710_v52, %v1694_v50  ;;  %v1758_v14 = vld [vmem:[#allocation11 + $0x1970] sm:$0xff]  ;;  %v5648_v28 = vpack.c.bf16 %v1807_v20, %v1791_v19  ;;  %v1869_v52 = vld [vmem:[#allocation11 + $0x1ce8] sm:$0xff]  ;;  %v1903_v3 = vld [vmem:[#allocation11 + $0x1df8] sm:$0xff] }
 0x451   :  { %5615 = vmatpush1.bf16.msra.mxu1 %v5614_v33  ;;  %5489 = vmatprep.subr.bf16.mxu0 %v5488_v34  ;;  %v5632_v33 = vpack.c.bf16 %v1679_v23, %v1663_v22  ;;  %v1678_v34 = vld [vmem:[#allocation11 + $0x16f0] sm:$0xff]  ;;  %v1919_v20 = vld [vmem:[#allocation11 + $0x1e78] sm:$0xff] }
 0x452   :  { %5617 = vmatprep.subr.bf16.mxu1 %v5616_v39  ;;  %v5634_v61 = vpack.c.bf16 %v1678_v34, %v1662_v30  ;;  %v1774_v16 = vld [vmem:[#allocation11 + $0x19f0] sm:$0xff]  ;;  %v1837_v34 = vld [vmem:[#allocation11 + $0x1be8] sm:$0xff] }
 0x453   :  { %v5646_v23 = vpack.c.bf16 %v1774_v16, %v1758_v14  ;;  %v1790_v27 = vld [vmem:[#allocation11 + $0x1a70] sm:$0xff] }
 0x454   :  { %5491 = vmatpush1.bf16.msra.mxu0 %v5490_v48  ;;  %v5508_v48 = vpack.c.bf16 %v1709_v37, %v1693_v36  ;;  %v1806_v30 = vld [vmem:[#allocation11 + $0x1af0] sm:$0xff]  ;;  %v1823_v36 = vld [vmem:[#allocation11 + $0x1b78] sm:$0xff] }
 0x455   :  { %5619 = vmatpush1.bf16.msra.mxu1 %v5618_v49  ;;  %5493 = vmatprep.subr.bf16.mxu0 %v5492_v31  ;;  %v1692_v49 = vld [vmem:[#allocation11 + $0x1760] sm:$0xff]  ;;  %v1839_v37 = vld [vmem:[#allocation11 + $0x1bf8] sm:$0xff]  ;;  %v5650_v45 = vpack.c.bf16 %v1806_v30, %v1790_v27  ;;  %v1838_v50 = vld [vmem:[#allocation11 + $0x1bf0] sm:$0xff] }
 0x456   :  { %5621 = vmatprep.subr.bf16.mxu1 %v5620_v53  ;;  %v1708_v31 = vld [vmem:[#allocation11 + $0x17e0] sm:$0xff]  ;;  %v1725_v53 = vld [vmem:[#allocation11 + $0x1868] sm:$0xff]  ;;  %v1902_v16 = vld [vmem:[#allocation11 + $0x1df0] sm:$0xff] }
 0x457   :  { %v5510_v56 = vpack.c.bf16 %v1708_v31, %v1692_v49  ;;  %v1822_v49 = vld [vmem:[#allocation11 + $0x1b70] sm:$0xff]  ;;  %v5652_v31 = vpack.c.bf16 %v1839_v37, %v1823_v36  ;;  %v1932_v27 = vld [vmem:[#allocation11 + $0x1ee0] sm:$0xff]  ;;  %v1949_v36 = vld [vmem:[#allocation11 + $0x1f68] sm:$0xff] }
 0x458   :  { %5495 = vmatpush1.bf16.msra.mxu0 %v5494_v59  ;;  %v5512_v59 = vpack.c.bf16 %v1741_v4, %v1725_v53  ;;  %v1855_v53 = vld [vmem:[#allocation11 + $0x1c78] sm:$0xff]  ;;  %v5654_v55 = vpack.c.bf16 %v1838_v50, %v1822_v49  ;;  %v1965_v37 = vld [vmem:[#allocation11 + $0x1fe8] sm:$0xff]  ;;  %v1964_v50 = vld [vmem:[#allocation11 + $0x1fe0] sm:$0xff] }
 0x459   :  { %5623 = vmatpush1.bf16.msra.mxu1 %v5622_v60  ;;  %5497 = vmatprep.subr.bf16.mxu0 %v5496_v62  ;;  %v1724_v60 = vld [vmem:[#allocation11 + $0x1860] sm:$0xff]  ;;  %v1871_v4 = vld [vmem:[#allocation11 + $0x1cf8] sm:$0xff]  ;;  %v5540_v49 = vpack.c.bf16 %v1965_v37, %v1949_v36  ;;  %v3227_v37 = vld [vmem:[#allocation14 + $0xb8] sm:$0xff] }
 0x45a   :  { %5625 = vmatprep.subr.bf16.mxu1 %v5624_v1  ;;  %v1740_v62 = vld [vmem:[#allocation11 + $0x18e0] sm:$0xff]  ;;  %v1757_v1 = vld [vmem:[#allocation11 + $0x1968] sm:$0xff] }
 0x45b   :  { %v5514_v8 = vpack.c.bf16 %v1740_v62, %v1724_v60  ;;  %v1854_v60 = vld [vmem:[#allocation11 + $0x1c70] sm:$0xff]  ;;  %v5656_v62 = vpack.c.bf16 %v1871_v4, %v1855_v53  ;;  %v3221_v4 = vld [vmem:[#allocation14 + $0x88] sm:$0xff]  ;;  %v3226_v36 = vld [vmem:[#allocation14 + $0xb0] sm:$0xff] }
 0x45c   :  { %5499 = vmatpush1.bf16.msra.mxu0 %v5498_v10  ;;  %v5516_v10 = vpack.c.bf16 %v1773_v2, %v1757_v1  ;;  %v6536_v1 = vld [vmem:[#allocation13] sm:$0xff]  ;;  %v1887_v2 = vld [vmem:[#allocation11 + $0x1d78] sm:$0xff]  ;;  %v3220_v53 = vld [vmem:[#allocation14 + $0x80] sm:$0xff] }
 0x45d   :  { %5627 = vmatpush1.bf16.msra.mxu1 %v5626_v58  ;;  %5501 = vmatprep.subr.bf16.mxu0 %v5500_v13  ;;  %v1756_v58 = vld [vmem:[#allocation11 + $0x1960] sm:$0xff]  ;;  %v1979_v14 = vrot.slane %v6536_v1, %v6450_v44  ;;  %v1987_v19 = vrot.slane %v6536_v1, %v6457_v51 }
 0x45e   :  { %v6528_v32 = vpop.f32.mrb[6].mxu0  ;;  %5629 = vmatprep.subr.bf16.mxu1 %v5628_v17  ;;  %v1772_v13 = vld [vmem:[#allocation11 + $0x19e0] sm:$0xff]  ;;  %v1789_v17 = vld [vmem:[#allocation11 + $0x1a68] sm:$0xff] }
 0x45f   :  { %v6530_v38 = vpop.f32.mrb[6].mxu1  ;;  %v6532_v39 = vpop.f32.mrb[7].mxu0  ;;  %v5518_v22 = vpack.c.bf16 %v1772_v13, %v1756_v58  ;;  %v1900_v58 = vld [vmem:[#allocation11 + $0x1de0] sm:$0xff]  ;;  %v1886_v13 = vld [vmem:[#allocation11 + $0x1d70] sm:$0xff]  ;;  %v5933_v30 = vadd.f32 %v6516_v11, %v1979_v14 }
 0x460   :  { %v6534_v46 = vpop.f32.mrb[7].mxu1  ;;  %5503 = vmatpush1.bf16.msra.mxu0 %v5502_v24  ;;  %v5520_v24 = vpack.c.bf16 %v1805_v18, %v1789_v17  ;;  %v1917_v17 = vld [vmem:[#allocation11 + $0x1e68] sm:$0xff] }
 0x461   :  { %5631 = vmatpush1.bf16.msra.mxu1 %v5630_v25  ;;  %5505 = vmatprep.subr.bf16.mxu0 %v5504_v26  ;;  %v1788_v25 = vld [vmem:[#allocation11 + $0x1a60] sm:$0xff]  ;;  %v1933_v18 = vld [vmem:[#allocation11 + $0x1ee8] sm:$0xff]  ;;  %6000 = vtanh.f32 %v5933_v30  ;;  %v3240_v30 = vld [vmem:[#allocation14 + $0x120] sm:$0xff] }
 0x462   :  { %5633 = vmatprep.subr.bf16.mxu1 %v5632_v33  ;;  %v1804_v26 = vld [vmem:[#allocation11 + $0x1ae0] sm:$0xff]  ;;  %v1821_v33 = vld [vmem:[#allocation11 + $0x1b68] sm:$0xff] }
 0x463   :  { %v5522_v40 = vpack.c.bf16 %v1804_v26, %v1788_v25  ;;  %v5536_v25 = vpack.c.bf16 %v1933_v18, %v1917_v17  ;;  %v1916_v26 = vld [vmem:[#allocation11 + $0x1e60] sm:$0xff]  ;;  %v3225_v17 = vld [vmem:[#allocation14 + $0xa8] sm:$0xff] }
 0x464   :  { %5507 = vmatpush1.bf16.msra.mxu0 %v5506_v47  ;;  %v5524_v47 = vpack.c.bf16 %v1837_v34, %v1821_v33  ;;  %v1934_v34 = vld [vmem:[#allocation11 + $0x1ef0] sm:$0xff] }
 0x465   :  { %5635 = vmatpush1.bf16.msra.mxu1 %v5634_v61  ;;  %5509 = vmatprep.subr.bf16.mxu0 %v5508_v48  ;;  %v1820_v61 = vld [vmem:[#allocation11 + $0x1b60] sm:$0xff] }
 0x466   :  { %5637 = vmatprep.subr.bf16.mxu1 %v5636_v43  ;;  %v1836_v48 = vld [vmem:[#allocation11 + $0x1be0] sm:$0xff]  ;;  %v1853_v43 = vld [vmem:[#allocation11 + $0x1c68] sm:$0xff] }
 0x467   :  { %v5526_v54 = vpack.c.bf16 %v1836_v48, %v1820_v61  ;;  %v5538_v61 = vpack.c.bf16 %v1932_v27, %v1916_v26  ;;  %v3208_v27 = vld [vmem:[#allocation14 + $0x20] sm:$0xff] }
 0x468   :  { %5511 = vmatpush1.bf16.msra.mxu0 %v5510_v56  ;;  %v5528_v56 = vpack.c.bf16 %v1869_v52, %v1853_v43  ;;  %v1950_v43 = vld [vmem:[#allocation11 + $0x1f70] sm:$0xff] }
 0x469   :  { %5639 = vmatpush1.bf16.msra.mxu1 %v5638_v57  ;;  %5513 = vmatprep.subr.bf16.mxu0 %v5512_v59  ;;  %v1852_v57 = vld [vmem:[#allocation11 + $0x1c60] sm:$0xff]  ;;  %v1966_v52 = vld [vmem:[#allocation11 + $0x1ff0] sm:$0xff] }
 0x46a   :  { %5641 = vmatprep.subr.bf16.mxu1 %v5640_v63  ;;  %v1868_v59 = vld [vmem:[#allocation11 + $0x1ce0] sm:$0xff]  ;;  %v1885_v63 = vld [vmem:[#allocation11 + $0x1d68] sm:$0xff] }
 0x46b   :  { %v5530_v7 = vpack.c.bf16 %v1868_v59, %v1852_v57  ;;  %v5672_v57 = vpack.c.bf16 %v3221_v4, %v3220_v53  ;;  %v3204_v59 = vld [vmem:[#allocation14] sm:$0xff]  ;;  %v3261_v4 = vld [vmem:[#allocation14 + $0x1c8] sm:$0xff] }
 0x46c   :  { %5515 = vmatpush1.bf16.msra.mxu0 %v5514_v8  ;;  %v5658_v8 = vpack.c.bf16 %v1870_v35, %v1854_v60  ;;  %v3205_v60 = vld [vmem:[#allocation14 + $0x8] sm:$0xff]  ;;  %v3236_v35 = vld [vmem:[#allocation14 + $0x100] sm:$0xff] }
 0x46d   :  { %5643 = vmatpush1.bf16.msra.mxu1 %v5642_v9  ;;  %5517 = vmatprep.subr.bf16.mxu0 %v5516_v10  ;;  %v5532_v9 = vpack.c.bf16 %v1901_v0, %v1885_v63  ;;  %v1884_v10 = vld [vmem:[#allocation11 + $0x1d60] sm:$0xff]  ;;  %v3237_v63 = vld [vmem:[#allocation14 + $0x108] sm:$0xff]  ;;  %v3260_v53 = vld [vmem:[#allocation14 + $0x1c0] sm:$0xff] }
 0x46e   :  { %5645 = vmatprep.subr.bf16.mxu1 %v5644_v15  ;;  %v5660_v15 = vpack.c.bf16 %v1903_v3, %v1887_v2  ;;  %v3222_v0 = vld [vmem:[#allocation14 + $0x90] sm:$0xff]  ;;  %v3223_v2 = vld [vmem:[#allocation14 + $0x98] sm:$0xff]  ;;  %v5674_v3 = vpack.c.bf16 %v3205_v60, %v3204_v59  ;;  %v3244_v59 = vld [vmem:[#allocation14 + $0x140] sm:$0xff]  ;;  %v1994_v60 = vsub.s32 5, %v6442_v41 }
 0x46f   :  { %v5676_v14 = vpack.c.bf16 %v3223_v2, %v3222_v0  ;;  %v3231_v0 = vld [vmem:[#allocation14 + $0xd8] sm:$0xff]  ;;  %v2002_v2 = vsub.s32 7, %v6442_v41 }
 0x470   :  { %5519 = vmatpush1.bf16.msra.mxu0 %v5518_v22  ;;  %v1935_v22 = vld [vmem:[#allocation11 + $0x1ef8] sm:$0xff] }
 0x471   :  { %5647 = vmatpush1.bf16.msra.mxu1 %v5646_v23  ;;  %5521 = vmatprep.subr.bf16.mxu0 %v5520_v24  ;;  %v5534_v23 = vpack.c.bf16 %v1900_v58, %v1884_v10  ;;  %v5662_v24 = vpack.c.bf16 %v1902_v16, %v1886_v13  ;;  %v5664_v33 = vpack.c.bf16 %v1935_v22, %v1919_v20  ;;  %v3206_v10 = vld [vmem:[#allocation14 + $0x10] sm:$0xff]  ;;  %v3207_v58 = vld [vmem:[#allocation14 + $0x18] sm:$0xff]  ;;  %v3224_v16 = vld [vmem:[#allocation14 + $0xa0] sm:$0xff]  ;;  %v6001_v22 = vpop.eup %6000 }
 0x472   :  { %5649 = vmatprep.subr.bf16.mxu1 %v5648_v28  ;;  %v1918_v28 = vld [vmem:[#allocation11 + $0x1e70] sm:$0xff]  ;;  %v3238_v13 = vld [vmem:[#allocation14 + $0x110] sm:$0xff]  ;;  %v3257_v20 = vld [vmem:[#allocation14 + $0x1a8] sm:$0xff]  ;;  %v5680_v26 = vpack.c.bf16 %v3225_v17, %v3224_v16  ;;  %v1995_v17 = vrot.slane %v6536_v1, %v1994_v60 }
 0x473   :  { %v5666_v48 = vpack.c.bf16 %v1934_v34, %v1918_v28  ;;  %v3209_v28 = vld [vmem:[#allocation14 + $0x28] sm:$0xff]  ;;  %v3246_v16 = vld [vmem:[#allocation14 + $0x150] sm:$0xff] }
 0x474   :  { %5523 = vmatpush1.bf16.msra.mxu0 %v5522_v40  ;;  %v5935_v40 = vadd.f32 %v6518_v12, %v1987_v19  ;;  %v3253_v12 = vld [vmem:[#allocation14 + $0x188] sm:$0xff]  ;;  %v3256_v19 = vld [vmem:[#allocation14 + $0x1a0] sm:$0xff] }
 0x475   :  { %5651 = vmatpush1.bf16.msra.mxu1 %v5650_v45  ;;  %5525 = vmatprep.subr.bf16.mxu0 %v5524_v47  ;;  %v1951_v45 = vld [vmem:[#allocation11 + $0x1f78] sm:$0xff] }
 0x476   :  { %5653 = vmatprep.subr.bf16.mxu1 %v5652_v31  ;;  %v1967_v47 = vld [vmem:[#allocation11 + $0x1ff8] sm:$0xff]  ;;  %v1948_v31 = vld [vmem:[#allocation11 + $0x1f60] sm:$0xff]  ;;  %6002 = vtanh.f32 %v5935_v40 }
 0x477   :  { %v5668_v11 = vpack.c.bf16 %v1967_v47, %v1951_v45  ;;  %v3241_v34 = vld [vmem:[#allocation14 + $0x128] sm:$0xff]  ;;  %v3258_v40 = vld [vmem:[#allocation14 + $0x1b0] sm:$0xff]  ;;  %v3259_v45 = vld [vmem:[#allocation14 + $0x1b8] sm:$0xff] }
 0x478   :  { %5527 = vmatpush1.bf16.msra.mxu0 %v5526_v54  ;;  %v3252_v54 = vld [vmem:[#allocation14 + $0x180] sm:$0xff]  ;;  %v5714_v47 = vpack.c.bf16 %v3241_v34, %v3240_v30 }
 0x479   :  { %5655 = vmatpush1.bf16.msra.mxu1 %v5654_v55  ;;  %5529 = vmatprep.subr.bf16.mxu0 %v5528_v56  ;;  %v5542_v55 = vpack.c.bf16 %v1964_v50, %v1948_v31  ;;  %v5670_v56 = vpack.c.bf16 %v1966_v52, %v1950_v43  ;;  %v3242_v31 = vld [vmem:[#allocation14 + $0x130] sm:$0xff]  ;;  %v5716_v50 = vpack.c.bf16 %v3259_v45, %v3258_v40  ;;  %v3243_v43 = vld [vmem:[#allocation14 + $0x138] sm:$0xff]  ;;  %v3229_v52 = vld [vmem:[#allocation14 + $0xc8] sm:$0xff] }
 0x47a   :  { %5657 = vmatprep.subr.bf16.mxu1 %v5656_v62  ;;  %v5704_v62 = vpack.c.bf16 %v3253_v12, %v3252_v54  ;;  %v5718_v12 = vpack.c.bf16 %v3243_v43, %v3242_v31  ;;  %v3216_v34 = vld [vmem:[#allocation14 + $0x60] sm:$0xff]  ;;  %v5937_v40 = vadd.f32 %v6532_v39, %v1995_v17  ;;  %v3218_v43 = vld [vmem:[#allocation14 + $0x70] sm:$0xff] }
 0x47b   :  { %v3250_v39 = vld [vmem:[#allocation14 + $0x170] sm:$0xff] }
 0x47c   :  { %5531 = vmatpush1.bf16.msra.mxu0 %v5530_v7  ;;  %v3254_v7 = vld [vmem:[#allocation14 + $0x190] sm:$0xff] }
 0x47d   :  { %5659 = vmatpush1.bf16.msra.mxu1 %v5658_v8  ;;  %5533 = vmatprep.subr.bf16.mxu0 %v5532_v9  ;;  %v3255_v8 = vld [vmem:[#allocation14 + $0x198] sm:$0xff]  ;;  %v5706_v9 = vpack.c.bf16 %v3237_v63, %v3236_v35  ;;  %v3245_v35 = vld [vmem:[#allocation14 + $0x148] sm:$0xff]  ;;  %v3230_v63 = vld [vmem:[#allocation14 + $0xd0] sm:$0xff] }
 0x47e   :  { %5661 = vmatprep.subr.bf16.mxu1 %v5660_v15  ;;  %v3239_v15 = vld [vmem:[#allocation14 + $0x118] sm:$0xff]  ;;  %v5708_v18 = vpack.c.bf16 %v3255_v8, %v3254_v7  ;;  %v1975_v8 = vrot.slane %v6536_v1, %v6445_v42 }
 0x47f   :  { %v3263_v7 = vld [vmem:[#allocation14 + $0x1d8] sm:$0xff] }
 0x480   :  { %5535 = vmatpush1.bf16.msra.mxu0 %v5534_v23  ;;  %v5678_v23 = vpack.c.bf16 %v3207_v58, %v3206_v10  ;;  %v1983_v10 = vrot.slane %v6536_v1, %v6464_v21  ;;  %v5722_v58 = vpack.c.bf16 %v3245_v35, %v3244_v59  ;;  %v3268_v59 = vld [vmem:[#allocation14 + $0x200] sm:$0xff] }
 0x481   :  { %5663 = vmatpush1.bf16.msra.mxu1 %v5662_v24  ;;  %5537 = vmatprep.subr.bf16.mxu0 %v5536_v25  ;;  %v6003_v24 = vpop.eup %6002  ;;  %v5710_v25 = vpack.c.bf16 %v3239_v15, %v3238_v13  ;;  %v5692_v13 = vpack.c.bf16 %v3231_v0, %v3230_v63  ;;  %v3215_v15 = vld [vmem:[#allocation14 + $0x58] sm:$0xff]  ;;  %v3300_v63 = vld [vmem:[#allocation14 + $0x300] sm:$0xff]  ;;  %v3301_v0 = vld [vmem:[#allocation14 + $0x308] sm:$0xff] }
 0x482   :  { %5665 = vmatprep.subr.bf16.mxu1 %v5664_v33  ;;  %v5712_v33 = vpack.c.bf16 %v3257_v20, %v3256_v19  ;;  %v3247_v19 = vld [vmem:[#allocation14 + $0x158] sm:$0xff]  ;;  %v3232_v20 = vld [vmem:[#allocation14 + $0xe0] sm:$0xff] }
 0x483   :  { %v5726_v30 = vpack.c.bf16 %v3247_v19, %v3246_v16  ;;  %v3288_v19 = vld [vmem:[#allocation14 + $0x2a0] sm:$0xff] }
 0x484   :  { %5539 = vmatpush1.bf16.msra.mxu0 %v5538_v61  ;;  %v5684_v61 = vpack.c.bf16 %v3227_v37, %v3226_v36  ;;  %v3217_v36 = vld [vmem:[#allocation14 + $0x68] sm:$0xff]  ;;  %v3248_v37 = vld [vmem:[#allocation14 + $0x160] sm:$0xff] }
 0x485   :  { %5667 = vmatpush1.bf16.msra.mxu1 %v5666_v48  ;;  %5541 = vmatprep.subr.bf16.mxu0 %v5540_v49  ;;  %v3210_v48 = vld [vmem:[#allocation14 + $0x30] sm:$0xff]  ;;  %v3211_v49 = vld [vmem:[#allocation14 + $0x38] sm:$0xff] }
 0x486   :  { %5669 = vmatprep.subr.bf16.mxu1 %v5668_v11  ;;  %v3228_v11 = vld [vmem:[#allocation14 + $0xc0] sm:$0xff]  ;;  %v5686_v54 = vpack.c.bf16 %v3211_v49, %v3210_v48  ;;  %v3266_v48 = vld [vmem:[#allocation14 + $0x1f0] sm:$0xff]  ;;  %v3267_v49 = vld [vmem:[#allocation14 + $0x1f8] sm:$0xff] }
 0x488   :  { %5543 = vmatpush1.bf16.msra.mxu0 %v5542_v55  ;;  %v5688_v55 = vpack.c.bf16 %v3229_v52, %v3228_v11  ;;  %v3219_v11 = vld [vmem:[#allocation14 + $0x78] sm:$0xff]  ;;  %v5732_v52 = vpack.c.bf16 %v3267_v49, %v3266_v48 }
 0x489   :  { %5671 = vmatpush1.bf16.msra.mxu1 %v5670_v56  ;;  %5673 = vmatprep.subr.bf16.mxu0 %v5672_v57  ;;  %v3212_v56 = vld [vmem:[#allocation14 + $0x40] sm:$0xff]  ;;  %v3213_v57 = vld [vmem:[#allocation14 + $0x48] sm:$0xff] }
 0x48a   :  { %5705 = vmatprep.subr.bf16.mxu1 %v5704_v62  ;;  %v5720_v62 = vpack.c.bf16 %v3261_v4, %v3260_v53  ;;  %v3251_v53 = vld [vmem:[#allocation14 + $0x178] sm:$0xff]  ;;  %v3284_v4 = vld [vmem:[#allocation14 + $0x280] sm:$0xff] }
 0x48b   :  { %3040 = vmatmul.mubr.f32.vlgmr.msra.gmra.mrb[10].mxu0 %v6494_v29 }
 0x48c   :  { %3182 = vmatmul.mubr.f32.vlgmr.msra.gmra.mrb[10].mxu1 %v6494_v29  ;;  %5675 = vmatpush3.bf16.msra.mxu0 %v5674_v3  ;;  %v5682_v29 = vpack.c.bf16 %v3209_v28, %v3208_v27  ;;  %v3262_v3 = vld [vmem:[#allocation14 + $0x1d0] sm:$0xff]  ;;  %v5934_v28 = vadd.f32 %v6514_v6, %v1983_v10  ;;  %v5698_v6 = vpack.c.bf16 %v3217_v36, %v3216_v34  ;;  %v3319_v10 = vld [vmem:[#allocation14 + $0x398] sm:$0xff]  ;;  %v3272_v34 = vld [vmem:[#allocation14 + $0x220] sm:$0xff] }
 0x48d   :  { %3531 = vmatprep.mubr.f32.mxu0 %v6001_v22  ;;  %5707 = vmatpush3.bf16.msra.mxu1 %v5706_v9  ;;  %v5690_v9 = vpack.c.bf16 %v3213_v57, %v3212_v56  ;;  %v3233_v22 = vld [vmem:[#allocation14 + $0xe8] sm:$0xff]  ;;  %v5734_v56 = vpack.c.bf16 %v3251_v53, %v3250_v39  ;;  %v3307_v39 = vld [vmem:[#allocation14 + $0x338] sm:$0xff] }
 0x48e   :  { %3601 = vmatprep.mubr.f32.mxu1 %v6003_v24  ;;  %5677 = vmatprep.subr.bf16.mxu0 %v5676_v14  ;;  %v3214_v14 = vld [vmem:[#allocation14 + $0x50] sm:$0xff]  ;;  %v3264_v24 = vld [vmem:[#allocation14 + $0x1e0] sm:$0xff]  ;;  %v3273_v36 = vld [vmem:[#allocation14 + $0x228] sm:$0xff] }
 0x48f   :  { %5709 = vmatprep.subr.bf16.mxu1 %v5708_v18  ;;  %v5724_v18 = vpack.c.bf16 %v3263_v7, %v3262_v3  ;;  %v5694_v27 = vpack.c.bf16 %v3215_v15, %v3214_v14  ;;  %v3286_v3 = vld [vmem:[#allocation14 + $0x290] sm:$0xff]  ;;  %v3287_v7 = vld [vmem:[#allocation14 + $0x298] sm:$0xff]  ;;  %v5746_v48 = vpack.c.bf16 %v3273_v36, %v3272_v34  ;;  %v3293_v53 = vld [vmem:[#allocation14 + $0x2c8] sm:$0xff] }
 0x490   :  { %5679 = vmatpush3.bf16.msra.mxu0 %v5678_v23  ;;  %v2003_v23 = vrot.slane %v6536_v1, %v2002_v2  ;;  %v3271_v14 = vld [vmem:[#allocation14 + $0x218] sm:$0xff]  ;;  %v3302_v15 = vld [vmem:[#allocation14 + $0x310] sm:$0xff]  ;;  %v5740_v17 = vpack.c.bf16 %v3287_v7, %v3286_v3  ;;  %v3281_v34 = vld [vmem:[#allocation14 + $0x268] sm:$0xff] }
 0x491   :  { %5711 = vmatpush3.bf16.msra.mxu1 %v5710_v25  ;;  %5681 = vmatprep.subr.bf16.mxu0 %v5680_v26  ;;  %v3265_v25 = vld [vmem:[#allocation14 + $0x1e8] sm:$0xff]  ;;  %v5932_v26 = vadd.f32 %v6512_v5, %v1975_v8  ;;  %v3294_v3 = vld [vmem:[#allocation14 + $0x2d0] sm:$0xff]  ;;  %v3295_v7 = vld [vmem:[#allocation14 + $0x2d8] sm:$0xff] }
 0x492   :  { %5713 = vmatprep.subr.bf16.mxu1 %v5712_v33  ;;  %v5696_v33 = vpack.c.bf16 %v3233_v22, %v3232_v20  ;;  %v5728_v45 = vpack.c.bf16 %v3265_v25, %v3264_v24  ;;  %v5939_v5 = vadd.f32 %v6534_v46, %v2003_v23  ;;  %v3316_v46 = vld [vmem:[#allocation14 + $0x380] sm:$0xff]  ;;  %v3289_v20 = vld [vmem:[#allocation14 + $0x2a8] sm:$0xff] }
 0x493   :  { %6004 = vtanh.f32 %v5932_v26  ;;  %v3320_v24 = vld [vmem:[#allocation14 + $0x3a0] sm:$0xff]  ;;  %v3321_v25 = vld [vmem:[#allocation14 + $0x3a8] sm:$0xff] }
 0x494   :  { %5683 = vmatpush3.bf16.msra.mxu0 %v5682_v29  ;;  %v3249_v29 = vld [vmem:[#allocation14 + $0x168] sm:$0xff]  ;;  %6006 = vtanh.f32 %v5934_v28  ;;  %v3312_v36 = vld [vmem:[#allocation14 + $0x360] sm:$0xff] }
 0x495   :  { %5715 = vmatpush3.bf16.msra.mxu1 %v5714_v47  ;;  %5685 = vmatprep.subr.bf16.mxu0 %v5684_v61  ;;  %v3234_v47 = vld [vmem:[#allocation14 + $0xf0] sm:$0xff]  ;;  %v3235_v61 = vld [vmem:[#allocation14 + $0xf8] sm:$0xff]  ;;  %v5730_v31 = vpack.c.bf16 %v3249_v29, %v3248_v37  ;;  %6008 = vtanh.f32 %v5937_v40  ;;  %v3304_v37 = vld [vmem:[#allocation14 + $0x320] sm:$0xff]  ;;  %v5776_v40 = vpack.c.bf16 %v3321_v25, %v3320_v24 }
 0x496   :  { %5717 = vmatprep.subr.bf16.mxu1 %v5716_v50  ;;  %v5700_v50 = vpack.c.bf16 %v3235_v61, %v3234_v47  ;;  %6010 = vtanh.f32 %v5939_v5  ;;  %v3290_v29 = vld [vmem:[#allocation14 + $0x2b0] sm:$0xff]  ;;  %v3291_v47 = vld [vmem:[#allocation14 + $0x2b8] sm:$0xff]  ;;  %v3328_v24 = vld [vmem:[#allocation14 + $0x3e0] sm:$0xff] }
 0x497   :  { %v3322_v61 = vld [vmem:[#allocation14 + $0x3b0] sm:$0xff]  ;;  %v3323_v5 = vld [vmem:[#allocation14 + $0x3b8] sm:$0xff]  ;;  %v3329_v25 = vld [vmem:[#allocation14 + $0x3e8] sm:$0xff] }
 0x498   :  { %5687 = vmatpush3.bf16.msra.mxu0 %v5686_v54  ;;  %v3285_v54 = vld [vmem:[#allocation14 + $0x288] sm:$0xff] }
 0x499   :  { %5719 = vmatpush3.bf16.msra.mxu1 %v5718_v12  ;;  %5689 = vmatprep.subr.bf16.mxu0 %v5688_v55  ;;  %v3317_v12 = vld [vmem:[#allocation14 + $0x388] sm:$0xff]  ;;  %v5702_v55 = vpack.c.bf16 %v3219_v11, %v3218_v43  ;;  %v5736_v57 = vpack.c.bf16 %v3285_v54, %v3284_v4  ;;  %v3306_v43 = vld [vmem:[#allocation14 + $0x330] sm:$0xff]  ;;  %v5780_v11 = vpack.c.bf16 %v3323_v5, %v3322_v61  ;;  %v3324_v4 = vld [vmem:[#allocation14 + $0x3c0] sm:$0xff] }
 0x49a   :  { %5721 = vmatprep.subr.bf16.mxu1 %v5720_v62  ;;  %v3269_v62 = vld [vmem:[#allocation14 + $0x208] sm:$0xff]  ;;  %v5768_v35 = vpack.c.bf16 %v3317_v12, %v3316_v46  ;;  %v1990_v46 = vsub.s32 4, %v6442_v41  ;;  %v3331_v61 = vld [vmem:[#allocation14 + $0x3f8] sm:$0xff] }
 0x49b   :  { %v5738_v8 = vpack.c.bf16 %v3269_v62, %v3268_v59  ;;  %v3325_v54 = vld [vmem:[#allocation14 + $0x3c8] sm:$0xff]  ;;  %v3276_v59 = vld [vmem:[#allocation14 + $0x240] sm:$0xff] }
 0x49c   :  { %5691 = vmatpush3.bf16.msra.mxu0 %v5690_v9  ;;  %v3318_v9 = vld [vmem:[#allocation14 + $0x390] sm:$0xff]  ;;  %v3277_v62 = vld [vmem:[#allocation14 + $0x248] sm:$0xff] }
 0x49d   :  { %5723 = vmatpush3.bf16.msra.mxu1 %v5722_v58  ;;  %5693 = vmatprep.subr.bf16.mxu0 %v5692_v13  ;;  %v5770_v58 = vpack.c.bf16 %v3301_v0, %v3300_v63  ;;  %v3270_v13 = vld [vmem:[#allocation14 + $0x210] sm:$0xff]  ;;  %v6005_v16 = vpop.eup %6004  ;;  %v5772_v23 = vpack.c.bf16 %v3319_v10, %v3318_v9  ;;  %v5784_v63 = vpack.c.bf16 %v3325_v54, %v3324_v4  ;;  %v3309_v0 = vld [vmem:[#allocation14 + $0x348] sm:$0xff]  ;;  %v3327_v9 = vld [vmem:[#allocation14 + $0x3d8] sm:$0xff] }
 0x49e   :  { %5725 = vmatprep.subr.bf16.mxu1 %v5724_v18  ;;  %v3303_v18 = vld [vmem:[#allocation14 + $0x318] sm:$0xff]  ;;  %v6007_v22 = vpop.eup %6006  ;;  %v1991_v10 = vrot.slane %v6536_v1, %v1990_v46 }
 0x49f   :  { %v6009_v26 = vpop.eup %6008 }
 0x4a0   :  { %5695 = vmatpush3.bf16.msra.mxu0 %v5694_v27  ;;  %v5742_v27 = vpack.c.bf16 %v3271_v14, %v3270_v13  ;;  %v6011_v28 = vpop.eup %6010 }
 0x4a1   :  { %5727 = vmatpush3.bf16.msra.mxu1 %v5726_v30  ;;  %5697 = vmatprep.subr.bf16.mxu0 %v5696_v33  ;;  %v5774_v30 = vpack.c.bf16 %v3303_v18, %v3302_v15  ;;  %v5744_v33 = vpack.c.bf16 %v3289_v20, %v3288_v19  ;;  %v5756_v15 = vpack.c.bf16 %v3295_v7, %v3294_v3  ;;  %v3310_v18 = vld [vmem:[#allocation14 + $0x350] sm:$0xff]  ;;  %v3311_v20 = vld [vmem:[#allocation14 + $0x358] sm:$0xff] }
 0x4a2   :  { %5729 = vmatprep.subr.bf16.mxu1 %v5728_v45  ;;  %v3305_v45 = vld [vmem:[#allocation14 + $0x328] sm:$0xff]  ;;  %v3383_v3 = vld [vmem:[#allocation14 + $0x598] sm:$0xff] }
 0x4a3   :  { %v5778_v49 = vpack.c.bf16 %v3305_v45, %v3304_v37  ;;  %v5792_v37 = vpack.c.bf16 %v3329_v25, %v3328_v24  ;;  %v3298_v45 = vld [vmem:[#allocation14 + $0x2f0] sm:$0xff] }
 0x4a4   :  { %5699 = vmatpush3.bf16.msra.mxu0 %v5698_v6  ;;  %v5748_v6 = vpack.c.bf16 %v3291_v47, %v3290_v29  ;;  %v3299_v29 = vld [vmem:[#allocation14 + $0x2f8] sm:$0xff]  ;;  %v3330_v47 = vld [vmem:[#allocation14 + $0x3f0] sm:$0xff] }
 0x4a5   :  { %5731 = vmatpush3.bf16.msra.mxu1 %v5730_v31  ;;  %5701 = vmatprep.subr.bf16.mxu0 %v5700_v50  ;;  %v3274_v31 = vld [vmem:[#allocation14 + $0x230] sm:$0xff]  ;;  %v3275_v50 = vld [vmem:[#allocation14 + $0x238] sm:$0xff]  ;;  %v5764_v5 = vpack.c.bf16 %v3299_v29, %v3298_v45 }
 0x4a6   :  { %5733 = vmatprep.subr.bf16.mxu1 %v5732_v52  ;;  %v3292_v52 = vld [vmem:[#allocation14 + $0x2c0] sm:$0xff]  ;;  %v5750_v12 = vpack.c.bf16 %v3275_v50, %v3274_v31  ;;  %v5796_v31 = vpack.c.bf16 %v3331_v61, %v3330_v47  ;;  %v3315_v50 = vld [vmem:[#allocation14 + $0x378] sm:$0xff]  ;;  %v3338_v47 = vld [vmem:[#allocation14 + $0x430] sm:$0xff] }
 0x4a7   :  { %v3339_v61 = vld [vmem:[#allocation14 + $0x438] sm:$0xff] }
 0x4a8   :  { %5703 = vmatpush3.bf16.msra.mxu0 %v5702_v55  ;;  %v1998_v55 = vsub.s32 6, %v6442_v41 }
 0x4a9   :  { %5735 = vmatpush3.bf16.msra.mxu1 %v5734_v56  ;;  %5737 = vmatprep.subr.bf16.mxu0 %v5736_v57  ;;  %v5782_v56 = vpack.c.bf16 %v3307_v39, %v3306_v43  ;;  %v5752_v57 = vpack.c.bf16 %v3293_v53, %v3292_v52  ;;  %v3348_v43 = vld [vmem:[#allocation14 + $0x480] sm:$0xff]  ;;  %v3381_v52 = vld [vmem:[#allocation14 + $0x588] sm:$0xff] }
 0x4aa   :  { %5769 = vmatprep.subr.bf16.mxu1 %v5768_v35  ;;  %v3308_v35 = vld [vmem:[#allocation14 + $0x340] sm:$0xff]  ;;  %v1999_v13 = vrot.slane %v6536_v1, %v1998_v55 }
 0x4ab   :  { %3532 = vmatmul.mubr.f32.vlgmr.msra.gmra.mrb[12].mxu0 %v6005_v16  ;;  %v5786_v14 = vpack.c.bf16 %v3309_v0, %v3308_v35  ;;  %v3278_v16 = vld [vmem:[#allocation14 + $0x250] sm:$0xff]  ;;  %v3380_v39 = vld [vmem:[#allocation14 + $0x580] sm:$0xff] }
 0x4ac   :  { %3602 = vmatmul.mubr.f32.vlgmr.msra.gmra.mrb[12].mxu1 %v6007_v22  ;;  %5739 = vmatpush3.bf16.msra.mxu0 %v5738_v8  ;;  %v3326_v8 = vld [vmem:[#allocation14 + $0x3d0] sm:$0xff]  ;;  %v3296_v22 = vld [vmem:[#allocation14 + $0x2e0] sm:$0xff]  ;;  %v5938_v1 = vadd.f32 %v6530_v38, %v1999_v13 }
 0x4ad   :  { %3671 = vmatprep.mubr.f32.mxu0 %v6009_v26  ;;  %5771 = vmatpush3.bf16.msra.mxu1 %v5770_v58  ;;  %v5754_v58 = vpack.c.bf16 %v3277_v62, %v3276_v59  ;;  %v5788_v19 = vpack.c.bf16 %v3327_v9, %v3326_v8  ;;  %v5936_v26 = vadd.f32 %v6528_v32, %v1991_v10  ;;  %v3365_v62 = vld [vmem:[#allocation14 + $0x508] sm:$0xff]  ;;  %v3350_v35 = vld [vmem:[#allocation14 + $0x490] sm:$0xff] }
 0x4ae   :  { %3741 = vmatprep.mubr.f32.mxu1 %v6011_v28  ;;  %5741 = vmatprep.subr.bf16.mxu0 %v5740_v17  ;;  %v3279_v17 = vld [vmem:[#allocation14 + $0x258] sm:$0xff]  ;;  %v5790_v28 = vpack.c.bf16 %v3311_v20, %v3310_v18  ;;  %v5832_v59 = vpack.c.bf16 %v3381_v52, %v3380_v39  ;;  %v3382_v0 = vld [vmem:[#allocation14 + $0x590] sm:$0xff]  ;;  %v3353_v18 = vld [vmem:[#allocation14 + $0x4a8] sm:$0xff] }
 0x4af   :  { %5773 = vmatprep.subr.bf16.mxu1 %v5772_v23  ;;  %v3297_v23 = vld [vmem:[#allocation14 + $0x2e8] sm:$0xff]  ;;  %6012 = vtanh.f32 %v5936_v26  ;;  %v3334_v10 = vld [vmem:[#allocation14 + $0x410] sm:$0xff]  ;;  %v3384_v20 = vld [vmem:[#allocation14 + $0x5a0] sm:$0xff] }
 0x4b0   :  { %5743 = vmatpush3.bf16.msra.mxu0 %v5742_v27  ;;  %v5758_v27 = vpack.c.bf16 %v3279_v17, %v3278_v16  ;;  %6014 = vtanh.f32 %v5938_v1  ;;  %v3366_v13 = vld [vmem:[#allocation14 + $0x510] sm:$0xff]  ;;  %v3367_v16 = vld [vmem:[#allocation14 + $0x518] sm:$0xff]  ;;  %v3352_v17 = vld [vmem:[#allocation14 + $0x4a0] sm:$0xff] }
 0x4b1   :  { %5775 = vmatpush3.bf16.msra.mxu1 %v5774_v30  ;;  %5745 = vmatprep.subr.bf16.mxu0 %v5744_v33  ;;  %v5760_v30 = vpack.c.bf16 %v3297_v23, %v3296_v22  ;;  %v3280_v33 = vld [vmem:[#allocation14 + $0x260] sm:$0xff]  ;;  %v3385_v22 = vld [vmem:[#allocation14 + $0x5a8] sm:$0xff]  ;;  %v5838_v24 = vpack.c.bf16 %v3367_v16, %v3366_v13  ;;  %v5808_v25 = vpack.c.bf16 %v3353_v18, %v3352_v17 }
 0x4b2   :  { %5777 = vmatprep.subr.bf16.mxu1 %v5776_v40  ;;  %v3313_v40 = vld [vmem:[#allocation14 + $0x368] sm:$0xff]  ;;  %v5762_v32 = vpack.c.bf16 %v3281_v34, %v3280_v33  ;;  %v3336_v26 = vld [vmem:[#allocation14 + $0x420] sm:$0xff]  ;;  %v3354_v33 = vld [vmem:[#allocation14 + $0x4b0] sm:$0xff] }
 0x4b3   :  { %v5794_v38 = vpack.c.bf16 %v3313_v40, %v3312_v36  ;;  %v3368_v1 = vld [vmem:[#allocation14 + $0x520] sm:$0xff]  ;;  %v3355_v34 = vld [vmem:[#allocation14 + $0x4b8] sm:$0xff]  ;;  %v3386_v36 = vld [vmem:[#allocation14 + $0x5b0] sm:$0xff] }
 0x4b4   :  { %5747 = vmatpush3.bf16.msra.mxu0 %v5746_v48  ;;  %v3282_v48 = vld [vmem:[#allocation14 + $0x270] sm:$0xff]  ;;  %v5812_v29 = vpack.c.bf16 %v3355_v34, %v3354_v33  ;;  %v3340_v39 = vld [vmem:[#allocation14 + $0x440] sm:$0xff]  ;;  %v3341_v52 = vld [vmem:[#allocation14 + $0x448] sm:$0xff] }
 0x4b5   :  { %5779 = vmatpush3.bf16.msra.mxu1 %v5778_v49  ;;  %5749 = vmatprep.subr.bf16.mxu0 %v5748_v6  ;;  %v3283_v49 = vld [vmem:[#allocation14 + $0x278] sm:$0xff]  ;;  %v3314_v6 = vld [vmem:[#allocation14 + $0x370] sm:$0xff]  ;;  %v3361_v13 = vld [vmem:[#allocation14 + $0x4e8] sm:$0xff] }
 0x4b6   :  { %5781 = vmatprep.subr.bf16.mxu1 %v5780_v11  ;;  %v3349_v11 = vld [vmem:[#allocation14 + $0x488] sm:$0xff]  ;;  %v5766_v53 = vpack.c.bf16 %v3283_v49, %v3282_v48  ;;  %v5798_v4 = vpack.c.bf16 %v3315_v50, %v3314_v6  ;;  %v3356_v48 = vld [vmem:[#allocation14 + $0x4c0] sm:$0xff]  ;;  %v5814_v50 = vpack.c.bf16 %v3339_v61, %v3338_v47  ;;  %v3394_v34 = vld [vmem:[#allocation14 + $0x5f0] sm:$0xff] }
 0x4b7   :  { %v5800_v54 = vpack.c.bf16 %v3349_v11, %v3348_v43  ;;  %v3357_v49 = vld [vmem:[#allocation14 + $0x4c8] sm:$0xff]  ;;  %v3388_v6 = vld [vmem:[#allocation14 + $0x5c0] sm:$0xff] }
 0x4b8   :  { %5751 = vmatpush3.bf16.msra.mxu0 %v5750_v12  ;;  %v3332_v12 = vld [vmem:[#allocation14 + $0x400] sm:$0xff]  ;;  %v5816_v11 = vpack.c.bf16 %v3357_v49, %v3356_v48  ;;  %v3393_v16 = vld [vmem:[#allocation14 + $0x5e8] sm:$0xff]  ;;  %v3379_v49 = vld [vmem:[#allocation14 + $0x578] sm:$0xff] }
 0x4b9   :  { %5783 = vmatpush3.bf16.msra.mxu1 %v5782_v56  ;;  %5753 = vmatprep.subr.bf16.mxu0 %v5752_v57  ;;  %v3333_v56 = vld [vmem:[#allocation14 + $0x408] sm:$0xff]  ;;  %v3364_v57 = vld [vmem:[#allocation14 + $0x500] sm:$0xff] }
 0x4ba   :  { %5785 = vmatprep.subr.bf16.mxu1 %v5784_v63  ;;  %v3351_v63 = vld [vmem:[#allocation14 + $0x498] sm:$0xff]  ;;  %v5802_v7 = vpack.c.bf16 %v3333_v56, %v3332_v12  ;;  %v5834_v8 = vpack.c.bf16 %v3365_v62, %v3364_v57  ;;  %v3358_v12 = vld [vmem:[#allocation14 + $0x4d0] sm:$0xff] }
 0x4bb   :  { %v5804_v9 = vpack.c.bf16 %v3351_v63, %v3350_v35  ;;  %v3359_v56 = vld [vmem:[#allocation14 + $0x4d8] sm:$0xff]  ;;  %v3390_v57 = vld [vmem:[#allocation14 + $0x5d0] sm:$0xff]  ;;  %v5818_v35 = vpack.c.bf16 %v3341_v52, %v3340_v39 }
 0x4bc   :  { %5755 = vmatpush3.bf16.msra.mxu0 %v5754_v58  ;;  %v3335_v58 = vld [vmem:[#allocation14 + $0x418] sm:$0xff] }
 0x4bd   :  { %5787 = vmatpush3.bf16.msra.mxu1 %v5786_v14  ;;  %5757 = vmatprep.subr.bf16.mxu0 %v5756_v15  ;;  %v6013_v14 = vpop.eup %6012  ;;  %v5836_v15 = vpack.c.bf16 %v3383_v3, %v3382_v0  ;;  %v5806_v23 = vpack.c.bf16 %v3335_v58, %v3334_v10  ;;  %v6572_v62 = vld [vmem:[#allocation13 + $0x8] sm:$0xff]  ;;  %v5820_v0 = vpack.c.bf16 %v3359_v56, %v3358_v12  ;;  %v3342_v3 = vld [vmem:[#allocation14 + $0x450] sm:$0xff]  ;;  %v3360_v58 = vld [vmem:[#allocation14 + $0x4e0] sm:$0xff] }
 0x4be   :  { %5789 = vmatprep.subr.bf16.mxu1 %v5788_v19  ;;  %v6015_v19 = vpop.eup %6014  ;;  %v3375_v10 = vld [vmem:[#allocation14 + $0x558] sm:$0xff]  ;;  %v2015_v17 = vrot.slane %v6572_v62, %v6464_v21  ;;  %v2011_v18 = vrot.slane %v6572_v62, %v6450_v44  ;;  %v3362_v21 = vld [vmem:[#allocation14 + $0x4f0] sm:$0xff]  ;;  %v3428_v12 = vld [vmem:[#allocation14 + $0x700] sm:$0xff] }
 0x4bf   :  { %v3429_v56 = vld [vmem:[#allocation14 + $0x708] sm:$0xff] }
 0x4c0   :  { %5759 = vmatpush3.bf16.msra.mxu0 %v5758_v27  ;;  %v3337_v27 = vld [vmem:[#allocation14 + $0x428] sm:$0xff] }
 0x4c1   :  { %5791 = vmatpush3.bf16.msra.mxu1 %v5790_v28  ;;  %5761 = vmatprep.subr.bf16.mxu0 %v5760_v30  ;;  %v5840_v28 = vpack.c.bf16 %v3385_v22, %v3384_v20  ;;  %v3369_v30 = vld [vmem:[#allocation14 + $0x528] sm:$0xff]  ;;  %v5810_v40 = vpack.c.bf16 %v3337_v27, %v3336_v26  ;;  %v3344_v20 = vld [vmem:[#allocation14 + $0x460] sm:$0xff]  ;;  %v2019_v22 = vrot.slane %v6572_v62, %v6457_v51 }
 0x4c2   :  { %5793 = vmatprep.subr.bf16.mxu1 %v5792_v37  ;;  %v3387_v37 = vld [vmem:[#allocation14 + $0x5b8] sm:$0xff]  ;;  %v5842_v45 = vpack.c.bf16 %v3369_v30, %v3368_v1  ;;  %v3377_v26 = vld [vmem:[#allocation14 + $0x568] sm:$0xff] }
 0x4c4   :  { %5763 = vmatpush3.bf16.msra.mxu0 %v5762_v32  ;;  %v3370_v32 = vld [vmem:[#allocation14 + $0x530] sm:$0xff] }
 0x4c5   :  { %5795 = vmatpush3.bf16.msra.mxu1 %v5794_v38  ;;  %5765 = vmatprep.subr.bf16.mxu0 %v5764_v5  ;;  %v5844_v38 = vpack.c.bf16 %v3387_v37, %v3386_v36  ;;  %v3371_v5 = vld [vmem:[#allocation14 + $0x538] sm:$0xff] }
 0x4c6   :  { %5797 = vmatprep.subr.bf16.mxu1 %v5796_v31  ;;  %v3389_v31 = vld [vmem:[#allocation14 + $0x5c8] sm:$0xff]  ;;  %v5846_v43 = vpack.c.bf16 %v3371_v5, %v3370_v32  ;;  %v3395_v36 = vld [vmem:[#allocation14 + $0x5f8] sm:$0xff]  ;;  %v3346_v32 = vld [vmem:[#allocation14 + $0x470] sm:$0xff] }
 0x4c7   :  { %v3378_v5 = vld [vmem:[#allocation14 + $0x570] sm:$0xff]  ;;  %v5860_v48 = vpack.c.bf16 %v3395_v36, %v3394_v34 }
 0x4c8   :  { %5767 = vmatpush3.bf16.msra.mxu0 %v5766_v53  ;;  %v3372_v53 = vld [vmem:[#allocation14 + $0x540] sm:$0xff]  ;;  %v5862_v39 = vpack.c.bf16 %v3379_v49, %v3378_v5  ;;  %v3453_v5 = vld [vmem:[#allocation14 + $0x7c8] sm:$0xff] }
 0x4c9   :  { %5799 = vmatpush3.bf16.msra.mxu1 %v5798_v4  ;;  %5801 = vmatprep.subr.bf16.mxu0 %v5800_v54  ;;  %v5848_v4 = vpack.c.bf16 %v3389_v31, %v3388_v6  ;;  %v3373_v54 = vld [vmem:[#allocation14 + $0x548] sm:$0xff]  ;;  %v3412_v6 = vld [vmem:[#allocation14 + $0x680] sm:$0xff] }
 0x4ca   :  { %5833 = vmatprep.subr.bf16.mxu1 %v5832_v59  ;;  %v3391_v59 = vld [vmem:[#allocation14 + $0x5d8] sm:$0xff]  ;;  %v5850_v63 = vpack.c.bf16 %v3373_v54, %v3372_v53  ;;  %v3413_v31 = vld [vmem:[#allocation14 + $0x688] sm:$0xff] }
 0x4cb   :  { %3672 = vmatmul.mubr.f32.vlgmr.msra.gmra.mrb[14].mxu0 %v6013_v14  ;;  %v2007_v14 = vrot.slane %v6572_v62, %v6445_v42  ;;  %v3376_v42 = vld [vmem:[#allocation14 + $0x560] sm:$0xff]  ;;  %v5864_v52 = vpack.c.bf16 %v3413_v31, %v3412_v6  ;;  %v3397_v54 = vld [vmem:[#allocation14 + $0x608] sm:$0xff] }
 0x4cc   :  { %3742 = vmatmul.mubr.f32.vlgmr.msra.gmra.mrb[14].mxu1 %v6015_v19  ;;  %5803 = vmatpush3.bf16.msra.mxu0 %v5802_v7  ;;  %v3343_v7 = vld [vmem:[#allocation14 + $0x458] sm:$0xff]  ;;  %v3404_v31 = vld [vmem:[#allocation14 + $0x640] sm:$0xff] }
 0x4cd   :  { %5835 = vmatpush3.bf16.msra.mxu1 %v5834_v8  ;;  %5805 = vmatprep.subr.bf16.mxu0 %v5804_v9  ;;  %v3374_v8 = vld [vmem:[#allocation14 + $0x550] sm:$0xff]  ;;  %v5852_v9 = vpack.c.bf16 %v3391_v59, %v3390_v57  ;;  %v5822_v19 = vpack.c.bf16 %v3343_v7, %v3342_v3  ;;  %v3415_v59 = vld [vmem:[#allocation14 + $0x698] sm:$0xff] }
 0x4ce   :  { %5837 = vmatprep.subr.bf16.mxu1 %v5836_v15  ;;  %v3392_v15 = vld [vmem:[#allocation14 + $0x5e0] sm:$0xff]  ;;  %v3414_v57 = vld [vmem:[#allocation14 + $0x690] sm:$0xff] }
 0x4cf   :  { %v5856_v1 = vpack.c.bf16 %v3393_v16, %v3392_v15  ;;  %v3431_v16 = vld [vmem:[#allocation14 + $0x718] sm:$0xff] }
 0x4d0   :  { %5807 = vmatpush3.bf16.msra.mxu0 %v5806_v23  ;;  %v5854_v23 = vpack.c.bf16 %v3375_v10, %v3374_v8  ;;  %v5898_v8 = vpack.c.bf16 %v3429_v56, %v3428_v12  ;;  %v3398_v10 = vld [vmem:[#allocation14 + $0x610] sm:$0xff] }
 0x4d1   :  { %5839 = vmatpush3.bf16.msra.mxu1 %v5838_v24  ;;  %5809 = vmatprep.subr.bf16.mxu0 %v5808_v25  ;;  %v5824_v24 = vpack.c.bf16 %v3361_v13, %v3360_v58  ;;  %v3345_v25 = vld [vmem:[#allocation14 + $0x468] sm:$0xff]  ;;  %v3399_v58 = vld [vmem:[#allocation14 + $0x618] sm:$0xff]  ;;  %v3430_v13 = vld [vmem:[#allocation14 + $0x710] sm:$0xff] }
 0x4d2   :  { %5841 = vmatprep.subr.bf16.mxu1 %v5840_v28  ;;  %v3363_v28 = vld [vmem:[#allocation14 + $0x4f8] sm:$0xff]  ;;  %v5826_v51 = vpack.c.bf16 %v3345_v25, %v3344_v20  ;;  %v3448_v20 = vld [vmem:[#allocation14 + $0x7a0] sm:$0xff] }
 0x4d3   :  { %v5828_v61 = vpack.c.bf16 %v3363_v28, %v3362_v21  ;;  %v3433_v21 = vld [vmem:[#allocation14 + $0x728] sm:$0xff]  ;;  %v3418_v28 = vld [vmem:[#allocation14 + $0x6b0] sm:$0xff] }
 0x4d4   :  { %5811 = vmatpush3.bf16.msra.mxu0 %v5810_v40 }
 0x4d5   :  { %5843 = vmatpush3.bf16.msra.mxu1 %v5842_v45  ;;  %5813 = vmatprep.subr.bf16.mxu0 %v5812_v29  ;;  %v5858_v45 = vpack.c.bf16 %v3377_v26, %v3376_v42  ;;  %v3400_v42 = vld [vmem:[#allocation14 + $0x620] sm:$0xff]  ;;  %v3401_v26 = vld [vmem:[#allocation14 + $0x628] sm:$0xff] }
 0x4d6   :  { %5845 = vmatprep.subr.bf16.mxu1 %v5844_v38  ;;  %v3347_v38 = vld [vmem:[#allocation14 + $0x478] sm:$0xff]  ;;  %v5874_v34 = vpack.c.bf16 %v3401_v26, %v3400_v42 }
 0x4d8   :  { %5815 = vmatpush3.bf16.msra.mxu0 %v5814_v50  ;;  %v3444_v50 = vld [vmem:[#allocation14 + $0x780] sm:$0xff] }
 0x4d9   :  { %5847 = vmatpush3.bf16.msra.mxu1 %v5846_v43  ;;  %5817 = vmatprep.subr.bf16.mxu0 %v5816_v11  ;;  %v3445_v43 = vld [vmem:[#allocation14 + $0x788] sm:$0xff]  ;;  %v5830_v11 = vpack.c.bf16 %v3347_v38, %v3346_v32  ;;  %v3452_v38 = vld [vmem:[#allocation14 + $0x7c0] sm:$0xff] }
 0x4da   :  { %5849 = vmatprep.subr.bf16.mxu1 %v5848_v4  ;;  %v5896_v53 = vpack.c.bf16 %v3445_v43, %v3444_v50  ;;  %v3396_v4 = vld [vmem:[#allocation14 + $0x600] sm:$0xff]  ;;  %v3421_v32 = vld [vmem:[#allocation14 + $0x6c8] sm:$0xff] }
 0x4db   :  { %v5866_v3 = vpack.c.bf16 %v3397_v54, %v3396_v4  ;;  %v3405_v50 = vld [vmem:[#allocation14 + $0x648] sm:$0xff]  ;;  %v3436_v43 = vld [vmem:[#allocation14 + $0x740] sm:$0xff]  ;;  %v3454_v4 = vld [vmem:[#allocation14 + $0x7d0] sm:$0xff] }
 0x4dc   :  { %5819 = vmatpush3.bf16.msra.mxu0 %v5818_v35  ;;  %v3446_v35 = vld [vmem:[#allocation14 + $0x790] sm:$0xff]  ;;  %v3455_v54 = vld [vmem:[#allocation14 + $0x7d8] sm:$0xff]  ;;  %v5882_v12 = vpack.c.bf16 %v3405_v50, %v3404_v31 }
 0x4dd   :  { %5851 = vmatpush3.bf16.msra.mxu1 %v5850_v63  ;;  %5821 = vmatprep.subr.bf16.mxu0 %v5820_v0  ;;  %v3447_v63 = vld [vmem:[#allocation14 + $0x798] sm:$0xff] }
 0x4de   :  { %v2757_v27 = vpop.f32.mrb[8].mxu0  ;;  %5853 = vmatprep.subr.bf16.mxu1 %v5852_v9  ;;  %v5868_v9 = vpack.c.bf16 %v3415_v59, %v3414_v57  ;;  %v5900_v15 = vpack.c.bf16 %v3447_v63, %v3446_v35  ;;  %v3406_v59 = vld [vmem:[#allocation14 + $0x650] sm:$0xff]  ;;  %v3407_v35 = vld [vmem:[#allocation14 + $0x658] sm:$0xff] }
 0x4df   :  { %v5940_v30 = vadd.f32 %v2757_v27, %v2007_v14  ;;  %v2899_v44 = vpop.f32.mrb[8].mxu1  ;;  %v2759_v33 = vpop.f32.mrb[9].mxu0  ;;  %v3432_v27 = vld [vmem:[#allocation14 + $0x720] sm:$0xff]  ;;  %v3438_v63 = vld [vmem:[#allocation14 + $0x750] sm:$0xff] }
 0x4e0   :  { %v5941_v37 = vadd.f32 %v2759_v33, %v2011_v18  ;;  %v2901_v40 = vpop.f32.mrb[9].mxu1  ;;  %5823 = vmatpush3.bf16.msra.mxu0 %v5822_v19  ;;  %v5942_v29 = vadd.f32 %v2899_v44, %v2015_v17  ;;  %v3416_v17 = vld [vmem:[#allocation14 + $0x6a0] sm:$0xff]  ;;  %v3417_v18 = vld [vmem:[#allocation14 + $0x6a8] sm:$0xff]  ;;  %v3450_v44 = vld [vmem:[#allocation14 + $0x7b0] sm:$0xff]  ;;  %v5906_v36 = vpack.c.bf16 %v3433_v21, %v3432_v27 }
 0x4e1   :  { %v5943_v47 = vadd.f32 %v2901_v40, %v2019_v22  ;;  %5855 = vmatpush3.bf16.msra.mxu1 %v5854_v23  ;;  %5825 = vmatprep.subr.bf16.mxu0 %v5824_v24  ;;  %6016 = vtanh.f32 %v5940_v30  ;;  %v3449_v22 = vld [vmem:[#allocation14 + $0x7a8] sm:$0xff]  ;;  %v5870_v23 = vpack.c.bf16 %v3399_v58, %v3398_v10  ;;  %v5902_v24 = vpack.c.bf16 %v3431_v16, %v3430_v13  ;;  %v3419_v30 = vld [vmem:[#allocation14 + $0x6b8] sm:$0xff]  ;;  %v3402_v40 = vld [vmem:[#allocation14 + $0x630] sm:$0xff] }
 0x4e2   :  { %5857 = vmatprep.subr.bf16.mxu1 %v5856_v1  ;;  %6018 = vtanh.f32 %v5941_v37  ;;  %v5872_v25 = vpack.c.bf16 %v3417_v18, %v3416_v17  ;;  %v5904_v1 = vpack.c.bf16 %v3449_v22, %v3448_v20  ;;  %v3451_v33 = vld [vmem:[#allocation14 + $0x7b8] sm:$0xff]  ;;  %v5876_v37 = vpack.c.bf16 %v3419_v30, %v3418_v28  ;;  %v3457_v10 = vld [vmem:[#allocation14 + $0x7e8] sm:$0xff]  ;;  %v3440_v17 = vld [vmem:[#allocation14 + $0x760] sm:$0xff] }
 0x4e3   :  { %6020 = vtanh.f32 %v5943_v47  ;;  %v3435_v47 = vld [vmem:[#allocation14 + $0x738] sm:$0xff]  ;;  %v5886_v58 = vpack.c.bf16 %v3407_v35, %v3406_v59  ;;  %v3409_v16 = vld [vmem:[#allocation14 + $0x668] sm:$0xff]  ;;  %v3426_v20 = vld [vmem:[#allocation14 + $0x6f0] sm:$0xff] }
 0x4e4   :  { %5827 = vmatpush3.bf16.msra.mxu0 %v5826_v51  ;;  %6022 = vtanh.f32 %v5942_v29  ;;  %v3403_v51 = vld [vmem:[#allocation14 + $0x638] sm:$0xff]  ;;  %v5908_v29 = vpack.c.bf16 %v3451_v33, %v3450_v44  ;;  %v3410_v27 = vld [vmem:[#allocation14 + $0x670] sm:$0xff] }
 0x4e5   :  { %5859 = vmatpush3.bf16.msra.mxu1 %v5858_v45  ;;  %5829 = vmatprep.subr.bf16.mxu0 %v5828_v61  ;;  %v3434_v45 = vld [vmem:[#allocation14 + $0x730] sm:$0xff]  ;;  %v3420_v61 = vld [vmem:[#allocation14 + $0x6c0] sm:$0xff]  ;;  %v3427_v22 = vld [vmem:[#allocation14 + $0x6f8] sm:$0xff] }
 0x4e6   :  { %5861 = vmatprep.subr.bf16.mxu1 %v5860_v48  ;;  %v5878_v48 = vpack.c.bf16 %v3403_v51, %v3402_v40  ;;  %v5910_v49 = vpack.c.bf16 %v3435_v47, %v3434_v45  ;;  %v5880_v6 = vpack.c.bf16 %v3421_v32, %v3420_v61  ;;  %v5892_v26 = vpack.c.bf16 %v3427_v22, %v3426_v20  ;;  %v3442_v28 = vld [vmem:[#allocation14 + $0x770] sm:$0xff]  ;;  %v3443_v30 = vld [vmem:[#allocation14 + $0x778] sm:$0xff] }
 0x4e7   :  { %v5926_v33 = vpack.c.bf16 %v3443_v30, %v3442_v28  ;;  %v2035_v40 = vrot.slane %v6572_v62, %v2002_v2 }
 0x4e8   :  { %5831 = vmatpush3.bf16.msra.mxu0 %v5830_v11  ;;  %v5912_v11 = vpack.c.bf16 %v3453_v5, %v3452_v38 }
 0x4e9   :  { %5863 = vmatpush3.bf16.msra.mxu1 %v5862_v39  ;;  %5865 = vmatprep.subr.bf16.mxu0 %v5864_v52  ;;  %v3437_v39 = vld [vmem:[#allocation14 + $0x748] sm:$0xff]  ;;  %v3422_v52 = vld [vmem:[#allocation14 + $0x6d0] sm:$0xff] }
 0x4ea   :  { %5897 = vmatprep.subr.bf16.mxu1 %v5896_v53  ;;  %v3423_v53 = vld [vmem:[#allocation14 + $0x6d8] sm:$0xff]  ;;  %v5914_v56 = vpack.c.bf16 %v3437_v39, %v3436_v43 }
 0x4eb   :  { %v6017_v0 = vpop.eup %6016  ;;  %v5884_v57 = vpack.c.bf16 %v3423_v53, %v3422_v52 }
 0x4ec   :  { %v6019_v7 = vpop.eup %6018 }
 0x4ed   :  { %v6021_v14 = vpop.eup %6020  ;;  %3811 = vmatprep.mubr.f32.mxu0 %v6019_v7  ;;  %v3424_v7 = vld [vmem:[#allocation14 + $0x6e0] sm:$0xff] }
 0x4ee   :  { %v6023_v19 = vpop.eup %6022  ;;  %3881 = vmatprep.mubr.f32.mxu1 %v6021_v14  ;;  %3812 = vmatmul.mubr.f32.vlgmr.msra.gmra.mrb[16].mxu0 %v6017_v0  ;;  %v5916_v0 = vpack.c.bf16 %v3455_v54, %v3454_v4 }
 0x4ef   :  { %3882 = vmatmul.mubr.f32.vlgmr.msra.gmra.mrb[16].mxu1 %v6023_v19  ;;  %5867 = vmatpush3.bf16.msra.mxu0 %v5866_v3  ;;  %v3439_v3 = vld [vmem:[#allocation14 + $0x758] sm:$0xff]  ;;  %v3441_v19 = vld [vmem:[#allocation14 + $0x768] sm:$0xff] }
 0x4f0   :  { %5899 = vmatpush3.bf16.msra.mxu1 %v5898_v8  ;;  %5869 = vmatprep.subr.bf16.mxu0 %v5868_v9  ;;  %v3425_v8 = vld [vmem:[#allocation14 + $0x6e8] sm:$0xff]  ;;  %v3456_v9 = vld [vmem:[#allocation14 + $0x7e0] sm:$0xff]  ;;  %v5918_v13 = vpack.c.bf16 %v3439_v3, %v3438_v63  ;;  %v5922_v42 = vpack.c.bf16 %v3441_v19, %v3440_v17 }
 0x4f1   :  { %5901 = vmatprep.subr.bf16.mxu1 %v5900_v15  ;;  %v5888_v14 = vpack.c.bf16 %v3425_v8, %v3424_v7  ;;  %v3408_v15 = vld [vmem:[#allocation14 + $0x660] sm:$0xff]  ;;  %v5920_v18 = vpack.c.bf16 %v3457_v10, %v3456_v9 }
 0x4f3   :  { %5871 = vmatpush3.bf16.msra.mxu0 %v5870_v23  ;;  %v3458_v23 = vld [vmem:[#allocation14 + $0x7f0] sm:$0xff] }
 0x4f4   :  { %5903 = vmatpush3.bf16.msra.mxu1 %v5902_v24  ;;  %5873 = vmatprep.subr.bf16.mxu0 %v5872_v25  ;;  %v3459_v24 = vld [vmem:[#allocation14 + $0x7f8] sm:$0xff]  ;;  %v5890_v25 = vpack.c.bf16 %v3409_v16, %v3408_v15 }
 0x4f5   :  { %5905 = vmatprep.subr.bf16.mxu1 %v5904_v1  ;;  %v3411_v1 = vld [vmem:[#allocation14 + $0x678] sm:$0xff]  ;;  %v5924_v21 = vpack.c.bf16 %v3459_v24, %v3458_v23 }
 0x4f6   :  { %v5894_v44 = vpack.c.bf16 %v3411_v1, %v3410_v27 }
 0x4f7   :  { %5875 = vmatpush3.bf16.msra.mxu0 %v5874_v34  ;;  %v2023_v34 = vrot.slane %v6572_v62, %v1990_v46 }
 0x4f8   :  { %5907 = vmatpush3.bf16.msra.mxu1 %v5906_v36  ;;  %5877 = vmatprep.subr.bf16.mxu0 %v5876_v37  ;;  %v2027_v36 = vrot.slane %v6572_v62, %v1994_v60  ;;  %v2031_v37 = vrot.slane %v6572_v62, %v1998_v55  ;;  %v4047_v62 = vld [vmem:[#allocation16] ss:$0 sm:$0xff] }
 0x4f9   :  { %5909 = vmatprep.subr.bf16.mxu1 %v5908_v29 }
 0x4fb   :  { %5879 = vmatpush3.bf16.msra.mxu0 %v5878_v48 }
 0x4fc   :  { %5911 = vmatpush3.bf16.msra.mxu1 %v5910_v49  ;;  %5881 = vmatprep.subr.bf16.mxu0 %v5880_v6 }
 0x4fd   :  { %5913 = vmatprep.subr.bf16.mxu1 %v5912_v11 }
 0x4ff   :  { %5883 = vmatpush3.bf16.msra.mxu0 %v5882_v12 }
 0x500   :  { %5915 = vmatpush3.bf16.msra.mxu1 %v5914_v56  ;;  %5885 = vmatprep.subr.bf16.mxu0 %v5884_v57 }
 0x501   :  { %5917 = vmatprep.subr.bf16.mxu1 %v5916_v0 }
 0x503   :  { %5887 = vmatpush3.bf16.msra.mxu0 %v5886_v58 }
 0x504   :  { %5919 = vmatpush3.bf16.msra.mxu1 %v5918_v13  ;;  %5889 = vmatprep.subr.bf16.mxu0 %v5888_v14 }
 0x505   :  { %5921 = vmatprep.subr.bf16.mxu1 %v5920_v18 }
 0x507   :  { %5891 = vmatpush3.bf16.msra.mxu0 %v5890_v25 }
 0x508   :  { %5923 = vmatpush3.bf16.msra.mxu1 %v5922_v42  ;;  %5893 = vmatprep.subr.bf16.mxu0 %v5892_v26 }
 0x509   :  { %5925 = vmatprep.subr.bf16.mxu1 %v5924_v21 }
 0x50b   :  { %5895 = vmatpush3.bf16.msra.mxu0 %v5894_v44 }
 0x50c   :  { %5927 = vmatpush3.bf16.msra.mxu1 %v5926_v33 }
 0x55e   :  { %v3041_v51 = vpop.f32.mrb[10].mxu0 }
 0x55f   :  { %v5944_v45 = vadd.f32 %v3041_v51, %v2023_v34  ;;  %v3183_v29 = vpop.f32.mrb[10].mxu1  ;;  %v3043_v47 = vpop.f32.mrb[11].mxu0 }
 0x560   :  { %v5945_v61 = vadd.f32 %v3043_v47, %v2027_v36  ;;  %v3185_v32 = vpop.f32.mrb[11].mxu1  ;;  %v5946_v38 = vadd.f32 %v3183_v29, %v2031_v37 }
 0x561   :  { %v5947_v46 = vadd.f32 %v3185_v32, %v2035_v40  ;;  %6024 = vtanh.f32 %v5944_v45 }
 0x562   :  { %6026 = vtanh.f32 %v5945_v61 }
 0x563   :  { %6028 = vtanh.f32 %v5947_v46 }
 0x564   :  { %6030 = vtanh.f32 %v5946_v38 }
 0x56b   :  { %v6025_v60 = vpop.eup %6024 }
 0x56c   :  { %v6027_v5 = vpop.eup %6026 }
 0x56d   :  { %v6029_v48 = vpop.eup %6028  ;;  %3951 = vmatprep.mubr.f32.mxu0 %v6027_v5 }
 0x56e   :  { %v6031_v55 = vpop.eup %6030  ;;  %4021 = vmatprep.mubr.f32.mxu1 %v6029_v48  ;;  %3952 = vmatmul.mubr.f32.vlgmr.msra.gmra.mrb[18].mxu0 %v6025_v60 }
 0x56f   :  { %4022 = vmatmul.mubr.f32.vlgmr.msra.gmra.mrb[18].mxu1 %v6031_v55 }
 0x57e   :  { %v4080_v41 = vpop.f32.mrb[12].mxu0 }
 0x57f   :  { %v4115_v2 = vpop.f32.mrb[12].mxu1  ;;  %v4081_v49 = vpop.f32.mrb[13].mxu0 }
 0x580   :  { %v4082_v6 = vadd.f32 %v4081_v49, %v4080_v41  ;;  %v4116_v31 = vpop.f32.mrb[13].mxu1 }
 0x581   :  { %v4117_v50 = vadd.f32 %v4116_v31, %v4115_v2 }
 0x582   :  { %v3534_v43 = vadd.f32 %v4082_v6, %v4047_v62 }
 0x584   :  { %v3604_v11 = vadd.f32 %v4117_v50, %v3534_v43 }
 0x59e   :  { %v4150_v39 = vpop.f32.mrb[14].mxu0 }
 0x59f   :  { %v4185_v52 = vpop.f32.mrb[14].mxu1  ;;  %v4151_v53 = vpop.f32.mrb[15].mxu0 }
 0x5a0   :  { %v4152_v4 = vadd.f32 %v4151_v53, %v4150_v39  ;;  %v4186_v54 = vpop.f32.mrb[15].mxu1 }
 0x5a1   :  { %v4187_v12 = vadd.f32 %v4186_v54, %v4185_v52 }
 0x5a2   :  { %v3674_v56 = vadd.f32 %v4152_v4, %v3604_v11 }
 0x5a4   :  { %v3744_v57 = vadd.f32 %v4187_v12, %v3674_v56 }
 0x5c1   :  { %v4220_v59 = vpop.f32.mrb[16].mxu0 }
 0x5c2   :  { %v4255_v35 = vpop.f32.mrb[16].mxu1  ;;  %v4221_v63 = vpop.f32.mrb[17].mxu0 }
 0x5c3   :  { %v4222_v0 = vadd.f32 %v4221_v63, %v4220_v59  ;;  %v4256_v3 = vpop.f32.mrb[17].mxu1 }
 0x5c4   :  { %v4257_v7 = vadd.f32 %v4256_v3, %v4255_v35 }
 0x5c5   :  { %v3814_v8 = vadd.f32 %v4222_v0, %v3744_v57 }
 0x5c7   :  { %v3884_v9 = vadd.f32 %v4257_v7, %v3814_v8 }
 0x641   :  { %v4290_v10 = vpop.f32.mrb[18].mxu0 }
 0x642   :  { %v4325_v58 = vpop.f32.mrb[18].mxu1  ;;  %v4291_v13 = vpop.f32.mrb[19].mxu0 }
 0x643   :  { %v4292_v14 = vadd.f32 %v4291_v13, %v4290_v10  ;;  %v4326_v15 = vpop.f32.mrb[19].mxu1 }
 0x644   :  { %v4327_v16 = vadd.f32 %v4326_v15, %v4325_v58 }
 0x645   :  { %v3954_v17 = vadd.f32 %v4292_v14, %v3884_v9 }
 0x647   :  { %v4024_v18 = vadd.f32 %v4327_v16, %v3954_v17 }
 0x649   :  { %4027 = vst [vmem:[#allocation17] sm:$0xff] %v4024_v18 }
 0x64a   :  { %6241 = shalt.err (!%p6238_p6)
}
 0x64b   :  { %s6242_s21 = scalar_lea.hbm %s6615_s9, 128 }
 0x64c   :  { %p6243_p7 = scmp.ne.s32.totalorder %s6615_s9, %s6242_s21  ;;  %p6246_p8 = scmp.lt.u32.totalorder %s6242_s21, %s6615_s9 }
 0x64e   :  { %p6248_p9 = pnand %p6246_p8, %p6243_p7 }
 0x650   :  { %6251 = shalt.err (!%p6248_p9)
}
 0x651   :  { %4037 = dma.vmem_to_hbm [thread:$0]  %s4035_s3, 128, %s6615_s9, [#allocation4]  }
 0x652   :  { %6262 = dma.done.wait [#allocation4], 128  }
 0x653   :  { %6263 = vsyncadd [#allocation4], 4294967168 }
 0x654   :  { %4041 = vsyncpa [#allocation3], 1 }
 0x655   :  { %4042 = vsyncpa [#allocation6], 1 }
 0x656   :  { %4043 = vsyncpa [#allocation9], 1 }
 0x657   :  { %4044 = vsyncpa [#allocation12], 1 }
 0x658   :  { %4045 = vsyncpa [#allocation15], 1 }
 0x659   :  { %4046 = vsyncpa [#allocation4], 1 }

</bundles_post_ra>
